<compile_context>
chip_gen: v7x
topology: tpu7x:2x2x1
jax: 0.10.0
libtpu: 0.0.40
codegen_flags: <defaults>
</compile_context>

<pallas_src>
import jax
import jax.numpy as jnp
from jax.experimental import pallas as pl
from jax.experimental.pallas import tpu as pltpu

_PADL = 8  # left halo width in the padded scratch (sublane-aligned interior)


def _basic_block_kernel(x_ref, w1_ref, b1_ref, w2_ref, b2_ref, o_ref,
                        xp_ref, hp_ref):
    """Fused BasicBlock forward for one batch element (stride=1, identity skip).

    x_ref : (1, H, W, C)          input tile, channels-last
    w1_ref: (9, C, C)             conv1 weight (tap = kh*3+kw), BN1 scale folded in
    b1_ref: (1, C)                folded BN1 bias
    w2_ref: (9, C, C)             conv2 weight, BN2 scale folded in
    b2_ref: (1, C)                folded BN2 bias
    o_ref : (1, H*W, C)           output tile (flattened spatial)
    xp_ref: (H+2, W+2*_PADL, C)   VMEM scratch: zero-halo padded input
    hp_ref: (H+2, W+2*_PADL, C)   VMEM scratch: zero-halo padded intermediate
    """
    _, H, W, C = x_ref.shape
    x = x_ref[0]                                        # (H, W, C)

    def conv3x3(src_ref, w_ref):
        # 3x3 stride-1 conv as 9 shifted (H*W, C) @ (C, C) MXU matmuls, reading
        # the shifted windows directly out of the zero-padded scratch.
        acc = jnp.zeros((H * W, C), jnp.float32)
        for kh in range(3):
            for kw in range(3):
                c0 = _PADL - 1 + kw
                patch = src_ref[kh:kh + H, c0:c0 + W, :]
                acc += jnp.dot(patch.reshape(H * W, C), w_ref[kh * 3 + kw],
                               preferred_element_type=jnp.float32)
        return acc

    # ---- stage 1: h = relu(bn1(conv1(x))) ---------------------------------
    xp_ref[...] = jnp.zeros_like(xp_ref)                # zero halo (re-done per step; scratch persists)
    xp_ref[1:H + 1, _PADL:_PADL + W, :] = x             # sublane-aligned interior store
    h = jnp.maximum(conv3x3(xp_ref, w1_ref) + b1_ref[...], 0.0)

    # ---- stage 2: out = relu(bn2(conv2(h)) + x) ----------------------------
    hp_ref[...] = jnp.zeros_like(hp_ref)
    hp_ref[1:H + 1, _PADL:_PADL + W, :] = h.reshape(H, W, C)
    out = conv3x3(hp_ref, w2_ref) + b2_ref[...] + x.reshape(H * W, C)
    o_ref[0] = jnp.maximum(out, 0.0).astype(o_ref.dtype)


def _fold_bn(gamma, beta, mean, var, eps=1e-5):
    scale = gamma / jnp.sqrt(var + eps)
    return scale, beta - mean * scale


def _prep_weight(w_oihw, scale):
    # PyTorch OIHW (O, I, 3, 3) -> (kh*3+kw, I, O), with the BN scale (per O)
    # folded into the weight so the kernel only applies a bias.
    o, i = w_oihw.shape[0], w_oihw.shape[1]
    w = jnp.transpose(w_oihw, (2, 3, 1, 0)).reshape(9, i, o)
    return w * scale[None, None, :]


@jax.jit
def basic_block_forward(x_nchw, params):
    """BasicBlock forward. x_nchw: (N, C, H, W) float32 -> (N, C, H, W)."""
    N, C, H, W = x_nchw.shape
    planes = params["conv1_w"].shape[0]
    # TODO(synk): stride != 1 / downsample branch not implemented (identity skip only).
    assert params["conv1_w"].shape[1] == C and planes == C, (
        "kernel assumes inplanes == planes, stride=1, downsample=None")

    s1, b1 = _fold_bn(params["bn1_gamma"], params["bn1_beta"],
                      params["bn1_mean"], params["bn1_var"])
    s2, b2 = _fold_bn(params["bn2_gamma"], params["bn2_beta"],
                      params["bn2_mean"], params["bn2_var"])
    w1 = _prep_weight(params["conv1_w"], s1)
    w2 = _prep_weight(params["conv2_w"], s2)
    b1 = b1.reshape(1, planes)
    b2 = b2.reshape(1, planes)

    x = jnp.transpose(x_nchw, (0, 2, 3, 1))             # NCHW -> NHWC

    out = pl.pallas_call(
        _basic_block_kernel,
        out_shape=jax.ShapeDtypeStruct((N, H * W, planes), jnp.float32),
        grid_spec=pltpu.PrefetchScalarGridSpec(
            num_scalar_prefetch=0,
            grid=(N,),
            in_specs=[
                pl.BlockSpec((1, H, W, C), lambda n: (n, 0, 0, 0)),
                pl.BlockSpec((9, C, planes), lambda n: (0, 0, 0)),
                pl.BlockSpec((1, planes), lambda n: (0, 0)),
                pl.BlockSpec((9, planes, planes), lambda n: (0, 0, 0)),
                pl.BlockSpec((1, planes), lambda n: (0, 0)),
            ],
            out_specs=pl.BlockSpec((1, H * W, planes), lambda n: (n, 0, 0)),
            scratch_shapes=[
                pltpu.VMEM((H + 2, W + 2 * _PADL, C), jnp.float32),
                pltpu.VMEM((H + 2, W + 2 * _PADL, planes), jnp.float32),
            ],
        ),
        compiler_params=pltpu.CompilerParams(
            dimension_semantics=("parallel",)),
    )(x, w1, b1, w2, b2)

    out = out.reshape(N, H, W, planes)                  # free (same bits)
    return jnp.transpose(out, (0, 3, 1, 2))             # NHWC -> NCHW


# ----------------------- plain-JAX reference (for checking) -----------------
def _ref_forward(x_nchw, params):
    def conv(x, w):
        return jax.lax.conv_general_dilated(
            x, w, window_strides=(1, 1), padding=((1, 1), (1, 1)),
            dimension_numbers=("NCHW", "OIHW", "NCHW"))

    def bn(x, g, b, m, v, eps=1e-5):
        g = g.reshape(1, -1, 1, 1); b = b.reshape(1, -1, 1, 1)
        m = m.reshape(1, -1, 1, 1); v = v.reshape(1, -1, 1, 1)
        return (x - m) / jnp.sqrt(v + eps) * g + b

    identity = x_nchw
    out = conv(x_nchw, params["conv1_w"])
    out = bn(out, params["bn1_gamma"], params["bn1_beta"],
             params["bn1_mean"], params["bn1_var"])
    out = jnp.maximum(out, 0.0)
    out = conv(out, params["conv2_w"])
    out = bn(out, params["bn2_gamma"], params["bn2_beta"],
             params["bn2_mean"], params["bn2_var"])
    out = out + identity
    return jnp.maximum(out, 0.0)


if __name__ == "__main__":
    # BasicBlock(inplanes=8, planes=8, stride=1, downsample=None), eval mode.
    N, C, H, W = 2, 8, 16, 16
    planes = C

    key = jax.random.PRNGKey(0)
    k_x, k_w1, k_w2, k_g1, k_b1, k_g2, k_b2, k_m1, k_m2 = jax.random.split(key, 9)

    x = jax.random.normal(k_x, (N, C, H, W), jnp.float32)

    params = {
        "conv1_w": jax.random.normal(k_w1, (planes, C, 3, 3), jnp.float32) * 0.1,
        "conv2_w": jax.random.normal(k_w2, (planes, planes, 3, 3), jnp.float32) * 0.1,
        "bn1_gamma": 1.0 + 0.1 * jax.random.normal(k_g1, (planes,), jnp.float32),
        "bn1_beta": 0.1 * jax.random.normal(k_b1, (planes,), jnp.float32),
        "bn1_mean": 0.05 * jax.random.normal(k_m1, (planes,), jnp.float32),
        "bn1_var": jnp.ones((planes,), jnp.float32) * 1.2,
        "bn2_gamma": 1.0 + 0.1 * jax.random.normal(k_g2, (planes,), jnp.float32),
        "bn2_beta": 0.1 * jax.random.normal(k_b2, (planes,), jnp.float32),
        "bn2_mean": 0.05 * jax.random.normal(k_m2, (planes,), jnp.float32),
        "bn2_var": jnp.ones((planes,), jnp.float32) * 0.9,
    }

    out = jax.block_until_ready(basic_block_forward(x, params))
    ref = jax.block_until_ready(_ref_forward(x, params))

    assert out.shape == (N, C, H, W)
    assert jnp.allclose(out, ref, atol=1e-4, rtol=1e-4), (
        float(jnp.max(jnp.abs(out - ref))))

    print("KERNEL_OK")
</pallas_src>

<mosaic_0001>
module attributes {stable_mosaic.version = 11 : i64} {
  func.func @_basic_block_kernel(%arg0: i32, %arg1: memref<1x16x16x8xf32, #tpu.memory_space<vmem>>, %arg2: memref<9x8x8xf32, #tpu.memory_space<vmem>>, %arg3: memref<1x8xf32, #tpu.memory_space<vmem>>, %arg4: memref<9x8x8xf32, #tpu.memory_space<vmem>>, %arg5: memref<1x8xf32, #tpu.memory_space<vmem>>, %arg6: memref<1x256x8xf32, #tpu.memory_space<vmem>>, %arg7: memref<18x32x8xf32, #tpu.memory_space<vmem>>, %arg8: memref<18x32x8xf32, #tpu.memory_space<vmem>>) attributes {dimension_semantics = [#tpu.dimension_semantics<parallel>], iteration_bounds = array<i64: 2>, scalar_prefetch = 0 : i64, scratch_operands = 2 : i64, tpu.core_type = #tpu.core_type<tc>, window_params = [{transform_indices = @transform_0, window_bounds = array<i64: 1, 16, 16, 8>}, {pipeline_mode = #tpu.pipeline_mode<synchronous>, transform_indices = @transform_1, window_bounds = array<i64: 9, 8, 8>}, {pipeline_mode = #tpu.pipeline_mode<synchronous>, transform_indices = @transform_2, window_bounds = array<i64: 1, 8>}, {pipeline_mode = #tpu.pipeline_mode<synchronous>, transform_indices = @transform_3, window_bounds = array<i64: 9, 8, 8>}, {pipeline_mode = #tpu.pipeline_mode<synchronous>, transform_indices = @transform_4, window_bounds = array<i64: 1, 8>}, {transform_indices = @transform_5, window_bounds = array<i64: 1, 256, 8>}]} {
    %c0 = arith.constant 0 : index
    %c0_0 = arith.constant 0 : index
    %c0_1 = arith.constant 0 : index
    %c0_2 = arith.constant 0 : index
    %0 = vector.load %arg1[%c0, %c0_0, %c0_1, %c0_2] : memref<1x16x16x8xf32, #tpu.memory_space<vmem>>, vector<1x16x16x8xf32>
    %1 = vector.shape_cast %0 : vector<1x16x16x8xf32> to vector<16x16x8xf32>
    %cst = arith.constant 0.000000e+00 : f32
    %2 = vector.broadcast %cst : f32 to vector<18x32x8xf32>
    %c0_3 = arith.constant 0 : index
    %c0_4 = arith.constant 0 : index
    %c0_5 = arith.constant 0 : index
    %3 = vector.load %arg7[%c0_3, %c0_4, %c0_5] : memref<18x32x8xf32, #tpu.memory_space<vmem>>, vector<18x32x8xf32>
    tpu.vector_store %arg7[%c0_3, %c0_4, %c0_5], %2 {strides = array<i32>} : memref<18x32x8xf32, #tpu.memory_space<vmem>>, vector<18x32x8xf32>,
    %c1 = arith.constant 1 : index
    %c8 = arith.constant 8 : index
    %c0_6 = arith.constant 0 : index
    %4 = vector.load %arg7[%c1, %c8, %c0_6] : memref<18x32x8xf32, #tpu.memory_space<vmem>>, vector<16x16x8xf32>
    tpu.vector_store %arg7[%c1, %c8, %c0_6], %1 {strides = array<i32>} : memref<18x32x8xf32, #tpu.memory_space<vmem>>, vector<16x16x8xf32>,
    %cst_7 = arith.constant 0.000000e+00 : f32
    %5 = vector.broadcast %cst_7 : f32 to vector<256x8xf32>
    %c0_8 = arith.constant 0 : index
    %c7 = arith.constant 7 : index
    %c0_9 = arith.constant 0 : index
    %6 = vector.load %arg7[%c0_8, %c7, %c0_9] : memref<18x32x8xf32, #tpu.memory_space<vmem>>, vector<16x16x8xf32>
    %7 = vector.shape_cast %6 : vector<16x16x8xf32> to vector<256x8xf32>
    %c0_10 = arith.constant 0 : index
    %c0_11 = arith.constant 0 : index
    %c0_12 = arith.constant 0 : index
    %8 = vector.load %arg2[%c0_10, %c0_11, %c0_12] : memref<9x8x8xf32, #tpu.memory_space<vmem>>, vector<1x8x8xf32>
    %9 = vector.shape_cast %8 : vector<1x8x8xf32> to vector<8x8xf32>
    %cst_13 = arith.constant dense<0.000000e+00> : vector<256x8xf32>
    %10 = tpu.matmul %7, %9, %cst_13 {dimension_numbers = #tpu.dot_dimension_numbers<[1], [0], [0], [1], [0, 0, 1, 1], [], []>} : vector<256x8xf32>, vector<8x8xf32>, vector<256x8xf32> -> vector<256x8xf32>
    %11 = arith.addf %5, %10 : vector<256x8xf32>
    %c0_14 = arith.constant 0 : index
    %c8_15 = arith.constant 8 : index
    %c0_16 = arith.constant 0 : index
    %12 = vector.load %arg7[%c0_14, %c8_15, %c0_16] : memref<18x32x8xf32, #tpu.memory_space<vmem>>, vector<16x16x8xf32>
    %13 = vector.shape_cast %12 : vector<16x16x8xf32> to vector<256x8xf32>
    %c1_17 = arith.constant 1 : index
    %c0_18 = arith.constant 0 : index
    %c0_19 = arith.constant 0 : index
    %14 = vector.load %arg2[%c1_17, %c0_18, %c0_19] : memref<9x8x8xf32, #tpu.memory_space<vmem>>, vector<1x8x8xf32>
    %15 = vector.shape_cast %14 : vector<1x8x8xf32> to vector<8x8xf32>
    %cst_20 = arith.constant dense<0.000000e+00> : vector<256x8xf32>
    %16 = tpu.matmul %13, %15, %cst_20 {dimension_numbers = #tpu.dot_dimension_numbers<[1], [0], [0], [1], [0, 0, 1, 1], [], []>} : vector<256x8xf32>, vector<8x8xf32>, vector<256x8xf32> -> vector<256x8xf32>
    %17 = arith.addf %11, %16 : vector<256x8xf32>
    %c0_21 = arith.constant 0 : index
    %c9 = arith.constant 9 : index
    %c0_22 = arith.constant 0 : index
    %18 = vector.load %arg7[%c0_21, %c9, %c0_22] : memref<18x32x8xf32, #tpu.memory_space<vmem>>, vector<16x16x8xf32>
    %19 = vector.shape_cast %18 : vector<16x16x8xf32> to vector<256x8xf32>
    %c2 = arith.constant 2 : index
    %c0_23 = arith.constant 0 : index
    %c0_24 = arith.constant 0 : index
    %20 = vector.load %arg2[%c2, %c0_23, %c0_24] : memref<9x8x8xf32, #tpu.memory_space<vmem>>, vector<1x8x8xf32>
    %21 = vector.shape_cast %20 : vector<1x8x8xf32> to vector<8x8xf32>
    %cst_25 = arith.constant dense<0.000000e+00> : vector<256x8xf32>
    %22 = tpu.matmul %19, %21, %cst_25 {dimension_numbers = #tpu.dot_dimension_numbers<[1], [0], [0], [1], [0, 0, 1, 1], [], []>} : vector<256x8xf32>, vector<8x8xf32>, vector<256x8xf32> -> vector<256x8xf32>
    %23 = arith.addf %17, %22 : vector<256x8xf32>
    %c1_26 = arith.constant 1 : index
    %c7_27 = arith.constant 7 : index
    %c0_28 = arith.constant 0 : index
    %24 = vector.load %arg7[%c1_26, %c7_27, %c0_28] : memref<18x32x8xf32, #tpu.memory_space<vmem>>, vector<16x16x8xf32>
    %25 = vector.shape_cast %24 : vector<16x16x8xf32> to vector<256x8xf32>
    %c3 = arith.constant 3 : index
    %c0_29 = arith.constant 0 : index
    %c0_30 = arith.constant 0 : index
    %26 = vector.load %arg2[%c3, %c0_29, %c0_30] : memref<9x8x8xf32, #tpu.memory_space<vmem>>, vector<1x8x8xf32>
    %27 = vector.shape_cast %26 : vector<1x8x8xf32> to vector<8x8xf32>
    %cst_31 = arith.constant dense<0.000000e+00> : vector<256x8xf32>
    %28 = tpu.matmul %25, %27, %cst_31 {dimension_numbers = #tpu.dot_dimension_numbers<[1], [0], [0], [1], [0, 0, 1, 1], [], []>} : vector<256x8xf32>, vector<8x8xf32>, vector<256x8xf32> -> vector<256x8xf32>
    %29 = arith.addf %23, %28 : vector<256x8xf32>
    %c1_32 = arith.constant 1 : index
    %c8_33 = arith.constant 8 : index
    %c0_34 = arith.constant 0 : index
    %30 = vector.load %arg7[%c1_32, %c8_33, %c0_34] : memref<18x32x8xf32, #tpu.memory_space<vmem>>, vector<16x16x8xf32>
    %31 = vector.shape_cast %30 : vector<16x16x8xf32> to vector<256x8xf32>
    %c4 = arith.constant 4 : index
    %c0_35 = arith.constant 0 : index
    %c0_36 = arith.constant 0 : index
    %32 = vector.load %arg2[%c4, %c0_35, %c0_36] : memref<9x8x8xf32, #tpu.memory_space<vmem>>, vector<1x8x8xf32>
    %33 = vector.shape_cast %32 : vector<1x8x8xf32> to vector<8x8xf32>
    %cst_37 = arith.constant dense<0.000000e+00> : vector<256x8xf32>
    %34 = tpu.matmul %31, %33, %cst_37 {dimension_numbers = #tpu.dot_dimension_numbers<[1], [0], [0], [1], [0, 0, 1, 1], [], []>} : vector<256x8xf32>, vector<8x8xf32>, vector<256x8xf32> -> vector<256x8xf32>
    %35 = arith.addf %29, %34 : vector<256x8xf32>
    %c1_38 = arith.constant 1 : index
    %c9_39 = arith.constant 9 : index
    %c0_40 = arith.constant 0 : index
    %36 = vector.load %arg7[%c1_38, %c9_39, %c0_40] : memref<18x32x8xf32, #tpu.memory_space<vmem>>, vector<16x16x8xf32>
    %37 = vector.shape_cast %36 : vector<16x16x8xf32> to vector<256x8xf32>
    %c5 = arith.constant 5 : index
    %c0_41 = arith.constant 0 : index
    %c0_42 = arith.constant 0 : index
    %38 = vector.load %arg2[%c5, %c0_41, %c0_42] : memref<9x8x8xf32, #tpu.memory_space<vmem>>, vector<1x8x8xf32>
    %39 = vector.shape_cast %38 : vector<1x8x8xf32> to vector<8x8xf32>
    %cst_43 = arith.constant dense<0.000000e+00> : vector<256x8xf32>
    %40 = tpu.matmul %37, %39, %cst_43 {dimension_numbers = #tpu.dot_dimension_numbers<[1], [0], [0], [1], [0, 0, 1, 1], [], []>} : vector<256x8xf32>, vector<8x8xf32>, vector<256x8xf32> -> vector<256x8xf32>
    %41 = arith.addf %35, %40 : vector<256x8xf32>
    %c2_44 = arith.constant 2 : index
    %c7_45 = arith.constant 7 : index
    %c0_46 = arith.constant 0 : index
    %42 = vector.load %arg7[%c2_44, %c7_45, %c0_46] : memref<18x32x8xf32, #tpu.memory_space<vmem>>, vector<16x16x8xf32>
    %43 = vector.shape_cast %42 : vector<16x16x8xf32> to vector<256x8xf32>
    %c6 = arith.constant 6 : index
    %c0_47 = arith.constant 0 : index
    %c0_48 = arith.constant 0 : index
    %44 = vector.load %arg2[%c6, %c0_47, %c0_48] : memref<9x8x8xf32, #tpu.memory_space<vmem>>, vector<1x8x8xf32>
    %45 = vector.shape_cast %44 : vector<1x8x8xf32> to vector<8x8xf32>
    %cst_49 = arith.constant dense<0.000000e+00> : vector<256x8xf32>
    %46 = tpu.matmul %43, %45, %cst_49 {dimension_numbers = #tpu.dot_dimension_numbers<[1], [0], [0], [1], [0, 0, 1, 1], [], []>} : vector<256x8xf32>, vector<8x8xf32>, vector<256x8xf32> -> vector<256x8xf32>
    %47 = arith.addf %41, %46 : vector<256x8xf32>
    %c2_50 = arith.constant 2 : index
    %c8_51 = arith.constant 8 : index
    %c0_52 = arith.constant 0 : index
    %48 = vector.load %arg7[%c2_50, %c8_51, %c0_52] : memref<18x32x8xf32, #tpu.memory_space<vmem>>, vector<16x16x8xf32>
    %49 = vector.shape_cast %48 : vector<16x16x8xf32> to vector<256x8xf32>
    %c7_53 = arith.constant 7 : index
    %c0_54 = arith.constant 0 : index
    %c0_55 = arith.constant 0 : index
    %50 = vector.load %arg2[%c7_53, %c0_54, %c0_55] : memref<9x8x8xf32, #tpu.memory_space<vmem>>, vector<1x8x8xf32>
    %51 = vector.shape_cast %50 : vector<1x8x8xf32> to vector<8x8xf32>
    %cst_56 = arith.constant dense<0.000000e+00> : vector<256x8xf32>
    %52 = tpu.matmul %49, %51, %cst_56 {dimension_numbers = #tpu.dot_dimension_numbers<[1], [0], [0], [1], [0, 0, 1, 1], [], []>} : vector<256x8xf32>, vector<8x8xf32>, vector<256x8xf32> -> vector<256x8xf32>
    %53 = arith.addf %47, %52 : vector<256x8xf32>
    %c2_57 = arith.constant 2 : index
    %c9_58 = arith.constant 9 : index
    %c0_59 = arith.constant 0 : index
    %54 = vector.load %arg7[%c2_57, %c9_58, %c0_59] : memref<18x32x8xf32, #tpu.memory_space<vmem>>, vector<16x16x8xf32>
    %55 = vector.shape_cast %54 : vector<16x16x8xf32> to vector<256x8xf32>
    %c8_60 = arith.constant 8 : index
    %c0_61 = arith.constant 0 : index
    %c0_62 = arith.constant 0 : index
    %56 = vector.load %arg2[%c8_60, %c0_61, %c0_62] : memref<9x8x8xf32, #tpu.memory_space<vmem>>, vector<1x8x8xf32>
    %57 = vector.shape_cast %56 : vector<1x8x8xf32> to vector<8x8xf32>
    %cst_63 = arith.constant dense<0.000000e+00> : vector<256x8xf32>
    %58 = tpu.matmul %55, %57, %cst_63 {dimension_numbers = #tpu.dot_dimension_numbers<[1], [0], [0], [1], [0, 0, 1, 1], [], []>} : vector<256x8xf32>, vector<8x8xf32>, vector<256x8xf32> -> vector<256x8xf32>
    %59 = arith.addf %53, %58 : vector<256x8xf32>
    %c0_64 = arith.constant 0 : index
    %c0_65 = arith.constant 0 : index
    %60 = vector.load %arg3[%c0_64, %c0_65] : memref<1x8xf32, #tpu.memory_space<vmem>>, vector<1x8xf32>
    %61 = vector.broadcast %60 : vector<1x8xf32> to vector<256x8xf32>
    %62 = arith.addf %59, %61 : vector<256x8xf32>
    %cst_66 = arith.constant 0.000000e+00 : f32
    %63 = vector.broadcast %cst_66 : f32 to vector<256x8xf32>
    %64 = arith.maximumf %62, %63 : vector<256x8xf32>
    %cst_67 = arith.constant 0.000000e+00 : f32
    %65 = vector.broadcast %cst_67 : f32 to vector<18x32x8xf32>
    %c0_68 = arith.constant 0 : index
    %c0_69 = arith.constant 0 : index
    %c0_70 = arith.constant 0 : index
    %66 = vector.load %arg8[%c0_68, %c0_69, %c0_70] : memref<18x32x8xf32, #tpu.memory_space<vmem>>, vector<18x32x8xf32>
    tpu.vector_store %arg8[%c0_68, %c0_69, %c0_70], %65 {strides = array<i32>} : memref<18x32x8xf32, #tpu.memory_space<vmem>>, vector<18x32x8xf32>,
    %67 = vector.shape_cast %64 : vector<256x8xf32> to vector<16x16x8xf32>
    %c1_71 = arith.constant 1 : index
    %c8_72 = arith.constant 8 : index
    %c0_73 = arith.constant 0 : index
    %68 = vector.load %arg8[%c1_71, %c8_72, %c0_73] : memref<18x32x8xf32, #tpu.memory_space<vmem>>, vector<16x16x8xf32>
    tpu.vector_store %arg8[%c1_71, %c8_72, %c0_73], %67 {strides = array<i32>} : memref<18x32x8xf32, #tpu.memory_space<vmem>>, vector<16x16x8xf32>,
    %cst_74 = arith.constant 0.000000e+00 : f32
    %69 = vector.broadcast %cst_74 : f32 to vector<256x8xf32>
    %c0_75 = arith.constant 0 : index
    %c7_76 = arith.constant 7 : index
    %c0_77 = arith.constant 0 : index
    %70 = vector.load %arg8[%c0_75, %c7_76, %c0_77] : memref<18x32x8xf32, #tpu.memory_space<vmem>>, vector<16x16x8xf32>
    %71 = vector.shape_cast %70 : vector<16x16x8xf32> to vector<256x8xf32>
    %c0_78 = arith.constant 0 : index
    %c0_79 = arith.constant 0 : index
    %c0_80 = arith.constant 0 : index
    %72 = vector.load %arg4[%c0_78, %c0_79, %c0_80] : memref<9x8x8xf32, #tpu.memory_space<vmem>>, vector<1x8x8xf32>
    %73 = vector.shape_cast %72 : vector<1x8x8xf32> to vector<8x8xf32>
    %cst_81 = arith.constant dense<0.000000e+00> : vector<256x8xf32>
    %74 = tpu.matmul %71, %73, %cst_81 {dimension_numbers = #tpu.dot_dimension_numbers<[1], [0], [0], [1], [0, 0, 1, 1], [], []>} : vector<256x8xf32>, vector<8x8xf32>, vector<256x8xf32> -> vector<256x8xf32>
    %75 = arith.addf %69, %74 : vector<256x8xf32>
    %c0_82 = arith.constant 0 : index
    %c8_83 = arith.constant 8 : index
    %c0_84 = arith.constant 0 : index
    %76 = vector.load %arg8[%c0_82, %c8_83, %c0_84] : memref<18x32x8xf32, #tpu.memory_space<vmem>>, vector<16x16x8xf32>
    %77 = vector.shape_cast %76 : vector<16x16x8xf32> to vector<256x8xf32>
    %c1_85 = arith.constant 1 : index
    %c0_86 = arith.constant 0 : index
    %c0_87 = arith.constant 0 : index
    %78 = vector.load %arg4[%c1_85, %c0_86, %c0_87] : memref<9x8x8xf32, #tpu.memory_space<vmem>>, vector<1x8x8xf32>
    %79 = vector.shape_cast %78 : vector<1x8x8xf32> to vector<8x8xf32>
    %cst_88 = arith.constant dense<0.000000e+00> : vector<256x8xf32>
    %80 = tpu.matmul %77, %79, %cst_88 {dimension_numbers = #tpu.dot_dimension_numbers<[1], [0], [0], [1], [0, 0, 1, 1], [], []>} : vector<256x8xf32>, vector<8x8xf32>, vector<256x8xf32> -> vector<256x8xf32>
    %81 = arith.addf %75, %80 : vector<256x8xf32>
    %c0_89 = arith.constant 0 : index
    %c9_90 = arith.constant 9 : index
    %c0_91 = arith.constant 0 : index
    %82 = vector.load %arg8[%c0_89, %c9_90, %c0_91] : memref<18x32x8xf32, #tpu.memory_space<vmem>>, vector<16x16x8xf32>
    %83 = vector.shape_cast %82 : vector<16x16x8xf32> to vector<256x8xf32>
    %c2_92 = arith.constant 2 : index
    %c0_93 = arith.constant 0 : index
    %c0_94 = arith.constant 0 : index
    %84 = vector.load %arg4[%c2_92, %c0_93, %c0_94] : memref<9x8x8xf32, #tpu.memory_space<vmem>>, vector<1x8x8xf32>
    %85 = vector.shape_cast %84 : vector<1x8x8xf32> to vector<8x8xf32>
    %cst_95 = arith.constant dense<0.000000e+00> : vector<256x8xf32>
    %86 = tpu.matmul %83, %85, %cst_95 {dimension_numbers = #tpu.dot_dimension_numbers<[1], [0], [0], [1], [0, 0, 1, 1], [], []>} : vector<256x8xf32>, vector<8x8xf32>, vector<256x8xf32> -> vector<256x8xf32>
    %87 = arith.addf %81, %86 : vector<256x8xf32>
    %c1_96 = arith.constant 1 : index
    %c7_97 = arith.constant 7 : index
    %c0_98 = arith.constant 0 : index
    %88 = vector.load %arg8[%c1_96, %c7_97, %c0_98] : memref<18x32x8xf32, #tpu.memory_space<vmem>>, vector<16x16x8xf32>
    %89 = vector.shape_cast %88 : vector<16x16x8xf32> to vector<256x8xf32>
    %c3_99 = arith.constant 3 : index
    %c0_100 = arith.constant 0 : index
    %c0_101 = arith.constant 0 : index
    %90 = vector.load %arg4[%c3_99, %c0_100, %c0_101] : memref<9x8x8xf32, #tpu.memory_space<vmem>>, vector<1x8x8xf32>
    %91 = vector.shape_cast %90 : vector<1x8x8xf32> to vector<8x8xf32>
    %cst_102 = arith.constant dense<0.000000e+00> : vector<256x8xf32>
    %92 = tpu.matmul %89, %91, %cst_102 {dimension_numbers = #tpu.dot_dimension_numbers<[1], [0], [0], [1], [0, 0, 1, 1], [], []>} : vector<256x8xf32>, vector<8x8xf32>, vector<256x8xf32> -> vector<256x8xf32>
    %93 = arith.addf %87, %92 : vector<256x8xf32>
    %c1_103 = arith.constant 1 : index
    %c8_104 = arith.constant 8 : index
    %c0_105 = arith.constant 0 : index
    %94 = vector.load %arg8[%c1_103, %c8_104, %c0_105] : memref<18x32x8xf32, #tpu.memory_space<vmem>>, vector<16x16x8xf32>
    %95 = vector.shape_cast %94 : vector<16x16x8xf32> to vector<256x8xf32>
    %c4_106 = arith.constant 4 : index
    %c0_107 = arith.constant 0 : index
    %c0_108 = arith.constant 0 : index
    %96 = vector.load %arg4[%c4_106, %c0_107, %c0_108] : memref<9x8x8xf32, #tpu.memory_space<vmem>>, vector<1x8x8xf32>
    %97 = vector.shape_cast %96 : vector<1x8x8xf32> to vector<8x8xf32>
    %cst_109 = arith.constant dense<0.000000e+00> : vector<256x8xf32>
    %98 = tpu.matmul %95, %97, %cst_109 {dimension_numbers = #tpu.dot_dimension_numbers<[1], [0], [0], [1], [0, 0, 1, 1], [], []>} : vector<256x8xf32>, vector<8x8xf32>, vector<256x8xf32> -> vector<256x8xf32>
    %99 = arith.addf %93, %98 : vector<256x8xf32>
    %c1_110 = arith.constant 1 : index
    %c9_111 = arith.constant 9 : index
    %c0_112 = arith.constant 0 : index
    %100 = vector.load %arg8[%c1_110, %c9_111, %c0_112] : memref<18x32x8xf32, #tpu.memory_space<vmem>>, vector<16x16x8xf32>
    %101 = vector.shape_cast %100 : vector<16x16x8xf32> to vector<256x8xf32>
    %c5_113 = arith.constant 5 : index
    %c0_114 = arith.constant 0 : index
    %c0_115 = arith.constant 0 : index
    %102 = vector.load %arg4[%c5_113, %c0_114, %c0_115] : memref<9x8x8xf32, #tpu.memory_space<vmem>>, vector<1x8x8xf32>
    %103 = vector.shape_cast %102 : vector<1x8x8xf32> to vector<8x8xf32>
    %cst_116 = arith.constant dense<0.000000e+00> : vector<256x8xf32>
    %104 = tpu.matmul %101, %103, %cst_116 {dimension_numbers = #tpu.dot_dimension_numbers<[1], [0], [0], [1], [0, 0, 1, 1], [], []>} : vector<256x8xf32>, vector<8x8xf32>, vector<256x8xf32> -> vector<256x8xf32>
    %105 = arith.addf %99, %104 : vector<256x8xf32>
    %c2_117 = arith.constant 2 : index
    %c7_118 = arith.constant 7 : index
    %c0_119 = arith.constant 0 : index
    %106 = vector.load %arg8[%c2_117, %c7_118, %c0_119] : memref<18x32x8xf32, #tpu.memory_space<vmem>>, vector<16x16x8xf32>
    %107 = vector.shape_cast %106 : vector<16x16x8xf32> to vector<256x8xf32>
    %c6_120 = arith.constant 6 : index
    %c0_121 = arith.constant 0 : index
    %c0_122 = arith.constant 0 : index
    %108 = vector.load %arg4[%c6_120, %c0_121, %c0_122] : memref<9x8x8xf32, #tpu.memory_space<vmem>>, vector<1x8x8xf32>
    %109 = vector.shape_cast %108 : vector<1x8x8xf32> to vector<8x8xf32>
    %cst_123 = arith.constant dense<0.000000e+00> : vector<256x8xf32>
    %110 = tpu.matmul %107, %109, %cst_123 {dimension_numbers = #tpu.dot_dimension_numbers<[1], [0], [0], [1], [0, 0, 1, 1], [], []>} : vector<256x8xf32>, vector<8x8xf32>, vector<256x8xf32> -> vector<256x8xf32>
    %111 = arith.addf %105, %110 : vector<256x8xf32>
    %c2_124 = arith.constant 2 : index
    %c8_125 = arith.constant 8 : index
    %c0_126 = arith.constant 0 : index
    %112 = vector.load %arg8[%c2_124, %c8_125, %c0_126] : memref<18x32x8xf32, #tpu.memory_space<vmem>>, vector<16x16x8xf32>
    %113 = vector.shape_cast %112 : vector<16x16x8xf32> to vector<256x8xf32>
    %c7_127 = arith.constant 7 : index
    %c0_128 = arith.constant 0 : index
    %c0_129 = arith.constant 0 : index
    %114 = vector.load %arg4[%c7_127, %c0_128, %c0_129] : memref<9x8x8xf32, #tpu.memory_space<vmem>>, vector<1x8x8xf32>
    %115 = vector.shape_cast %114 : vector<1x8x8xf32> to vector<8x8xf32>
    %cst_130 = arith.constant dense<0.000000e+00> : vector<256x8xf32>
    %116 = tpu.matmul %113, %115, %cst_130 {dimension_numbers = #tpu.dot_dimension_numbers<[1], [0], [0], [1], [0, 0, 1, 1], [], []>} : vector<256x8xf32>, vector<8x8xf32>, vector<256x8xf32> -> vector<256x8xf32>
    %117 = arith.addf %111, %116 : vector<256x8xf32>
    %c2_131 = arith.constant 2 : index
    %c9_132 = arith.constant 9 : index
    %c0_133 = arith.constant 0 : index
    %118 = vector.load %arg8[%c2_131, %c9_132, %c0_133] : memref<18x32x8xf32, #tpu.memory_space<vmem>>, vector<16x16x8xf32>
    %119 = vector.shape_cast %118 : vector<16x16x8xf32> to vector<256x8xf32>
    %c8_134 = arith.constant 8 : index
    %c0_135 = arith.constant 0 : index
    %c0_136 = arith.constant 0 : index
    %120 = vector.load %arg4[%c8_134, %c0_135, %c0_136] : memref<9x8x8xf32, #tpu.memory_space<vmem>>, vector<1x8x8xf32>
    %121 = vector.shape_cast %120 : vector<1x8x8xf32> to vector<8x8xf32>
    %cst_137 = arith.constant dense<0.000000e+00> : vector<256x8xf32>
    %122 = tpu.matmul %119, %121, %cst_137 {dimension_numbers = #tpu.dot_dimension_numbers<[1], [0], [0], [1], [0, 0, 1, 1], [], []>} : vector<256x8xf32>, vector<8x8xf32>, vector<256x8xf32> -> vector<256x8xf32>
    %123 = arith.addf %117, %122 : vector<256x8xf32>
    %c0_138 = arith.constant 0 : index
    %c0_139 = arith.constant 0 : index
    %124 = vector.load %arg5[%c0_138, %c0_139] : memref<1x8xf32, #tpu.memory_space<vmem>>, vector<1x8xf32>
    %125 = vector.broadcast %124 : vector<1x8xf32> to vector<256x8xf32>
    %126 = arith.addf %123, %125 : vector<256x8xf32>
    %127 = vector.shape_cast %1 : vector<16x16x8xf32> to vector<256x8xf32>
    %128 = arith.addf %126, %127 : vector<256x8xf32>
    %cst_140 = arith.constant 0.000000e+00 : f32
    %129 = vector.broadcast %cst_140 : f32 to vector<256x8xf32>
    %130 = arith.maximumf %128, %129 : vector<256x8xf32>
    %c0_141 = arith.constant 0 : index
    %c0_142 = arith.constant 0 : index
    %c0_143 = arith.constant 0 : index
    %131 = vector.load %arg6[%c0_141, %c0_142, %c0_143] : memref<1x256x8xf32, #tpu.memory_space<vmem>>, vector<1x256x8xf32>
    %132 = vector.shape_cast %131 : vector<1x256x8xf32> to vector<256x8xf32>
    %133 = vector.shape_cast %130 : vector<256x8xf32> to vector<1x256x8xf32>
    tpu.vector_store %arg6[%c0_141, %c0_142, %c0_143], %133 {strides = array<i32>} : memref<1x256x8xf32, #tpu.memory_space<vmem>>, vector<1x256x8xf32>,
    return
  }
  func.func @transform_0(%arg0: i32) -> (i32, i32, i32, i32) {
    %c0_i32 = arith.constant 0 : i32
    %c0_i32_0 = arith.constant 0 : i32
    %c0_i32_1 = arith.constant 0 : i32
    %c0_i32_2 = arith.constant 0 : i32
    return %arg0, %c0_i32, %c0_i32_0, %c0_i32_1 : i32, i32, i32, i32
  }
  func.func @transform_1(%arg0: i32) -> (i32, i32, i32) {
    %c0_i32 = arith.constant 0 : i32
    %c0_i32_0 = arith.constant 0 : i32
    %c0_i32_1 = arith.constant 0 : i32
    %c0_i32_2 = arith.constant 0 : i32
    return %c0_i32, %c0_i32_0, %c0_i32_1 : i32, i32, i32
  }
  func.func @transform_2(%arg0: i32) -> (i32, i32) {
    %c0_i32 = arith.constant 0 : i32
    %c0_i32_0 = arith.constant 0 : i32
    %c0_i32_1 = arith.constant 0 : i32
    return %c0_i32, %c0_i32_0 : i32, i32
  }
  func.func @transform_3(%arg0: i32) -> (i32, i32, i32) {
    %c0_i32 = arith.constant 0 : i32
    %c0_i32_0 = arith.constant 0 : i32
    %c0_i32_1 = arith.constant 0 : i32
    %c0_i32_2 = arith.constant 0 : i32
    return %c0_i32, %c0_i32_0, %c0_i32_1 : i32, i32, i32
  }
  func.func @transform_4(%arg0: i32) -> (i32, i32) {
    %c0_i32 = arith.constant 0 : i32
    %c0_i32_0 = arith.constant 0 : i32
    %c0_i32_1 = arith.constant 0 : i32
    return %c0_i32, %c0_i32_0 : i32, i32
  }
  func.func @transform_5(%arg0: i32) -> (i32, i32, i32) {
    %c0_i32 = arith.constant 0 : i32
    %c0_i32_0 = arith.constant 0 : i32
    %c0_i32_1 = arith.constant 0 : i32
    return %arg0, %c0_i32, %c0_i32_0 : i32, i32, i32
  }
}

</mosaic_0001>

<bundles_post_ra>
// kernel: basic_block_forward.1
= control target key start
LH: loop header
LB: loop body
LE: loop exit
PB: predicated region body
PF: predicated region fallthrough
CT: control target
= control target key end

     0   :  { %s10228_s18 = smov 0   ;;  %s12500_s0 = inlined_call_operand.vmem [shape: f32[2,16,16,8], index: 0, kind: input, shape index: {}]   ;;  %s12501_s1 = inlined_call_operand.vmem [shape: f32[9,8,8], index: 1, kind: input, shape index: {}]   ;;  %s12502_s2 = inlined_call_operand.vmem [shape: f32[1,8], index: 2, kind: input, shape index: {}]   ;;  %s12503_s3 = inlined_call_operand.vmem [shape: f32[9,8,8], index: 3, kind: input, shape index: {}]   ;;  %s12504_s4 = inlined_call_operand.vmem [shape: f32[1,8], index: 4, kind: input, shape index: {}]   ;;  %s12505_s5 = inlined_call_operand.vmem [shape: f32[2,256,8], index: 5, kind: output, shape index: {}]  }
   0x1 LB: > { %s7567_s19 = sadd.s32 4294967295, %s10195_s18   ;;  %p7571_p0 = scmp.ge.s32.totalorder %s10195_s18, 1  ;;  %s10195_s18 = sphi %s10228_s18, %s15_s18  }
   0x2   : > { %p187_p1 = scmp.lt.s32.totalorder %s10195_s18, 3 }
   0x4   : > { %p188_p2 = pnand %p7571_p0, %p187_p1 }
   0x6   : > { %191 = sbr.rel (%p188_p2) target bundleno = 1618 (0x652), region = 40 }
   0xd   : > { %v10239_v0 = vld [vmem:[%s12501_s1 + $0x8] sm:$0xff]  ;;  %vm257_vm0 = vcmask 64512   ;;  %v10244_v1 = vld [vmem:[%s12501_s1] sm:$0xff]  ;;  %p10248_p3 = scmp.lt.s32.totalorder %s7567_s19, 1  ;;  %v10197_v2 = vmov 0.0   ;;  %v10584_v9 = vld [vmem:[%s12501_s1 + $0x10] sm:$0xff] }
   0xe   : > { %8768 = vmatprep.subr.mxu0 %v10239_v0  ;;  %259 = vst.msk [vmem:[#allocation2 + $0x8] sm:$0xff] %vm257_vm0, %v10197_v2  ;;  %258 = vst.msk [vmem:[#allocation2] sm:$0xff] %vm257_vm0, %v10197_v2 }
   0xf   : > { %260 = vst.msk [vmem:[#allocation2 + $0x10] sm:$0xff] %vm257_vm0, %v10197_v2  ;;  %261 = vst.msk [vmem:[#allocation2 + $0x18] sm:$0xff] %vm257_vm0, %v10197_v2  ;;  %8769 = vmatpush3.msra.mxu0 %v10239_v0  ;;  %s12876_s19 = smov (!%p10248_p3, %s7567_s19), 1 }
  0x10   : > { %262 = vst.msk [vmem:[#allocation2 + $0x20] sm:$0xff] %vm257_vm0, %v10197_v2  ;;  %263 = vst.msk [vmem:[#allocation2 + $0x28] sm:$0xff] %vm257_vm0, %v10197_v2  ;;  %8818 = vmatprep.subr.mxu0 %v10244_v1  ;;  %s8172_s25 = sshll.u32 %s12876_s19, 8 }
  0x11   : > { %264 = vst.msk [vmem:[#allocation2 + $0x30] sm:$0xff] %vm257_vm0, %v10197_v2  ;;  %265 = vst.msk [vmem:[#allocation2 + $0x38] sm:$0xff] %vm257_vm0, %v10197_v2  ;;  %s10555_s28 = scalar_lea.vmem %s12500_s0, %s8172_s25  ;;  %s12370_s22 = scalar_lea.vmem %s12505_s5, %s8172_s25 }
  0x12   : > { %266 = vst.msk [vmem:[#allocation2 + $0x40] sm:$0xff] %vm257_vm0, %v10197_v2  ;;  %267 = vst.msk [vmem:[#allocation2 + $0x48] sm:$0xff] %vm257_vm0, %v10197_v2  ;;  %v10558_v3 = vld [vmem:[%s10555_s28] sm:$0xff]  ;;  %v10561_v4 = vld [vmem:[%s10555_s28 + $0x8] sm:$0xff] }
  0x13   : > { %268 = vst.msk [vmem:[#allocation2 + $0x50] sm:$0xff] %vm257_vm0, %v10197_v2  ;;  %269 = vst.msk [vmem:[#allocation2 + $0x58] sm:$0xff] %vm257_vm0, %v10197_v2  ;;  %v10564_v5 = vld [vmem:[%s10555_s28 + $0x10] sm:$0xff]  ;;  %v10573_v6 = vld [vmem:[%s10555_s28 + $0x18] sm:$0xff] }
  0x14   : > { %270 = vst.msk [vmem:[#allocation2 + $0x60] sm:$0xff] %vm257_vm0, %v10197_v2  ;;  %271 = vst.msk [vmem:[#allocation2 + $0x68] sm:$0xff] %vm257_vm0, %v10197_v2  ;;  %v10576_v7 = vld [vmem:[%s10555_s28 + $0x20] sm:$0xff]  ;;  %v10579_v8 = vld [vmem:[%s10555_s28 + $0x28] sm:$0xff] }
  0x15   : > { %272 = vst.msk [vmem:[#allocation2 + $0x70] sm:$0xff] %vm257_vm0, %v10197_v2  ;;  %273 = vst.msk [vmem:[#allocation2 + $0x78] sm:$0xff] %vm257_vm0, %v10197_v2  ;;  %v396_v10 = vld [vmem:[#allocation2 + $0x8] sm:$0xff]  ;;  %v10593_v12 = vld [vmem:[%s10555_s28 + $0x30] sm:$0xff] }
  0x16   : > { %274 = vst.msk [vmem:[#allocation2 + $0x80] sm:$0xff] %vm257_vm0, %v10197_v2  ;;  %275 = vst.msk [vmem:[#allocation2 + $0x88] sm:$0xff] %vm257_vm0, %v10197_v2  ;;  %v397_v11 = vld [vmem:[#allocation2 + $0x10] sm:$0xff]  ;;  %8770 = vmatprep.mubr.msk.f32.mxu0 %vm257_vm0, %v396_v10  ;;  %v10599_v13 = vld [vmem:[%s10555_s28 + $0x38] sm:$0xff] }
  0x17   : > { %276 = vst.msk [vmem:[#allocation2 + $0x90] sm:$0xff] %vm257_vm0, %v10197_v2  ;;  %277 = vst.msk [vmem:[#allocation2 + $0x98] sm:$0xff] %vm257_vm0, %v10197_v2  ;;  %v10602_v14 = vld [vmem:[%s10555_s28 + $0x40] sm:$0xff]  ;;  %v10605_v15 = vld [vmem:[%s10555_s28 + $0x48] sm:$0xff]  ;;  %8771 = vmatmul.mubr.msk.f32.vlgmr.msra.gmra.mrb[0].mxu0 %vm257_vm0, %v397_v11 }
  0x18   : > { %278 = vst.msk [vmem:[#allocation2 + $0xa0] sm:$0xff] %vm257_vm0, %v10197_v2  ;;  %279 = vst.msk [vmem:[#allocation2 + $0xa8] sm:$0xff] %vm257_vm0, %v10197_v2  ;;  %v10615_v16 = vld [vmem:[%s10555_s28 + $0x50] sm:$0xff]  ;;  %v10618_v17 = vld [vmem:[%s10555_s28 + $0x58] sm:$0xff]  ;;  %8819 = vmatpush3.msra.mxu0 %v10244_v1 }
  0x19   : > { %280 = vst.msk [vmem:[#allocation2 + $0xb0] sm:$0xff] %vm257_vm0, %v10197_v2  ;;  %281 = vst.msk [vmem:[#allocation2 + $0xb8] sm:$0xff] %vm257_vm0, %v10197_v2  ;;  %v10621_v18 = vld [vmem:[%s10555_s28 + $0x60] sm:$0xff]  ;;  %v10631_v19 = vld [vmem:[%s10555_s28 + $0x68] sm:$0xff]  ;;  %8868 = vmatprep.subr.mxu0 %v10584_v9 }
  0x1a   : > { %282 = vst.msk [vmem:[#allocation2 + $0xc0] sm:$0xff] %vm257_vm0, %v10197_v2  ;;  %283 = vst.msk [vmem:[#allocation2 + $0xc8] sm:$0xff] %vm257_vm0, %v10197_v2  ;;  %v10634_v20 = vld [vmem:[%s10555_s28 + $0x70] sm:$0xff]  ;;  %v10637_v21 = vld [vmem:[%s10555_s28 + $0x78] sm:$0xff] }
  0x1b   : > { %284 = vst.msk [vmem:[#allocation2 + $0xd0] sm:$0xff] %vm257_vm0, %v10197_v2  ;;  %285 = vst.msk [vmem:[#allocation2 + $0xd8] sm:$0xff] %vm257_vm0, %v10197_v2  ;;  %v10646_v22 = vld [vmem:[%s10555_s28 + $0x80] sm:$0xff]  ;;  %v10649_v23 = vld [vmem:[%s10555_s28 + $0x88] sm:$0xff] }
  0x1c   : > { %286 = vst.msk [vmem:[#allocation2 + $0xe0] sm:$0xff] %vm257_vm0, %v10197_v2  ;;  %287 = vst.msk [vmem:[#allocation2 + $0xe8] sm:$0xff] %vm257_vm0, %v10197_v2  ;;  %v10652_v24 = vld [vmem:[%s10555_s28 + $0x90] sm:$0xff]  ;;  %v10662_v25 = vld [vmem:[%s10555_s28 + $0x98] sm:$0xff] }
  0x1d   : > { %288 = vst.msk [vmem:[#allocation2 + $0xf0] sm:$0xff] %vm257_vm0, %v10197_v2  ;;  %289 = vst.msk [vmem:[#allocation2 + $0xf8] sm:$0xff] %vm257_vm0, %v10197_v2  ;;  %v10665_v26 = vld [vmem:[%s10555_s28 + $0xa0] sm:$0xff]  ;;  %v10668_v27 = vld [vmem:[%s10555_s28 + $0xa8] sm:$0xff] }
  0x1e   : > { %290 = vst.msk [vmem:[#allocation2 + $0x100] sm:$0xff] %vm257_vm0, %v10197_v2  ;;  %291 = vst.msk [vmem:[#allocation2 + $0x108] sm:$0xff] %vm257_vm0, %v10197_v2  ;;  %v10687_v31 = vld [vmem:[%s10555_s28 + $0xb0] sm:$0xff]  ;;  %v10690_v32 = vld [vmem:[%s10555_s28 + $0xb8] sm:$0xff] }
  0x1f   : > { %292 = vst.msk [vmem:[#allocation2 + $0x110] sm:$0xff] %vm257_vm0, %v10197_v2  ;;  %293 = vst.msk [vmem:[#allocation2 + $0x118] sm:$0xff] %vm257_vm0, %v10197_v2  ;;  %v10711_v37 = vld [vmem:[%s10555_s28 + $0xc0] sm:$0xff]  ;;  %v10714_v38 = vld [vmem:[%s10555_s28 + $0xc8] sm:$0xff] }
  0x20   : > { %294 = vst.msk [vmem:[#allocation2 + $0x120] sm:$0xff] %vm257_vm0, %v10197_v2  ;;  %295 = vst.msk [vmem:[#allocation2 + $0x128] sm:$0xff] %vm257_vm0, %v10197_v2  ;;  %v10717_v39 = vld [vmem:[%s10555_s28 + $0xd0] sm:$0xff]  ;;  %v10726_v40 = vld [vmem:[%s10555_s28 + $0xd8] sm:$0xff] }
  0x21   : > { %296 = vst.msk [vmem:[#allocation2 + $0x130] sm:$0xff] %vm257_vm0, %v10197_v2  ;;  %297 = vst.msk [vmem:[#allocation2 + $0x138] sm:$0xff] %vm257_vm0, %v10197_v2  ;;  %v10729_v41 = vld [vmem:[%s10555_s28 + $0xe0] sm:$0xff]  ;;  %v10732_v42 = vld [vmem:[%s10555_s28 + $0xe8] sm:$0xff] }
  0x22   : > { %298 = vst.msk [vmem:[#allocation2 + $0x140] sm:$0xff] %vm257_vm0, %v10197_v2  ;;  %299 = vst.msk [vmem:[#allocation2 + $0x148] sm:$0xff] %vm257_vm0, %v10197_v2  ;;  %v364_v10 = vld [vmem:[#allocation2 + $0xf] sm:$0xff] }
  0x23   : > { %300 = vst.msk [vmem:[#allocation2 + $0x150] sm:$0xff] %vm257_vm0, %v10197_v2  ;;  %301 = vst.msk [vmem:[#allocation2 + $0x158] sm:$0xff] %vm257_vm0, %v10197_v2 }
  0x24   : > { %302 = vst.msk [vmem:[#allocation2 + $0x160] sm:$0xff] %vm257_vm0, %v10197_v2  ;;  %303 = vst.msk [vmem:[#allocation2 + $0x168] sm:$0xff] %vm257_vm0, %v10197_v2 }
  0x25   : > { %304 = vst.msk [vmem:[#allocation2 + $0x170] sm:$0xff] %vm257_vm0, %v10197_v2  ;;  %305 = vst.msk [vmem:[#allocation2 + $0x178] sm:$0xff] %vm257_vm0, %v10197_v2 }
  0x26   : > { %306 = vst.msk [vmem:[#allocation2 + $0x180] sm:$0xff] %vm257_vm0, %v10197_v2  ;;  %307 = vst.msk [vmem:[#allocation2 + $0x188] sm:$0xff] %vm257_vm0, %v10197_v2 }
  0x27   : > { %308 = vst.msk [vmem:[#allocation2 + $0x190] sm:$0xff] %vm257_vm0, %v10197_v2  ;;  %309 = vst.msk [vmem:[#allocation2 + $0x198] sm:$0xff] %vm257_vm0, %v10197_v2 }
  0x28   : > { %310 = vst.msk [vmem:[#allocation2 + $0x1a0] sm:$0xff] %vm257_vm0, %v10197_v2  ;;  %311 = vst.msk [vmem:[#allocation2 + $0x1a8] sm:$0xff] %vm257_vm0, %v10197_v2 }
  0x29   : > { %312 = vst.msk [vmem:[#allocation2 + $0x1b0] sm:$0xff] %vm257_vm0, %v10197_v2  ;;  %313 = vst.msk [vmem:[#allocation2 + $0x1b8] sm:$0xff] %vm257_vm0, %v10197_v2 }
  0x2a   : > { %314 = vst.msk [vmem:[#allocation2 + $0x1c0] sm:$0xff] %vm257_vm0, %v10197_v2  ;;  %315 = vst.msk [vmem:[#allocation2 + $0x1c8] sm:$0xff] %vm257_vm0, %v10197_v2 }
  0x2b   : > { %316 = vst.msk [vmem:[#allocation2 + $0x1d0] sm:$0xff] %vm257_vm0, %v10197_v2  ;;  %317 = vst.msk [vmem:[#allocation2 + $0x1d8] sm:$0xff] %vm257_vm0, %v10197_v2 }
  0x2c   : > { %318 = vst.msk [vmem:[#allocation2 + $0x1e0] sm:$0xff] %vm257_vm0, %v10197_v2  ;;  %319 = vst.msk [vmem:[#allocation2 + $0x1e8] sm:$0xff] %vm257_vm0, %v10197_v2 }
  0x2d   : > { %320 = vst.msk [vmem:[#allocation2 + $0x1f0] sm:$0xff] %vm257_vm0, %v10197_v2  ;;  %321 = vst.msk [vmem:[#allocation2 + $0x1f8] sm:$0xff] %vm257_vm0, %v10197_v2 }
  0x2e   : > { %322 = vst.msk [vmem:[#allocation2 + $0x200] sm:$0xff] %vm257_vm0, %v10197_v2  ;;  %323 = vst.msk [vmem:[#allocation2 + $0x208] sm:$0xff] %vm257_vm0, %v10197_v2 }
  0x2f   : > { %324 = vst.msk [vmem:[#allocation2 + $0x210] sm:$0xff] %vm257_vm0, %v10197_v2  ;;  %325 = vst.msk [vmem:[#allocation2 + $0x218] sm:$0xff] %vm257_vm0, %v10197_v2 }
  0x30   : > { %326 = vst.msk [vmem:[#allocation2 + $0x220] sm:$0xff] %vm257_vm0, %v10197_v2  ;;  %327 = vst.msk [vmem:[#allocation2 + $0x228] sm:$0xff] %vm257_vm0, %v10197_v2 }
  0x31   : > { %328 = vst.msk [vmem:[#allocation2 + $0x230] sm:$0xff] %vm257_vm0, %v10197_v2  ;;  %329 = vst.msk [vmem:[#allocation2 + $0x238] sm:$0xff] %vm257_vm0, %v10197_v2 }
  0x32   : > { %3853 = vst.msk [vmem:[#allocation3] sm:$0xff] %vm257_vm0, %v10197_v2  ;;  %3854 = vst.msk [vmem:[#allocation3 + $0x8] sm:$0xff] %vm257_vm0, %v10197_v2 }
  0x33   : > { %3855 = vst.msk [vmem:[#allocation3 + $0x10] sm:$0xff] %vm257_vm0, %v10197_v2  ;;  %3856 = vst.msk [vmem:[#allocation3 + $0x18] sm:$0xff] %vm257_vm0, %v10197_v2 }
  0x34   : > { %3857 = vst.msk [vmem:[#allocation3 + $0x20] sm:$0xff] %vm257_vm0, %v10197_v2  ;;  %3858 = vst.msk [vmem:[#allocation3 + $0x28] sm:$0xff] %vm257_vm0, %v10197_v2 }
  0x35   : > { %3859 = vst.msk [vmem:[#allocation3 + $0x30] sm:$0xff] %vm257_vm0, %v10197_v2  ;;  %3860 = vst.msk [vmem:[#allocation3 + $0x38] sm:$0xff] %vm257_vm0, %v10197_v2 }
  0x36   : > { %3861 = vst.msk [vmem:[#allocation3 + $0x40] sm:$0xff] %vm257_vm0, %v10197_v2  ;;  %3862 = vst.msk [vmem:[#allocation3 + $0x48] sm:$0xff] %vm257_vm0, %v10197_v2 }
  0x37   : > { %3863 = vst.msk [vmem:[#allocation3 + $0x50] sm:$0xff] %vm257_vm0, %v10197_v2  ;;  %3864 = vst.msk [vmem:[#allocation3 + $0x58] sm:$0xff] %vm257_vm0, %v10197_v2 }
  0x38   : > { %3865 = vst.msk [vmem:[#allocation3 + $0x60] sm:$0xff] %vm257_vm0, %v10197_v2  ;;  %3866 = vst.msk [vmem:[#allocation3 + $0x68] sm:$0xff] %vm257_vm0, %v10197_v2 }
  0x39   : > { %3867 = vst.msk [vmem:[#allocation3 + $0x70] sm:$0xff] %vm257_vm0, %v10197_v2  ;;  %3868 = vst.msk [vmem:[#allocation3 + $0x78] sm:$0xff] %vm257_vm0, %v10197_v2 }
  0x3a   : > { %3869 = vst.msk [vmem:[#allocation3 + $0x80] sm:$0xff] %vm257_vm0, %v10197_v2  ;;  %3870 = vst.msk [vmem:[#allocation3 + $0x88] sm:$0xff] %vm257_vm0, %v10197_v2 }
  0x3b   : > { %3871 = vst.msk [vmem:[#allocation3 + $0x90] sm:$0xff] %vm257_vm0, %v10197_v2  ;;  %3872 = vst.msk [vmem:[#allocation3 + $0x98] sm:$0xff] %vm257_vm0, %v10197_v2 }
  0x3c   : > { %3873 = vst.msk [vmem:[#allocation3 + $0xa0] sm:$0xff] %vm257_vm0, %v10197_v2  ;;  %3874 = vst.msk [vmem:[#allocation3 + $0xa8] sm:$0xff] %vm257_vm0, %v10197_v2 }
  0x3d   : > { %3875 = vst.msk [vmem:[#allocation3 + $0xb0] sm:$0xff] %vm257_vm0, %v10197_v2  ;;  %3876 = vst.msk [vmem:[#allocation3 + $0xb8] sm:$0xff] %vm257_vm0, %v10197_v2 }
  0x3e   : > { %3877 = vst.msk [vmem:[#allocation3 + $0xc0] sm:$0xff] %vm257_vm0, %v10197_v2  ;;  %3878 = vst.msk [vmem:[#allocation3 + $0xc8] sm:$0xff] %vm257_vm0, %v10197_v2 }
  0x3f   : > { %3879 = vst.msk [vmem:[#allocation3 + $0xd0] sm:$0xff] %vm257_vm0, %v10197_v2  ;;  %3880 = vst.msk [vmem:[#allocation3 + $0xd8] sm:$0xff] %vm257_vm0, %v10197_v2 }
  0x40   : > { %3881 = vst.msk [vmem:[#allocation3 + $0xe0] sm:$0xff] %vm257_vm0, %v10197_v2  ;;  %3882 = vst.msk [vmem:[#allocation3 + $0xe8] sm:$0xff] %vm257_vm0, %v10197_v2 }
  0x41   : > { %3883 = vst.msk [vmem:[#allocation3 + $0xf0] sm:$0xff] %vm257_vm0, %v10197_v2  ;;  %3884 = vst.msk [vmem:[#allocation3 + $0xf8] sm:$0xff] %vm257_vm0, %v10197_v2 }
  0x42   : > { %3885 = vst.msk [vmem:[#allocation3 + $0x100] sm:$0xff] %vm257_vm0, %v10197_v2  ;;  %3886 = vst.msk [vmem:[#allocation3 + $0x108] sm:$0xff] %vm257_vm0, %v10197_v2 }
  0x43   : > { %3887 = vst.msk [vmem:[#allocation3 + $0x110] sm:$0xff] %vm257_vm0, %v10197_v2  ;;  %3888 = vst.msk [vmem:[#allocation3 + $0x118] sm:$0xff] %vm257_vm0, %v10197_v2 }
  0x44   : > { %3889 = vst.msk [vmem:[#allocation3 + $0x120] sm:$0xff] %vm257_vm0, %v10197_v2  ;;  %3890 = vst.msk [vmem:[#allocation3 + $0x128] sm:$0xff] %vm257_vm0, %v10197_v2 }
  0x45   : > { %3891 = vst.msk [vmem:[#allocation3 + $0x130] sm:$0xff] %vm257_vm0, %v10197_v2  ;;  %3892 = vst.msk [vmem:[#allocation3 + $0x138] sm:$0xff] %vm257_vm0, %v10197_v2 }
  0x46   : > { %3893 = vst.msk [vmem:[#allocation3 + $0x140] sm:$0xff] %vm257_vm0, %v10197_v2  ;;  %3894 = vst.msk [vmem:[#allocation3 + $0x148] sm:$0xff] %vm257_vm0, %v10197_v2 }
  0x47   : > { %3895 = vst.msk [vmem:[#allocation3 + $0x150] sm:$0xff] %vm257_vm0, %v10197_v2  ;;  %3896 = vst.msk [vmem:[#allocation3 + $0x158] sm:$0xff] %vm257_vm0, %v10197_v2 }
  0x48   : > { %3897 = vst.msk [vmem:[#allocation3 + $0x160] sm:$0xff] %vm257_vm0, %v10197_v2  ;;  %3898 = vst.msk [vmem:[#allocation3 + $0x168] sm:$0xff] %vm257_vm0, %v10197_v2 }
  0x49   : > { %3899 = vst.msk [vmem:[#allocation3 + $0x170] sm:$0xff] %vm257_vm0, %v10197_v2  ;;  %3900 = vst.msk [vmem:[#allocation3 + $0x178] sm:$0xff] %vm257_vm0, %v10197_v2 }
  0x4a   : > { %3901 = vst.msk [vmem:[#allocation3 + $0x180] sm:$0xff] %vm257_vm0, %v10197_v2  ;;  %3902 = vst.msk [vmem:[#allocation3 + $0x188] sm:$0xff] %vm257_vm0, %v10197_v2 }
  0x4b   : > { %3903 = vst.msk [vmem:[#allocation3 + $0x190] sm:$0xff] %vm257_vm0, %v10197_v2  ;;  %3904 = vst.msk [vmem:[#allocation3 + $0x198] sm:$0xff] %vm257_vm0, %v10197_v2 }
  0x4c   : > { %3905 = vst.msk [vmem:[#allocation3 + $0x1a0] sm:$0xff] %vm257_vm0, %v10197_v2  ;;  %3906 = vst.msk [vmem:[#allocation3 + $0x1a8] sm:$0xff] %vm257_vm0, %v10197_v2 }
  0x4d   : > { %3907 = vst.msk [vmem:[#allocation3 + $0x1b0] sm:$0xff] %vm257_vm0, %v10197_v2  ;;  %3908 = vst.msk [vmem:[#allocation3 + $0x1b8] sm:$0xff] %vm257_vm0, %v10197_v2 }
  0x4e   : > { %3909 = vst.msk [vmem:[#allocation3 + $0x1c0] sm:$0xff] %vm257_vm0, %v10197_v2  ;;  %3910 = vst.msk [vmem:[#allocation3 + $0x1c8] sm:$0xff] %vm257_vm0, %v10197_v2 }
  0x4f   : > { %3911 = vst.msk [vmem:[#allocation3 + $0x1d0] sm:$0xff] %vm257_vm0, %v10197_v2  ;;  %3912 = vst.msk [vmem:[#allocation3 + $0x1d8] sm:$0xff] %vm257_vm0, %v10197_v2 }
  0x50   : > { %3913 = vst.msk [vmem:[#allocation3 + $0x1e0] sm:$0xff] %vm257_vm0, %v10197_v2  ;;  %3914 = vst.msk [vmem:[#allocation3 + $0x1e8] sm:$0xff] %vm257_vm0, %v10197_v2 }
  0x51   : > { %3915 = vst.msk [vmem:[#allocation3 + $0x1f0] sm:$0xff] %vm257_vm0, %v10197_v2  ;;  %3916 = vst.msk [vmem:[#allocation3 + $0x1f8] sm:$0xff] %vm257_vm0, %v10197_v2 }
  0x52   : > { %3917 = vst.msk [vmem:[#allocation3 + $0x200] sm:$0xff] %vm257_vm0, %v10197_v2  ;;  %3918 = vst.msk [vmem:[#allocation3 + $0x208] sm:$0xff] %vm257_vm0, %v10197_v2 }
  0x53   : > { %3919 = vst.msk [vmem:[#allocation3 + $0x210] sm:$0xff] %vm257_vm0, %v10197_v2  ;;  %3920 = vst.msk [vmem:[#allocation3 + $0x218] sm:$0xff] %vm257_vm0, %v10197_v2 }
  0x54   : > { %3921 = vst.msk [vmem:[#allocation3 + $0x220] sm:$0xff] %vm257_vm0, %v10197_v2  ;;  %3922 = vst.msk [vmem:[#allocation3 + $0x228] sm:$0xff] %vm257_vm0, %v10197_v2 }
  0x55   : > { %3923 = vst.msk [vmem:[#allocation3 + $0x230] sm:$0xff] %vm257_vm0, %v10197_v2  ;;  %3924 = vst.msk [vmem:[#allocation3 + $0x238] sm:$0xff] %vm257_vm0, %v10197_v2  ;;  %v363_v2 = vld [vmem:[#allocation2 + $0x7] sm:$0xff] }
  0x56   : > { %12652 = vst [vmem:[#allocation4_spill] sm:$0xff] %v10558_v3  ;;  %12653 = vst [vmem:[#allocation5_spill] sm:$0xff] %v10561_v4 }
  0x57   : > { %12654 = vst [vmem:[#allocation6_spill] sm:$0xff] %v10564_v5  ;;  %331 = vst.msk [vmem:[#allocation2 + $0x28] sm:$0xff] %vm257_vm0, %v10558_v3  ;;  %v1072_v3 = vld [vmem:[#allocation2 + $0x9] sm:$0xff] }
  0x58   : > { %332 = vst.msk [vmem:[#allocation2 + $0x30] sm:$0xff] %vm257_vm0, %v10561_v4  ;;  %333 = vst.msk [vmem:[#allocation2 + $0x48] sm:$0xff] %vm257_vm0, %v10564_v5 }
  0x59   : > { %12655 = vst [vmem:[#allocation7_spill] sm:$0xff] %v10573_v6  ;;  %12656 = vst [vmem:[#allocation8_spill] sm:$0xff] %v10576_v7 }
  0x5a   : > { %12657 = vst [vmem:[#allocation9_spill] sm:$0xff] %v10579_v8  ;;  %334 = vst.msk [vmem:[#allocation2 + $0x50] sm:$0xff] %vm257_vm0, %v10573_v6 }
  0x5b   : > { %335 = vst.msk [vmem:[#allocation2 + $0x68] sm:$0xff] %vm257_vm0, %v10576_v7  ;;  %336 = vst.msk [vmem:[#allocation2 + $0x70] sm:$0xff] %vm257_vm0, %v10579_v8  ;;  %v10950_v7 = vld [vmem:[%s10555_s28 + $0xf0] sm:$0xff]  ;;  %v10955_v8 = vld [vmem:[%s10555_s28 + $0xf8] sm:$0xff] }
  0x5c   : > { %12658 = vst [vmem:[#allocation10_spill] sm:$0xff] %v10593_v12  ;;  %337 = vst.msk [vmem:[#allocation2 + $0x88] sm:$0xff] %vm257_vm0, %v10593_v12 }
  0x5d   : > { %12659 = vst [vmem:[#allocation11_spill] sm:$0xff] %v10599_v13  ;;  %12660 = vst [vmem:[#allocation12_spill] sm:$0xff] %v10602_v14 }
  0x5e   : > { %12661 = vst [vmem:[#allocation13_spill] sm:$0xff] %v10605_v15  ;;  %338 = vst.msk [vmem:[#allocation2 + $0x90] sm:$0xff] %vm257_vm0, %v10599_v13  ;;  %v10670_v28 = vld [vmem:[#allocation2 + $0x28] sm:$0xff] }
  0x5f   : > { %339 = vst.msk [vmem:[#allocation2 + $0xa8] sm:$0xff] %vm257_vm0, %v10602_v14  ;;  %340 = vst.msk [vmem:[#allocation2 + $0xb0] sm:$0xff] %vm257_vm0, %v10605_v15  ;;  %v10672_v29 = vld [vmem:[#allocation2 + $0x30] sm:$0xff]  ;;  %v10674_v30 = vld [vmem:[#allocation2 + $0x48] sm:$0xff]  ;;  %8773 = vmatprep.mubr.msk.f32.mxu0 %vm257_vm0, %v10670_v28 }
  0x60   : > { %12662 = vst [vmem:[#allocation14_spill] sm:$0xff] %v10615_v16  ;;  %12663 = vst [vmem:[#allocation15_spill] sm:$0xff] %v10618_v17  ;;  %8774 = vmatmul.mubr.msk.f32.gmra.mrb[2].mxu0 %vm257_vm0, %v10672_v29  ;;  %v10837_v11 = vld [vmem:[#allocation2 + $0x27] sm:$0xff] }
  0x61   : > { %12664 = vst [vmem:[#allocation16_spill] sm:$0xff] %v10621_v18  ;;  %341 = vst.msk [vmem:[#allocation2 + $0xc8] sm:$0xff] %vm257_vm0, %v10615_v16  ;;  %8776 = vmatprep.mubr.msk.f32.mxu0 %vm257_vm0, %v10674_v30  ;;  %v10694_v33 = vld [vmem:[#allocation2 + $0x50] sm:$0xff] }
  0x62   : > { %342 = vst.msk [vmem:[#allocation2 + $0xd0] sm:$0xff] %vm257_vm0, %v10618_v17  ;;  %343 = vst.msk [vmem:[#allocation2 + $0xe8] sm:$0xff] %vm257_vm0, %v10621_v18  ;;  %v10700_v34 = vld [vmem:[#allocation2 + $0x68] sm:$0xff]  ;;  %v10706_v35 = vld [vmem:[#allocation2 + $0x70] sm:$0xff] }
  0x63   : > { %12665 = vst [vmem:[#allocation17_spill] sm:$0xff] %v10631_v19  ;;  %12666 = vst [vmem:[#allocation18_spill] sm:$0xff] %v10634_v20  ;;  %v10708_v36 = vld [vmem:[#allocation2 + $0x88] sm:$0xff] }
  0x64   : > { %12667 = vst [vmem:[#allocation19_spill] sm:$0xff] %v10637_v21  ;;  %344 = vst.msk [vmem:[#allocation2 + $0xf0] sm:$0xff] %vm257_vm0, %v10631_v19  ;;  %8777 = vmatmul.mubr.msk.f32.gmra.mrb[4].mxu0 %vm257_vm0, %v10694_v33  ;;  %v10976_v4 = vld [vmem:[#allocation2 + $0x29] sm:$0xff] }
  0x65   : > { %345 = vst.msk [vmem:[#allocation2 + $0x108] sm:$0xff] %vm257_vm0, %v10634_v20  ;;  %346 = vst.msk [vmem:[#allocation2 + $0x110] sm:$0xff] %vm257_vm0, %v10637_v21  ;;  %8779 = vmatprep.mubr.msk.f32.mxu0 %vm257_vm0, %v10700_v34  ;;  %v10744_v43 = vld [vmem:[#allocation2 + $0x90] sm:$0xff] }
  0x66   : > { %12668 = vst [vmem:[#allocation20_spill] sm:$0xff] %v10646_v22  ;;  %12669 = vst [vmem:[#allocation21_spill] sm:$0xff] %v10649_v23  ;;  %v10746_v44 = vld [vmem:[#allocation2 + $0xa8] sm:$0xff]  ;;  %v10752_v45 = vld [vmem:[#allocation2 + $0xb0] sm:$0xff] }
  0x67   : > { %12670 = vst [vmem:[#allocation22_spill] sm:$0xff] %v10652_v24  ;;  %347 = vst.msk [vmem:[#allocation2 + $0x128] sm:$0xff] %vm257_vm0, %v10646_v22 }
  0x68   : > { %348 = vst.msk [vmem:[#allocation2 + $0x130] sm:$0xff] %vm257_vm0, %v10649_v23  ;;  %349 = vst.msk [vmem:[#allocation2 + $0x148] sm:$0xff] %vm257_vm0, %v10652_v24  ;;  %8780 = vmatmul.mubr.msk.f32.gmra.mrb[6].mxu0 %vm257_vm0, %v10706_v35  ;;  %v10754_v46 = vld [vmem:[#allocation2 + $0xc8] sm:$0xff] }
  0x69   : > { %12671 = vst [vmem:[#allocation23_spill] sm:$0xff] %v10662_v25  ;;  %12672 = vst [vmem:[#allocation24_spill] sm:$0xff] %v10665_v26  ;;  %8782 = vmatprep.mubr.msk.f32.mxu0 %vm257_vm0, %v10708_v36  ;;  %v10760_v47 = vld [vmem:[#allocation2 + $0xd0] sm:$0xff]  ;;  %v10762_v48 = vld [vmem:[#allocation2 + $0xe8] sm:$0xff] }
  0x6a   : > { %12673 = vst [vmem:[#allocation25_spill] sm:$0xff] %v10668_v27  ;;  %350 = vst.msk [vmem:[#allocation2 + $0x150] sm:$0xff] %vm257_vm0, %v10662_v25 }
  0x6b   : > { %351 = vst.msk [vmem:[#allocation2 + $0x168] sm:$0xff] %vm257_vm0, %v10665_v26  ;;  %352 = vst.msk [vmem:[#allocation2 + $0x170] sm:$0xff] %vm257_vm0, %v10668_v27  ;;  %v10768_v49 = vld [vmem:[#allocation2 + $0xf0] sm:$0xff]  ;;  %v10891_v27 = vld [vmem:[#allocation2 + $0xe7] sm:$0xff] }
  0x6c   : > { %12674 = vst [vmem:[#allocation26_spill] sm:$0xff] %v10687_v31  ;;  %12675 = vst [vmem:[#allocation27_spill] sm:$0xff] %v10690_v32  ;;  %8783 = vmatmul.mubr.msk.f32.gmra.mrb[8].mxu0 %vm257_vm0, %v10744_v43  ;;  %v10770_v50 = vld [vmem:[#allocation2 + $0x108] sm:$0xff]  ;;  %v10776_v51 = vld [vmem:[#allocation2 + $0x110] sm:$0xff] }
  0x6d   : > { %353 = vst.msk [vmem:[#allocation2 + $0x188] sm:$0xff] %vm257_vm0, %v10687_v31  ;;  %354 = vst.msk [vmem:[#allocation2 + $0x190] sm:$0xff] %vm257_vm0, %v10690_v32  ;;  %8785 = vmatprep.mubr.msk.f32.mxu0 %vm257_vm0, %v10746_v44  ;;  %v10881_v31 = vld [vmem:[#allocation2 + $0xaf] sm:$0xff]  ;;  %v10883_v32 = vld [vmem:[#allocation2 + $0xc7] sm:$0xff] }
  0x6e   : > { %12676 = vst [vmem:[#allocation28_spill] sm:$0xff] %v10711_v37  ;;  %12677 = vst [vmem:[#allocation29_spill] sm:$0xff] %v10714_v38  ;;  %v10778_v52 = vld [vmem:[#allocation2 + $0x128] sm:$0xff] }
  0x6f   : > { %12678 = vst [vmem:[#allocation30_spill] sm:$0xff] %v10717_v39  ;;  %355 = vst.msk [vmem:[#allocation2 + $0x1a8] sm:$0xff] %vm257_vm0, %v10711_v37  ;;  %v10784_v53 = vld [vmem:[#allocation2 + $0x130] sm:$0xff]  ;;  %v10786_v54 = vld [vmem:[#allocation2 + $0x148] sm:$0xff] }
  0x70   : > { %356 = vst.msk [vmem:[#allocation2 + $0x1b0] sm:$0xff] %vm257_vm0, %v10714_v38  ;;  %357 = vst.msk [vmem:[#allocation2 + $0x1c8] sm:$0xff] %vm257_vm0, %v10717_v39  ;;  %8786 = vmatmul.mubr.msk.f32.gmra.mrb[10].mxu0 %vm257_vm0, %v10752_v45  ;;  %v10850_v39 = vld [vmem:[#allocation2 + $0x47] sm:$0xff]  ;;  %v10873_v37 = vld [vmem:[#allocation2 + $0x8f] sm:$0xff] }
  0x71   : > { %12679 = vst [vmem:[#allocation31_spill] sm:$0xff] %v10726_v40  ;;  %12680 = vst [vmem:[#allocation32_spill] sm:$0xff] %v10729_v41  ;;  %8788 = vmatprep.mubr.msk.f32.mxu0 %vm257_vm0, %v10754_v46  ;;  %v10792_v55 = vld [vmem:[#allocation2 + $0x150] sm:$0xff]  ;;  %v10875_v38 = vld [vmem:[#allocation2 + $0xa7] sm:$0xff] }
  0x72   : > { %12681 = vst [vmem:[#allocation33_spill] sm:$0xff] %v10732_v42  ;;  %358 = vst.msk [vmem:[#allocation2 + $0x1d0] sm:$0xff] %vm257_vm0, %v10726_v40  ;;  %v10794_v56 = vld [vmem:[#allocation2 + $0x168] sm:$0xff]  ;;  %v10800_v57 = vld [vmem:[#allocation2 + $0x170] sm:$0xff] }
  0x73   : > { %359 = vst.msk [vmem:[#allocation2 + $0x1e8] sm:$0xff] %vm257_vm0, %v10729_v41  ;;  %360 = vst.msk [vmem:[#allocation2 + $0x1f0] sm:$0xff] %vm257_vm0, %v10732_v42  ;;  %v10842_v41 = vld [vmem:[%s12501_s1 + $0x18] sm:$0xff]  ;;  %v10848_v42 = vld [vmem:[#allocation2 + $0x2f] sm:$0xff] }
  0x74   : > { %8789 = vmatmul.mubr.msk.f32.gmra.mrb[12].mxu0 %vm257_vm0, %v10760_v47  ;;  %v10802_v58 = vld [vmem:[#allocation2 + $0x188] sm:$0xff]  ;;  %v10808_v59 = vld [vmem:[#allocation2 + $0x190] sm:$0xff]  ;;  %12686 = vst [vmem:[#allocation38_spill] sm:$0xff] %v10950_v7  ;;  %361 = vst.msk [vmem:[#allocation2 + $0x208] sm:$0xff] %vm257_vm0, %v10950_v7 }
  0x75   : > { %8791 = vmatprep.mubr.msk.f32.mxu0 %vm257_vm0, %v10762_v48  ;;  %v10867_v40 = vld [vmem:[#allocation2 + $0x87] sm:$0xff]  ;;  %v10889_v26 = vld [vmem:[#allocation2 + $0xcf] sm:$0xff]  ;;  %12687 = vst [vmem:[#allocation39_spill] sm:$0xff] %v10955_v8  ;;  %362 = vst.msk [vmem:[#allocation2 + $0x210] sm:$0xff] %vm257_vm0, %v10955_v8 }
  0x76   : > { %v10810_v60 = vld [vmem:[#allocation2 + $0x1a8] sm:$0xff]  ;;  %v1073_v8 = vld [vmem:[#allocation2 + $0x11] sm:$0xff]  ;;  %12688 = vst [vmem:[#allocation40_spill] sm:$0xff] %v10976_v4 }
  0x77   : > { %v10816_v61 = vld [vmem:[#allocation2 + $0x1b0] sm:$0xff]  ;;  %v10818_v62 = vld [vmem:[#allocation2 + $0x1c8] sm:$0xff] }
  0x78   : > { %8792 = vmatmul.mubr.msk.f32.gmra.mrb[14].mxu0 %vm257_vm0, %v10768_v49  ;;  %12682 = vst [vmem:[#allocation34_spill] sm:$0xff] %v10818_v62  ;;  %v10897_v24 = vld [vmem:[#allocation2 + $0xef] sm:$0xff]  ;;  %v10899_v25 = vld [vmem:[#allocation2 + $0x107] sm:$0xff] }
  0x79   : > { %8794 = vmatprep.mubr.msk.f32.mxu0 %vm257_vm0, %v10770_v50  ;;  %v10824_v63 = vld [vmem:[#allocation2 + $0x1d0] sm:$0xff]  ;;  %v10907_v23 = vld [vmem:[#allocation2 + $0x127] sm:$0xff] }
  0x7a   : > { %12683 = vst [vmem:[#allocation35_spill] sm:$0xff] %v10824_v63  ;;  %v10826_v0 = vld [vmem:[#allocation2 + $0x1e8] sm:$0xff]  ;;  %v10832_v1 = vld [vmem:[#allocation2 + $0x1f0] sm:$0xff] }
  0x7b   : > { %12684 = vst [vmem:[#allocation36_spill] sm:$0xff] %v10826_v0  ;;  %12685 = vst [vmem:[#allocation37_spill] sm:$0xff] %v10832_v1  ;;  %v10905_v22 = vld [vmem:[#allocation2 + $0x10f] sm:$0xff]  ;;  %v10915_v21 = vld [vmem:[#allocation2 + $0x147] sm:$0xff] }
  0x7c   : > { %8795 = vmatmul.mubr.msk.f32.gmra.mrb[16].mxu0 %vm257_vm0, %v10776_v51  ;;  %v10913_v20 = vld [vmem:[#allocation2 + $0x12f] sm:$0xff]  ;;  %v10923_v19 = vld [vmem:[#allocation2 + $0x167] sm:$0xff] }
  0x7d   : > { %8797 = vmatprep.mubr.msk.f32.mxu0 %vm257_vm0, %v10778_v52  ;;  %v10921_v18 = vld [vmem:[#allocation2 + $0x14f] sm:$0xff]  ;;  %v10931_v17 = vld [vmem:[#allocation2 + $0x187] sm:$0xff] }
  0x7e   : > { %v10929_v16 = vld [vmem:[#allocation2 + $0x16f] sm:$0xff]  ;;  %v10939_v15 = vld [vmem:[#allocation2 + $0x1a7] sm:$0xff] }
  0x7f   : > { %v10937_v14 = vld [vmem:[#allocation2 + $0x18f] sm:$0xff]  ;;  %v10947_v13 = vld [vmem:[#allocation2 + $0x1c7] sm:$0xff] }
  0x80   : > { %8798 = vmatmul.mubr.msk.f32.gmra.mrb[18].mxu0 %vm257_vm0, %v10784_v53  ;;  %v10945_v12 = vld [vmem:[#allocation2 + $0x1af] sm:$0xff]  ;;  %v10965_v6 = vld [vmem:[#allocation2 + $0x1e7] sm:$0xff] }
  0x81   : > { %8800 = vmatprep.mubr.msk.f32.mxu0 %vm257_vm0, %v10786_v54  ;;  %v10963_v5 = vld [vmem:[#allocation2 + $0x1cf] sm:$0xff] }
  0x82   : > { %v10971_v7 = vld [vmem:[#allocation2 + $0x1ef] sm:$0xff] }
  0x84   : > { %8801 = vmatmul.mubr.msk.f32.gmra.mrb[20].mxu0 %vm257_vm0, %v10792_v55 }
  0x85   : > { %8803 = vmatprep.mubr.msk.f32.mxu0 %vm257_vm0, %v10794_v56 }
  0x88   : > { %8804 = vmatmul.mubr.msk.f32.gmra.mrb[22].mxu0 %vm257_vm0, %v10800_v57 }
  0x89   : > { %8806 = vmatprep.mubr.msk.f32.mxu0 %vm257_vm0, %v10802_v58 }
  0x8c   : > { %8807 = vmatmul.mubr.msk.f32.gmra.mrb[24].mxu0 %vm257_vm0, %v10808_v59 }
  0x8d   : > { %8809 = vmatprep.mubr.msk.f32.mxu0 %vm257_vm0, %v10810_v60 }
  0x90   : > { %8810 = vmatmul.mubr.msk.f32.gmra.mrb[26].mxu0 %vm257_vm0, %v10816_v61 }
  0x91   : > { %8812 = vmatprep.mubr.msk.f32.mxu0 %vm257_vm0, %v10818_v62 }
  0x94   : > { %8813 = vmatmul.mubr.msk.f32.gmra.mrb[28].mxu0 %vm257_vm0, %v10824_v63  ;;  %v10989_v63 = vld [vmem:[#allocation2 + $0x49] sm:$0xff] }
  0x95   : > { %8815 = vmatprep.mubr.msk.f32.mxu0 %vm257_vm0, %v10826_v0  ;;  %v10987_v0 = vld [vmem:[#allocation2 + $0x31] sm:$0xff]  ;;  %12690 = vst [vmem:[#allocation42_spill] sm:$0xff] %v10989_v63 }
  0x96   : > { %12689 = vst [vmem:[#allocation41_spill] sm:$0xff] %v10987_v0 }
  0x98   : > { %8816 = vmatmul.mubr.msk.f32.gmra.mrb[30].mxu0 %vm257_vm0, %v10832_v1  ;;  %v10981_v1 = vld [vmem:[%s12501_s1 + $0x20] sm:$0xff] }
  0x99   : > { %8820 = vmatprep.mubr.msk.f32.mxu0 %vm257_vm0, %v363_v2  ;;  %v10857_v2 = vld [vmem:[#allocation2 + $0x4f] sm:$0xff] }
  0x9c   : > { %8821 = vmatmul.mubr.msk.f32.vlgmr.msra.gmra.mrb[0].mxu0 %vm257_vm0, %v364_v10  ;;  %v10859_v10 = vld [vmem:[#allocation2 + $0x67] sm:$0xff] }
  0x9d   : > { %8869 = vmatpush3.msra.mxu0 %v10584_v9  ;;  %8823 = vmatprep.mubr.msk.f32.mxu0 %vm257_vm0, %v10837_v11  ;;  %v10865_v9 = vld [vmem:[#allocation2 + $0x6f] sm:$0xff] }
  0x9e   : > { %8918 = vmatprep.subr.mxu0 %v10842_v41 }
  0xa0   : > { %8824 = vmatmul.mubr.msk.f32.gmra.mrb[2].mxu0 %vm257_vm0, %v10848_v42 }
  0xa1   : > { %8826 = vmatprep.mubr.msk.f32.mxu0 %vm257_vm0, %v10850_v39 }
  0xa4   : > { %8827 = vmatmul.mubr.msk.f32.gmra.mrb[4].mxu0 %vm257_vm0, %v10857_v2 }
  0xa5   : > { %8829 = vmatprep.mubr.msk.f32.mxu0 %vm257_vm0, %v10859_v10 }
  0xa8   : > { %8830 = vmatmul.mubr.msk.f32.gmra.mrb[6].mxu0 %vm257_vm0, %v10865_v9 }
  0xa9   : > { %8832 = vmatprep.mubr.msk.f32.mxu0 %vm257_vm0, %v10867_v40 }
  0xac   : > { %8833 = vmatmul.mubr.msk.f32.gmra.mrb[8].mxu0 %vm257_vm0, %v10873_v37 }
  0xad   : > { %8835 = vmatprep.mubr.msk.f32.mxu0 %vm257_vm0, %v10875_v38 }
  0xb0   : > { %8836 = vmatmul.mubr.msk.f32.gmra.mrb[10].mxu0 %vm257_vm0, %v10881_v31 }
  0xb1   : > { %8838 = vmatprep.mubr.msk.f32.mxu0 %vm257_vm0, %v10883_v32 }
  0xb4   : > { %8839 = vmatmul.mubr.msk.f32.gmra.mrb[12].mxu0 %vm257_vm0, %v10889_v26 }
  0xb5   : > { %8841 = vmatprep.mubr.msk.f32.mxu0 %vm257_vm0, %v10891_v27 }
  0xb8   : > { %8842 = vmatmul.mubr.msk.f32.gmra.mrb[14].mxu0 %vm257_vm0, %v10897_v24 }
  0xb9   : > { %8844 = vmatprep.mubr.msk.f32.mxu0 %vm257_vm0, %v10899_v25 }
  0xbc   : > { %8845 = vmatmul.mubr.msk.f32.gmra.mrb[16].mxu0 %vm257_vm0, %v10905_v22 }
  0xbd   : > { %8847 = vmatprep.mubr.msk.f32.mxu0 %vm257_vm0, %v10907_v23 }
  0xc0   : > { %8848 = vmatmul.mubr.msk.f32.gmra.mrb[18].mxu0 %vm257_vm0, %v10913_v20 }
  0xc1   : > { %8850 = vmatprep.mubr.msk.f32.mxu0 %vm257_vm0, %v10915_v21 }
  0xc4   : > { %8851 = vmatmul.mubr.msk.f32.gmra.mrb[20].mxu0 %vm257_vm0, %v10921_v18 }
  0xc5   : > { %8853 = vmatprep.mubr.msk.f32.mxu0 %vm257_vm0, %v10923_v19 }
  0xc8   : > { %8854 = vmatmul.mubr.msk.f32.gmra.mrb[22].mxu0 %vm257_vm0, %v10929_v16 }
  0xc9   : > { %8856 = vmatprep.mubr.msk.f32.mxu0 %vm257_vm0, %v10931_v17 }
  0xcc   : > { %8857 = vmatmul.mubr.msk.f32.gmra.mrb[24].mxu0 %vm257_vm0, %v10937_v14 }
  0xcd   : > { %8859 = vmatprep.mubr.msk.f32.mxu0 %vm257_vm0, %v10939_v15 }
  0xd0   : > { %8860 = vmatmul.mubr.msk.f32.gmra.mrb[26].mxu0 %vm257_vm0, %v10945_v12 }
  0xd1   : > { %8862 = vmatprep.mubr.msk.f32.mxu0 %vm257_vm0, %v10947_v13 }
  0xd4   : > { %8863 = vmatmul.mubr.msk.f32.gmra.mrb[28].mxu0 %vm257_vm0, %v10963_v5 }
  0xd5   : > { %8865 = vmatprep.mubr.msk.f32.mxu0 %vm257_vm0, %v10965_v6 }
  0xd8   : > { %8866 = vmatmul.mubr.msk.f32.gmra.mrb[30].mxu0 %vm257_vm0, %v10971_v7 }
  0xd9   : > { %8870 = vmatprep.mubr.msk.f32.mxu0 %vm257_vm0, %v1072_v3  ;;  %v10996_v3 = vld [vmem:[#allocation2 + $0x51] sm:$0xff] }
  0xda   : > { %12691 = vst [vmem:[#allocation43_spill] sm:$0xff] %v10996_v3 }
  0xdc   : > { %8871 = vmatmul.mubr.msk.f32.vlgmr.msra.gmra.mrb[0].mxu0 %vm257_vm0, %v1073_v8  ;;  %v10998_v8 = vld [vmem:[#allocation2 + $0x69] sm:$0xff] }
  0xdd   : > { %8919 = vmatpush3.msra.mxu0 %v10842_v41  ;;  %8873 = vmatprep.mubr.msk.f32.mxu0 %vm257_vm0, %v10976_v4  ;;  %12692 = vst [vmem:[#allocation44_spill] sm:$0xff] %v10998_v8  ;;  %v11004_v41 = vld [vmem:[#allocation2 + $0x71] sm:$0xff]  ;;  %v11006_v4 = vld [vmem:[#allocation2 + $0x89] sm:$0xff] }
  0xde   : > { %8968 = vmatprep.subr.mxu0 %v10981_v1  ;;  %12693 = vst [vmem:[#allocation45_spill] sm:$0xff] %v11004_v41  ;;  %12694 = vst [vmem:[#allocation46_spill] sm:$0xff] %v11006_v4 }
  0xe0   : > { %8874 = vmatmul.mubr.msk.f32.gmra.mrb[2].mxu0 %vm257_vm0, %v10987_v0  ;;  %v11014_v0 = vld [vmem:[#allocation2 + $0xa9] sm:$0xff] }
  0xe1   : > { %8876 = vmatprep.mubr.msk.f32.mxu0 %vm257_vm0, %v10989_v63  ;;  %v11012_v63 = vld [vmem:[#allocation2 + $0x91] sm:$0xff]  ;;  %12696 = vst [vmem:[#allocation48_spill] sm:$0xff] %v11014_v0 }
  0xe2   : > { %12695 = vst [vmem:[#allocation47_spill] sm:$0xff] %v11012_v63 }
  0xe4   : > { %8877 = vmatmul.mubr.msk.f32.gmra.mrb[4].mxu0 %vm257_vm0, %v10996_v3  ;;  %v11022_v3 = vld [vmem:[#allocation2 + $0xc9] sm:$0xff] }
  0xe5   : > { %8879 = vmatprep.mubr.msk.f32.mxu0 %vm257_vm0, %v10998_v8  ;;  %v11020_v8 = vld [vmem:[#allocation2 + $0xb1] sm:$0xff]  ;;  %12698 = vst [vmem:[#allocation50_spill] sm:$0xff] %v11022_v3 }
  0xe6   : > { %12697 = vst [vmem:[#allocation49_spill] sm:$0xff] %v11020_v8 }
  0xe8   : > { %8880 = vmatmul.mubr.msk.f32.gmra.mrb[6].mxu0 %vm257_vm0, %v11004_v41  ;;  %v11030_v41 = vld [vmem:[#allocation2 + $0xe9] sm:$0xff] }
  0xe9   : > { %8882 = vmatprep.mubr.msk.f32.mxu0 %vm257_vm0, %v11006_v4  ;;  %v11028_v4 = vld [vmem:[#allocation2 + $0xd1] sm:$0xff]  ;;  %12700 = vst [vmem:[#allocation52_spill] sm:$0xff] %v11030_v41 }
  0xea   : > { %12699 = vst [vmem:[#allocation51_spill] sm:$0xff] %v11028_v4 }
  0xec   : > { %8883 = vmatmul.mubr.msk.f32.gmra.mrb[8].mxu0 %vm257_vm0, %v11012_v63  ;;  %v11038_v63 = vld [vmem:[#allocation2 + $0x109] sm:$0xff] }
  0xed   : > { %8885 = vmatprep.mubr.msk.f32.mxu0 %vm257_vm0, %v11014_v0  ;;  %v11036_v0 = vld [vmem:[#allocation2 + $0xf1] sm:$0xff]  ;;  %12702 = vst [vmem:[#allocation54_spill] sm:$0xff] %v11038_v63 }
  0xee   : > { %12701 = vst [vmem:[#allocation53_spill] sm:$0xff] %v11036_v0 }
  0xf0   : > { %8886 = vmatmul.mubr.msk.f32.gmra.mrb[10].mxu0 %vm257_vm0, %v11020_v8  ;;  %v11046_v8 = vld [vmem:[#allocation2 + $0x129] sm:$0xff] }
  0xf1   : > { %8888 = vmatprep.mubr.msk.f32.mxu0 %vm257_vm0, %v11022_v3  ;;  %v11044_v3 = vld [vmem:[#allocation2 + $0x111] sm:$0xff]  ;;  %12704 = vst [vmem:[#allocation56_spill] sm:$0xff] %v11046_v8 }
  0xf2   : > { %12703 = vst [vmem:[#allocation55_spill] sm:$0xff] %v11044_v3 }
  0xf4   : > { %8889 = vmatmul.mubr.msk.f32.gmra.mrb[12].mxu0 %vm257_vm0, %v11028_v4  ;;  %v11054_v4 = vld [vmem:[#allocation2 + $0x149] sm:$0xff] }
  0xf5   : > { %8891 = vmatprep.mubr.msk.f32.mxu0 %vm257_vm0, %v11030_v41  ;;  %v11052_v41 = vld [vmem:[#allocation2 + $0x131] sm:$0xff]  ;;  %12706 = vst [vmem:[#allocation58_spill] sm:$0xff] %v11054_v4 }
  0xf6   : > { %12705 = vst [vmem:[#allocation57_spill] sm:$0xff] %v11052_v41 }
  0xf8   : > { %8892 = vmatmul.mubr.msk.f32.gmra.mrb[14].mxu0 %vm257_vm0, %v11036_v0  ;;  %v11062_v0 = vld [vmem:[#allocation2 + $0x169] sm:$0xff] }
  0xf9   : > { %8894 = vmatprep.mubr.msk.f32.mxu0 %vm257_vm0, %v11038_v63  ;;  %v11060_v63 = vld [vmem:[#allocation2 + $0x151] sm:$0xff]  ;;  %12708 = vst [vmem:[#allocation60_spill] sm:$0xff] %v11062_v0 }
  0xfa   : > { %12707 = vst [vmem:[#allocation59_spill] sm:$0xff] %v11060_v63 }
  0xfc   : > { %8895 = vmatmul.mubr.msk.f32.gmra.mrb[16].mxu0 %vm257_vm0, %v11044_v3  ;;  %v11070_v3 = vld [vmem:[#allocation2 + $0x189] sm:$0xff] }
  0xfd   : > { %8897 = vmatprep.mubr.msk.f32.mxu0 %vm257_vm0, %v11046_v8  ;;  %v11068_v8 = vld [vmem:[#allocation2 + $0x171] sm:$0xff]  ;;  %12710 = vst [vmem:[#allocation62_spill] sm:$0xff] %v11070_v3 }
  0xfe   : > { %12709 = vst [vmem:[#allocation61_spill] sm:$0xff] %v11068_v8 }
 0x100   : > { %8898 = vmatmul.mubr.msk.f32.gmra.mrb[18].mxu0 %vm257_vm0, %v11052_v41  ;;  %v11078_v41 = vld [vmem:[#allocation2 + $0x1a9] sm:$0xff] }
 0x101   : > { %8900 = vmatprep.mubr.msk.f32.mxu0 %vm257_vm0, %v11054_v4  ;;  %v11076_v4 = vld [vmem:[#allocation2 + $0x191] sm:$0xff]  ;;  %12711 = vst [vmem:[#allocation63_spill] sm:$0xff] %v11078_v41 }
 0x104   : > { %8901 = vmatmul.mubr.msk.f32.gmra.mrb[20].mxu0 %vm257_vm0, %v11060_v63  ;;  %v11086_v63 = vld [vmem:[#allocation2 + $0x1c9] sm:$0xff] }
 0x105   : > { %8903 = vmatprep.mubr.msk.f32.mxu0 %vm257_vm0, %v11062_v0  ;;  %v11084_v0 = vld [vmem:[#allocation2 + $0x1b1] sm:$0xff]  ;;  %12712 = vst [vmem:[#allocation64_spill] sm:$0xff] %v11086_v63 }
 0x108   : > { %8904 = vmatmul.mubr.msk.f32.gmra.mrb[22].mxu0 %vm257_vm0, %v11068_v8  ;;  %v11094_v8 = vld [vmem:[#allocation2 + $0x1e9] sm:$0xff] }
 0x109   : > { %8906 = vmatprep.mubr.msk.f32.mxu0 %vm257_vm0, %v11070_v3  ;;  %v11092_v3 = vld [vmem:[#allocation2 + $0x1d1] sm:$0xff]  ;;  %12713 = vst [vmem:[#allocation65_spill] sm:$0xff] %v11094_v8 }
 0x10c   : > { %8907 = vmatmul.mubr.msk.f32.gmra.mrb[24].mxu0 %vm257_vm0, %v11076_v4 }
 0x10d   : > { %8909 = vmatprep.mubr.msk.f32.mxu0 %vm257_vm0, %v11078_v41  ;;  %v11100_v41 = vld [vmem:[#allocation2 + $0x1f1] sm:$0xff] }
 0x110   : > { %8910 = vmatmul.mubr.msk.f32.gmra.mrb[26].mxu0 %vm257_vm0, %v11084_v0 }
 0x111   : > { %8912 = vmatprep.mubr.msk.f32.mxu0 %vm257_vm0, %v11086_v63  ;;  %v7740_v63 = vld [vmem:[%s12501_s1 + $0x28] sm:$0xff] }
 0x114   : > { %8913 = vmatmul.mubr.msk.f32.gmra.mrb[28].mxu0 %vm257_vm0, %v11092_v3 }
 0x115   : > { %8915 = vmatprep.mubr.msk.f32.mxu0 %vm257_vm0, %v11094_v8 }
 0x118   : > { %8916 = vmatmul.mubr.msk.f32.gmra.mrb[30].mxu0 %vm257_vm0, %v11100_v41 }
 0x119   : > { %8920 = vmatprep.mubr.msk.f32.mxu0 %vm257_vm0, %v10837_v11  ;;  %v7773_v11 = vld [vmem:[%s12501_s1 + $0x30] sm:$0xff] }
 0x11c   : > { %8921 = vmatmul.mubr.msk.f32.vlgmr.msra.gmra.mrb[0].mxu0 %vm257_vm0, %v10848_v42  ;;  %v11166_v42 = vld [vmem:[#allocation2 + $0x207] sm:$0xff] }
 0x11d   : > { %8969 = vmatpush3.msra.mxu0 %v10981_v1  ;;  %8923 = vmatprep.mubr.msk.f32.mxu0 %vm257_vm0, %v10850_v39  ;;  %v11172_v1 = vld [vmem:[#allocation2 + $0x20f] sm:$0xff] }
 0x11e   : > { %9018 = vmatprep.subr.mxu0 %v7740_v63 }
 0x120   : > { %8924 = vmatmul.mubr.msk.f32.gmra.mrb[2].mxu0 %vm257_vm0, %v10857_v2 }
 0x121   : > { %8926 = vmatprep.mubr.msk.f32.mxu0 %vm257_vm0, %v10859_v10 }
 0x124   : > { %8927 = vmatmul.mubr.msk.f32.gmra.mrb[4].mxu0 %vm257_vm0, %v10865_v9 }
 0x125   : > { %8929 = vmatprep.mubr.msk.f32.mxu0 %vm257_vm0, %v10867_v40 }
 0x128   : > { %8930 = vmatmul.mubr.msk.f32.gmra.mrb[6].mxu0 %vm257_vm0, %v10873_v37 }
 0x129   : > { %8932 = vmatprep.mubr.msk.f32.mxu0 %vm257_vm0, %v10875_v38 }
 0x12c   : > { %8933 = vmatmul.mubr.msk.f32.gmra.mrb[8].mxu0 %vm257_vm0, %v10881_v31 }
 0x12d   : > { %8935 = vmatprep.mubr.msk.f32.mxu0 %vm257_vm0, %v10883_v32 }
 0x130   : > { %8936 = vmatmul.mubr.msk.f32.gmra.mrb[10].mxu0 %vm257_vm0, %v10889_v26 }
 0x131   : > { %8938 = vmatprep.mubr.msk.f32.mxu0 %vm257_vm0, %v10891_v27 }
 0x134   : > { %8939 = vmatmul.mubr.msk.f32.gmra.mrb[12].mxu0 %vm257_vm0, %v10897_v24 }
 0x135   : > { %8941 = vmatprep.mubr.msk.f32.mxu0 %vm257_vm0, %v10899_v25 }
 0x138   : > { %8942 = vmatmul.mubr.msk.f32.gmra.mrb[14].mxu0 %vm257_vm0, %v10905_v22 }
 0x139   : > { %8944 = vmatprep.mubr.msk.f32.mxu0 %vm257_vm0, %v10907_v23 }
 0x13c   : > { %8945 = vmatmul.mubr.msk.f32.gmra.mrb[16].mxu0 %vm257_vm0, %v10913_v20 }
 0x13d   : > { %8947 = vmatprep.mubr.msk.f32.mxu0 %vm257_vm0, %v10915_v21 }
 0x140   : > { %8948 = vmatmul.mubr.msk.f32.gmra.mrb[18].mxu0 %vm257_vm0, %v10921_v18 }
 0x141   : > { %8950 = vmatprep.mubr.msk.f32.mxu0 %vm257_vm0, %v10923_v19 }
 0x144   : > { %8951 = vmatmul.mubr.msk.f32.gmra.mrb[20].mxu0 %vm257_vm0, %v10929_v16 }
 0x145   : > { %8953 = vmatprep.mubr.msk.f32.mxu0 %vm257_vm0, %v10931_v17 }
 0x148   : > { %8954 = vmatmul.mubr.msk.f32.gmra.mrb[22].mxu0 %vm257_vm0, %v10937_v14 }
 0x149   : > { %8956 = vmatprep.mubr.msk.f32.mxu0 %vm257_vm0, %v10939_v15 }
 0x14c   : > { %8957 = vmatmul.mubr.msk.f32.gmra.mrb[24].mxu0 %vm257_vm0, %v10945_v12 }
 0x14d   : > { %8959 = vmatprep.mubr.msk.f32.mxu0 %vm257_vm0, %v10947_v13 }
 0x150   : > { %8960 = vmatmul.mubr.msk.f32.gmra.mrb[26].mxu0 %vm257_vm0, %v10963_v5 }
 0x151   : > { %8962 = vmatprep.mubr.msk.f32.mxu0 %vm257_vm0, %v10965_v6 }
 0x154   : > { %8963 = vmatmul.mubr.msk.f32.gmra.mrb[28].mxu0 %vm257_vm0, %v10971_v7 }
 0x155   : > { %8965 = vmatprep.mubr.msk.f32.mxu0 %vm257_vm0, %v11166_v42 }
 0x158   : > { %8966 = vmatmul.mubr.msk.f32.gmra.mrb[30].mxu0 %vm257_vm0, %v11172_v1 }
 0x159   : > { %8970 = vmatprep.mubr.msk.f32.mxu0 %vm257_vm0, %v10670_v28  ;;  %v12714_v28 = vld [vmem:[#allocation35_spill] sm:$0xff] }
 0x15c   : > { %8971 = vmatmul.mubr.msk.f32.vlgmr.msra.gmra.mrb[0].mxu0 %vm257_vm0, %v10672_v29  ;;  %v12715_v29 = vld [vmem:[#allocation36_spill] sm:$0xff] }
 0x15d   : > { %9019 = vmatpush3.msra.mxu0 %v7740_v63  ;;  %8973 = vmatprep.mubr.msk.f32.mxu0 %vm257_vm0, %v10674_v30  ;;  %v11237_v30 = vld [vmem:[#allocation2 + $0x208] sm:$0xff]  ;;  %v7806_v63 = vld [vmem:[%s12501_s1 + $0x38] sm:$0xff] }
 0x15e   : > { %9068 = vmatprep.subr.mxu0 %v7773_v11  ;;  %12716 = vst [vmem:[#allocation66_spill] sm:$0xff] %v11237_v30 }
 0x160   : > { %8974 = vmatmul.mubr.msk.f32.gmra.mrb[2].mxu0 %vm257_vm0, %v10694_v33  ;;  %v12717_v33 = vld [vmem:[#allocation37_spill] sm:$0xff] }
 0x161   : > { %8976 = vmatprep.mubr.msk.f32.mxu0 %vm257_vm0, %v10700_v34  ;;  %v11243_v34 = vld [vmem:[#allocation2 + $0x210] sm:$0xff] }
 0x162   : > { %12718 = vst [vmem:[#allocation67_spill] sm:$0xff] %v11243_v34 }
 0x164   : > { %8977 = vmatmul.mubr.msk.f32.gmra.mrb[4].mxu0 %vm257_vm0, %v10706_v35  ;;  %v12719_v35 = vld [vmem:[#allocation40_spill] sm:$0xff] }
 0x165   : > { %8979 = vmatprep.mubr.msk.f32.mxu0 %vm257_vm0, %v10708_v36 }
 0x168   : > { %8980 = vmatmul.mubr.msk.f32.gmra.mrb[6].mxu0 %vm257_vm0, %v10744_v43 }
 0x169   : > { %8982 = vmatprep.mubr.msk.f32.mxu0 %vm257_vm0, %v10746_v44 }
 0x16c   : > { %8983 = vmatmul.mubr.msk.f32.gmra.mrb[8].mxu0 %vm257_vm0, %v10752_v45 }
 0x16d   : > { %8985 = vmatprep.mubr.msk.f32.mxu0 %vm257_vm0, %v10754_v46 }
 0x170   : > { %8986 = vmatmul.mubr.msk.f32.gmra.mrb[10].mxu0 %vm257_vm0, %v10760_v47 }
 0x171   : > { %8988 = vmatprep.mubr.msk.f32.mxu0 %vm257_vm0, %v10762_v48 }
 0x174   : > { %8989 = vmatmul.mubr.msk.f32.gmra.mrb[12].mxu0 %vm257_vm0, %v10768_v49 }
 0x175   : > { %8991 = vmatprep.mubr.msk.f32.mxu0 %vm257_vm0, %v10770_v50 }
 0x178   : > { %8992 = vmatmul.mubr.msk.f32.gmra.mrb[14].mxu0 %vm257_vm0, %v10776_v51 }
 0x179   : > { %8994 = vmatprep.mubr.msk.f32.mxu0 %vm257_vm0, %v10778_v52 }
 0x17c   : > { %8995 = vmatmul.mubr.msk.f32.gmra.mrb[16].mxu0 %vm257_vm0, %v10784_v53 }
 0x17d   : > { %8997 = vmatprep.mubr.msk.f32.mxu0 %vm257_vm0, %v10786_v54 }
 0x180   : > { %8998 = vmatmul.mubr.msk.f32.gmra.mrb[18].mxu0 %vm257_vm0, %v10792_v55 }
 0x181   : > { %9000 = vmatprep.mubr.msk.f32.mxu0 %vm257_vm0, %v10794_v56 }
 0x184   : > { %9001 = vmatmul.mubr.msk.f32.gmra.mrb[20].mxu0 %vm257_vm0, %v10800_v57 }
 0x185   : > { %9003 = vmatprep.mubr.msk.f32.mxu0 %vm257_vm0, %v10802_v58 }
 0x188   : > { %9004 = vmatmul.mubr.msk.f32.gmra.mrb[22].mxu0 %vm257_vm0, %v10808_v59 }
 0x189   : > { %9006 = vmatprep.mubr.msk.f32.mxu0 %vm257_vm0, %v10810_v60 }
 0x18c   : > { %9007 = vmatmul.mubr.msk.f32.gmra.mrb[24].mxu0 %vm257_vm0, %v10816_v61 }
 0x18d   : > { %9009 = vmatprep.mubr.msk.f32.mxu0 %vm257_vm0, %v10818_v62  ;;  %v12726_v62 = vld [vmem:[#allocation47_spill] sm:$0xff] }
 0x190   : > { %9010 = vmatmul.mubr.msk.f32.gmra.mrb[26].mxu0 %vm257_vm0, %v12714_v28  ;;  %v12723_v28 = vld [vmem:[#allocation44_spill] sm:$0xff] }
 0x191   : > { %9012 = vmatprep.mubr.msk.f32.mxu0 %vm257_vm0, %v12715_v29  ;;  %v12720_v29 = vld [vmem:[#allocation41_spill] sm:$0xff] }
 0x194   : > { %9013 = vmatmul.mubr.msk.f32.gmra.mrb[28].mxu0 %vm257_vm0, %v12717_v33  ;;  %v12721_v33 = vld [vmem:[#allocation42_spill] sm:$0xff] }
 0x195   : > { %9015 = vmatprep.mubr.msk.f32.mxu0 %vm257_vm0, %v11237_v30  ;;  %v12722_v30 = vld [vmem:[#allocation43_spill] sm:$0xff] }
 0x198   : > { %9016 = vmatmul.mubr.msk.f32.gmra.mrb[30].mxu0 %vm257_vm0, %v11243_v34  ;;  %v12724_v34 = vld [vmem:[#allocation45_spill] sm:$0xff] }
 0x199   : > { %9020 = vmatprep.mubr.msk.f32.mxu0 %vm257_vm0, %v12719_v35  ;;  %v12725_v35 = vld [vmem:[#allocation46_spill] sm:$0xff] }
 0x19c   : > { %9021 = vmatmul.mubr.msk.f32.vlgmr.msra.gmra.mrb[0].mxu0 %vm257_vm0, %v12720_v29  ;;  %v12728_v29 = vld [vmem:[#allocation49_spill] sm:$0xff] }
 0x19d   : > { %9069 = vmatpush3.msra.mxu0 %v7773_v11  ;;  %9023 = vmatprep.mubr.msk.f32.mxu0 %vm257_vm0, %v12721_v33  ;;  %v12727_v11 = vld [vmem:[#allocation48_spill] sm:$0xff]  ;;  %v12729_v33 = vld [vmem:[#allocation50_spill] sm:$0xff] }
 0x19e   : > { %9118 = vmatprep.subr.mxu0 %v7806_v63 }
 0x1a0   : > { %9024 = vmatmul.mubr.msk.f32.gmra.mrb[2].mxu0 %vm257_vm0, %v12722_v30  ;;  %v12730_v30 = vld [vmem:[#allocation51_spill] sm:$0xff] }
 0x1a1   : > { %9026 = vmatprep.mubr.msk.f32.mxu0 %vm257_vm0, %v12723_v28  ;;  %v12731_v28 = vld [vmem:[#allocation52_spill] sm:$0xff] }
 0x1a4   : > { %9027 = vmatmul.mubr.msk.f32.gmra.mrb[4].mxu0 %vm257_vm0, %v12724_v34  ;;  %v12732_v34 = vld [vmem:[#allocation53_spill] sm:$0xff] }
 0x1a5   : > { %9029 = vmatprep.mubr.msk.f32.mxu0 %vm257_vm0, %v12725_v35  ;;  %v12733_v35 = vld [vmem:[#allocation54_spill] sm:$0xff] }
 0x1a8   : > { %9030 = vmatmul.mubr.msk.f32.gmra.mrb[6].mxu0 %vm257_vm0, %v12726_v62  ;;  %v12734_v62 = vld [vmem:[#allocation55_spill] sm:$0xff] }
 0x1a9   : > { %9032 = vmatprep.mubr.msk.f32.mxu0 %vm257_vm0, %v12727_v11  ;;  %v12735_v11 = vld [vmem:[#allocation56_spill] sm:$0xff] }
 0x1ac   : > { %9033 = vmatmul.mubr.msk.f32.gmra.mrb[8].mxu0 %vm257_vm0, %v12728_v29  ;;  %v12736_v29 = vld [vmem:[#allocation57_spill] sm:$0xff] }
 0x1ad   : > { %9035 = vmatprep.mubr.msk.f32.mxu0 %vm257_vm0, %v12729_v33  ;;  %v12737_v33 = vld [vmem:[#allocation58_spill] sm:$0xff] }
 0x1b0   : > { %9036 = vmatmul.mubr.msk.f32.gmra.mrb[10].mxu0 %vm257_vm0, %v12730_v30  ;;  %v12738_v30 = vld [vmem:[#allocation59_spill] sm:$0xff] }
 0x1b1   : > { %9038 = vmatprep.mubr.msk.f32.mxu0 %vm257_vm0, %v12731_v28  ;;  %v12739_v28 = vld [vmem:[#allocation60_spill] sm:$0xff] }
 0x1b4   : > { %9039 = vmatmul.mubr.msk.f32.gmra.mrb[12].mxu0 %vm257_vm0, %v12732_v34  ;;  %v12740_v34 = vld [vmem:[#allocation61_spill] sm:$0xff] }
 0x1b5   : > { %9041 = vmatprep.mubr.msk.f32.mxu0 %vm257_vm0, %v12733_v35  ;;  %v12741_v35 = vld [vmem:[#allocation62_spill] sm:$0xff] }
 0x1b8   : > { %9042 = vmatmul.mubr.msk.f32.gmra.mrb[14].mxu0 %vm257_vm0, %v12734_v62 }
 0x1b9   : > { %9044 = vmatprep.mubr.msk.f32.mxu0 %vm257_vm0, %v12735_v11  ;;  %v12742_v11 = vld [vmem:[#allocation63_spill] sm:$0xff] }
 0x1bc   : > { %9045 = vmatmul.mubr.msk.f32.gmra.mrb[16].mxu0 %vm257_vm0, %v12736_v29 }
 0x1bd   : > { %9047 = vmatprep.mubr.msk.f32.mxu0 %vm257_vm0, %v12737_v33  ;;  %v12743_v33 = vld [vmem:[#allocation64_spill] sm:$0xff] }
 0x1c0   : > { %9048 = vmatmul.mubr.msk.f32.gmra.mrb[18].mxu0 %vm257_vm0, %v12738_v30 }
 0x1c1   : > { %9050 = vmatprep.mubr.msk.f32.mxu0 %vm257_vm0, %v12739_v28 }
 0x1c4   : > { %9051 = vmatmul.mubr.msk.f32.gmra.mrb[20].mxu0 %vm257_vm0, %v12740_v34  ;;  %v11308_v34 = vld [vmem:[#allocation2 + $0x209] sm:$0xff] }
 0x1c5   : > { %9053 = vmatprep.mubr.msk.f32.mxu0 %vm257_vm0, %v12741_v35 }
 0x1c8   : > { %9054 = vmatmul.mubr.msk.f32.gmra.mrb[22].mxu0 %vm257_vm0, %v11076_v4 }
 0x1c9   : > { %9056 = vmatprep.mubr.msk.f32.mxu0 %vm257_vm0, %v12742_v11  ;;  %v11314_v11 = vld [vmem:[#allocation2 + $0x211] sm:$0xff] }
 0x1cc   : > { %9057 = vmatmul.mubr.msk.f32.gmra.mrb[24].mxu0 %vm257_vm0, %v11084_v0 }
 0x1cd   : > { %9059 = vmatprep.mubr.msk.f32.mxu0 %vm257_vm0, %v12743_v33 }
 0x1d0   : > { %9060 = vmatmul.mubr.msk.f32.gmra.mrb[26].mxu0 %vm257_vm0, %v11092_v3 }
 0x1d1   : > { %9062 = vmatprep.mubr.msk.f32.mxu0 %vm257_vm0, %v11094_v8  ;;  %v7839_v8 = vld [vmem:[%s12501_s1 + $0x40] sm:$0xff] }
 0x1d4   : > { %9063 = vmatmul.mubr.msk.f32.gmra.mrb[28].mxu0 %vm257_vm0, %v11100_v41 }
 0x1d5   : > { %9065 = vmatprep.mubr.msk.f32.mxu0 %vm257_vm0, %v11308_v34 }
 0x1d8   : > { %9066 = vmatmul.mubr.msk.f32.gmra.mrb[30].mxu0 %vm257_vm0, %v11314_v11 }
 0x1d9   : > { %9070 = vmatprep.mubr.msk.f32.mxu0 %vm257_vm0, %v10850_v39  ;;  %v12760_v39 = vld [vmem:[#allocation52_spill] sm:$0xff] }
 0x1dc   : > { %9071 = vmatmul.mubr.msk.f32.vlgmr.msra.gmra.mrb[0].mxu0 %vm257_vm0, %v10857_v2 }
 0x1dd   : > { %9119 = vmatpush3.msra.mxu0 %v7806_v63  ;;  %9073 = vmatprep.mubr.msk.f32.mxu0 %vm257_vm0, %v10859_v10 }
 0x1de   : > { %9168 = vmatprep.subr.mxu0 %v7839_v8 }
 0x1e0   : > { %9074 = vmatmul.mubr.msk.f32.gmra.mrb[2].mxu0 %vm257_vm0, %v10865_v9 }
 0x1e1   : > { %9076 = vmatprep.mubr.msk.f32.mxu0 %vm257_vm0, %v10867_v40  ;;  %v12761_v40 = vld [vmem:[#allocation53_spill] sm:$0xff] }
 0x1e4   : > { %9077 = vmatmul.mubr.msk.f32.gmra.mrb[4].mxu0 %vm257_vm0, %v10873_v37  ;;  %v12758_v37 = vld [vmem:[#allocation50_spill] sm:$0xff] }
 0x1e5   : > { %9079 = vmatprep.mubr.msk.f32.mxu0 %vm257_vm0, %v10875_v38  ;;  %v12759_v38 = vld [vmem:[#allocation51_spill] sm:$0xff] }
 0x1e8   : > { %9080 = vmatmul.mubr.msk.f32.gmra.mrb[6].mxu0 %vm257_vm0, %v10881_v31  ;;  %v12755_v31 = vld [vmem:[#allocation47_spill] sm:$0xff] }
 0x1e9   : > { %9082 = vmatprep.mubr.msk.f32.mxu0 %vm257_vm0, %v10883_v32  ;;  %v12756_v32 = vld [vmem:[#allocation48_spill] sm:$0xff] }
 0x1ec   : > { %9083 = vmatmul.mubr.msk.f32.gmra.mrb[8].mxu0 %vm257_vm0, %v10889_v26  ;;  %v12753_v26 = vld [vmem:[#allocation45_spill] sm:$0xff] }
 0x1ed   : > { %9085 = vmatprep.mubr.msk.f32.mxu0 %vm257_vm0, %v10891_v27  ;;  %v12754_v27 = vld [vmem:[#allocation46_spill] sm:$0xff] }
 0x1f0   : > { %9086 = vmatmul.mubr.msk.f32.gmra.mrb[10].mxu0 %vm257_vm0, %v10897_v24  ;;  %v12751_v24 = vld [vmem:[#allocation43_spill] sm:$0xff] }
 0x1f1   : > { %9088 = vmatprep.mubr.msk.f32.mxu0 %vm257_vm0, %v10899_v25  ;;  %v12752_v25 = vld [vmem:[#allocation44_spill] sm:$0xff] }
 0x1f4   : > { %9089 = vmatmul.mubr.msk.f32.gmra.mrb[12].mxu0 %vm257_vm0, %v10905_v22  ;;  %v3039_v22 = vld [vmem:[#allocation2 + $0x230] sm:$0xff] }
 0x1f5   : > { %9091 = vmatprep.mubr.msk.f32.mxu0 %vm257_vm0, %v10907_v23  ;;  %v12750_v23 = vld [vmem:[#allocation42_spill] sm:$0xff] }
 0x1f8   : > { %9092 = vmatmul.mubr.msk.f32.gmra.mrb[14].mxu0 %vm257_vm0, %v10913_v20  ;;  %v3038_v20 = vld [vmem:[#allocation2 + $0x228] sm:$0xff] }
 0x1f9   : > { %9094 = vmatprep.mubr.msk.f32.mxu0 %vm257_vm0, %v10915_v21  ;;  %v12749_v21 = vld [vmem:[#allocation67_spill] sm:$0xff] }
 0x1fc   : > { %9095 = vmatmul.mubr.msk.f32.gmra.mrb[16].mxu0 %vm257_vm0, %v10921_v18  ;;  %v12747_v18 = vld [vmem:[#allocation37_spill] sm:$0xff] }
 0x1fd   : > { %9097 = vmatprep.mubr.msk.f32.mxu0 %vm257_vm0, %v10923_v19  ;;  %v12748_v19 = vld [vmem:[#allocation66_spill] sm:$0xff] }
 0x200   : > { %9098 = vmatmul.mubr.msk.f32.gmra.mrb[18].mxu0 %vm257_vm0, %v10929_v16  ;;  %v12745_v16 = vld [vmem:[#allocation35_spill] sm:$0xff] }
 0x201   : > { %9100 = vmatprep.mubr.msk.f32.mxu0 %vm257_vm0, %v10931_v17  ;;  %v12746_v17 = vld [vmem:[#allocation36_spill] sm:$0xff] }
 0x204   : > { %9101 = vmatmul.mubr.msk.f32.gmra.mrb[20].mxu0 %vm257_vm0, %v10937_v14  ;;  %v2651_v14 = vld [vmem:[#allocation2 + $0x227] sm:$0xff] }
 0x205   : > { %9103 = vmatprep.mubr.msk.f32.mxu0 %vm257_vm0, %v10939_v15  ;;  %v12744_v15 = vld [vmem:[#allocation34_spill] sm:$0xff] }
 0x208   : > { %9104 = vmatmul.mubr.msk.f32.gmra.mrb[22].mxu0 %vm257_vm0, %v10945_v12  ;;  %v2652_v12 = vld [vmem:[#allocation2 + $0x22f] sm:$0xff] }
 0x209   : > { %9106 = vmatprep.mubr.msk.f32.mxu0 %vm257_vm0, %v10947_v13  ;;  %v3008_v13 = vld [vmem:[#allocation2 + $0x48] sm:$0xff] }
 0x20c   : > { %9107 = vmatmul.mubr.msk.f32.gmra.mrb[24].mxu0 %vm257_vm0, %v10963_v5  ;;  %v3009_v5 = vld [vmem:[#allocation2 + $0x50] sm:$0xff] }
 0x20d   : > { %9109 = vmatprep.mubr.msk.f32.mxu0 %vm257_vm0, %v10965_v6  ;;  %v3010_v6 = vld [vmem:[#allocation2 + $0x68] sm:$0xff] }
 0x210   : > { %9110 = vmatmul.mubr.msk.f32.gmra.mrb[26].mxu0 %vm257_vm0, %v10971_v7  ;;  %v3011_v7 = vld [vmem:[#allocation2 + $0x70] sm:$0xff] }
 0x211   : > { %9112 = vmatprep.mubr.msk.f32.mxu0 %vm257_vm0, %v11166_v42 }
 0x214   : > { %9113 = vmatmul.mubr.msk.f32.gmra.mrb[28].mxu0 %vm257_vm0, %v11172_v1 }
 0x215   : > { %9115 = vmatprep.mubr.msk.f32.mxu0 %vm257_vm0, %v2651_v14 }
 0x218   : > { %9116 = vmatmul.mubr.msk.f32.gmra.mrb[30].mxu0 %vm257_vm0, %v2652_v12 }
 0x219   : > { %9120 = vmatprep.mubr.msk.f32.mxu0 %vm257_vm0, %v3008_v13 }
 0x21c   : > { %9121 = vmatmul.mubr.msk.f32.vlgmr.msra.gmra.mrb[0].mxu0 %vm257_vm0, %v3009_v5 }
 0x21d   : > { %9169 = vmatpush3.msra.mxu0 %v7839_v8  ;;  %9123 = vmatprep.mubr.msk.f32.mxu0 %vm257_vm0, %v3010_v6 }
 0x220   : > { %9124 = vmatmul.mubr.msk.f32.gmra.mrb[2].mxu0 %vm257_vm0, %v3011_v7 }
 0x221   : > { %9126 = vmatprep.mubr.msk.f32.mxu0 %vm257_vm0, %v10708_v36  ;;  %v12757_v36 = vld [vmem:[#allocation49_spill] sm:$0xff] }
 0x224   : > { %9127 = vmatmul.mubr.msk.f32.gmra.mrb[4].mxu0 %vm257_vm0, %v10744_v43  ;;  %v12762_v43 = vld [vmem:[#allocation54_spill] sm:$0xff] }
 0x225   : > { %9129 = vmatprep.mubr.msk.f32.mxu0 %vm257_vm0, %v10746_v44  ;;  %v12763_v44 = vld [vmem:[#allocation56_spill] sm:$0xff] }
 0x228   : > { %9130 = vmatmul.mubr.msk.f32.gmra.mrb[6].mxu0 %vm257_vm0, %v10752_v45  ;;  %v12764_v45 = vld [vmem:[#allocation58_spill] sm:$0xff] }
 0x229   : > { %9132 = vmatprep.mubr.msk.f32.mxu0 %vm257_vm0, %v10754_v46  ;;  %v12765_v46 = vld [vmem:[#allocation61_spill] sm:$0xff] }
 0x22c   : > { %9133 = vmatmul.mubr.msk.f32.gmra.mrb[8].mxu0 %vm257_vm0, %v10760_v47  ;;  %v12766_v47 = vld [vmem:[#allocation63_spill] sm:$0xff] }
 0x22d   : > { %9135 = vmatprep.mubr.msk.f32.mxu0 %vm257_vm0, %v10762_v48  ;;  %v12767_v48 = vld [vmem:[#allocation65_spill] sm:$0xff] }
 0x230   : > { %9136 = vmatmul.mubr.msk.f32.gmra.mrb[10].mxu0 %vm257_vm0, %v10768_v49  ;;  %v3426_v49 = vld [vmem:[#allocation2 + $0x231] sm:$0xff] }
 0x231   : > { %9138 = vmatprep.mubr.msk.f32.mxu0 %vm257_vm0, %v10770_v50  ;;  %v7873_v50 = vld [vmem:[%s12503_s3 + $0x8] sm:$0xff] }
 0x232   : > { %9218 = vmatprep.subr.mxu1 %v7873_v50 }
 0x233   : > { %9219 = vmatpush3.msra.mxu1 %v7873_v50 }
 0x234   : > { %9139 = vmatmul.mubr.msk.f32.gmra.mrb[12].mxu0 %vm257_vm0, %v10776_v51  ;;  %v3991_v51 = vld [vmem:[#allocation3 + $0x8] sm:$0xff] }
 0x235   : > { %9141 = vmatprep.mubr.msk.f32.mxu0 %vm257_vm0, %v10778_v52  ;;  %9220 = vmatprep.mubr.msk.f32.mxu1 %vm257_vm0, %v3991_v51  ;;  %v3992_v52 = vld [vmem:[#allocation3 + $0x10] sm:$0xff] }
 0x236   : > { %9221 = vmatmul.mubr.msk.f32.vlgmr.msra.gmra.mrb[0].mxu1 %vm257_vm0, %v3992_v52 }
 0x238   : > { %9142 = vmatmul.mubr.msk.f32.gmra.mrb[14].mxu0 %vm257_vm0, %v10784_v53  ;;  %v3990_v53 = vld [vmem:[%s12503_s3] sm:$0xff] }
 0x239   : > { %9144 = vmatprep.mubr.msk.f32.mxu0 %vm257_vm0, %v10786_v54  ;;  %9268 = vmatprep.subr.mxu1 %v3990_v53  ;;  %v11514_v54 = vld [vmem:[%s12503_s3 + $0x10] sm:$0xff] }
 0x23a   : > { %9269 = vmatpush3.msra.mxu1 %v3990_v53 }
 0x23b   : > { %9318 = vmatprep.subr.mxu1 %v11514_v54 }
 0x23c   : > { %9145 = vmatmul.mubr.msk.f32.gmra.mrb[16].mxu0 %vm257_vm0, %v10792_v55  ;;  %v11520_v55 = vld [vmem:[%s12502_s2] ss:$0 sm:$0xff] }
 0x23d   : > { %9147 = vmatprep.mubr.msk.f32.mxu0 %vm257_vm0, %v10794_v56 }
 0x240   : > { %9148 = vmatmul.mubr.msk.f32.gmra.mrb[18].mxu0 %vm257_vm0, %v10800_v57 }
 0x241   : > { %9150 = vmatprep.mubr.msk.f32.mxu0 %vm257_vm0, %v10802_v58 }
 0x244   : > { %9151 = vmatmul.mubr.msk.f32.gmra.mrb[20].mxu0 %vm257_vm0, %v10808_v59 }
 0x245   : > { %9153 = vmatprep.mubr.msk.f32.mxu0 %vm257_vm0, %v10810_v60 }
 0x248   : > { %9154 = vmatmul.mubr.msk.f32.gmra.mrb[22].mxu0 %vm257_vm0, %v10816_v61 }
 0x249   : > { %9156 = vmatprep.mubr.msk.f32.mxu0 %vm257_vm0, %v12744_v15 }
 0x24c   : > { %9157 = vmatmul.mubr.msk.f32.gmra.mrb[24].mxu0 %vm257_vm0, %v12745_v16 }
 0x24d   : > { %9159 = vmatprep.mubr.msk.f32.mxu0 %vm257_vm0, %v12746_v17 }
 0x250   : > { %9160 = vmatmul.mubr.msk.f32.gmra.mrb[26].mxu0 %vm257_vm0, %v12747_v18 }
 0x251   : > { %9162 = vmatprep.mubr.msk.f32.mxu0 %vm257_vm0, %v12748_v19 }
 0x254   : > { %9163 = vmatmul.mubr.msk.f32.gmra.mrb[28].mxu0 %vm257_vm0, %v12749_v21 }
 0x255   : > { %9165 = vmatprep.mubr.msk.f32.mxu0 %vm257_vm0, %v3038_v20 }
 0x258   : > { %9166 = vmatmul.mubr.msk.f32.gmra.mrb[30].mxu0 %vm257_vm0, %v3039_v22 }
 0x259   : > { %9170 = vmatprep.mubr.msk.f32.mxu0 %vm257_vm0, %v12750_v23 }
 0x25c   : > { %9171 = vmatmul.mubr.msk.f32.vlgmr.msra.gmra.mrb[0].mxu0 %vm257_vm0, %v12751_v24 }
 0x25d   : > { %9173 = vmatprep.mubr.msk.f32.mxu0 %vm257_vm0, %v12752_v25 }
 0x260   : > { %9174 = vmatmul.mubr.msk.f32.gmra.mrb[2].mxu0 %vm257_vm0, %v12753_v26 }
 0x261   : > { %9176 = vmatprep.mubr.msk.f32.mxu0 %vm257_vm0, %v12754_v27 }
 0x264   : > { %9177 = vmatmul.mubr.msk.f32.gmra.mrb[4].mxu0 %vm257_vm0, %v12755_v31 }
 0x265   : > { %9179 = vmatprep.mubr.msk.f32.mxu0 %vm257_vm0, %v12756_v32 }
 0x268   : > { %9180 = vmatmul.mubr.msk.f32.gmra.mrb[6].mxu0 %vm257_vm0, %v12757_v36 }
 0x269   : > { %9182 = vmatprep.mubr.msk.f32.mxu0 %vm257_vm0, %v12758_v37 }
 0x26c   : > { %9183 = vmatmul.mubr.msk.f32.gmra.mrb[8].mxu0 %vm257_vm0, %v12759_v38 }
 0x26d   : > { %9185 = vmatprep.mubr.msk.f32.mxu0 %vm257_vm0, %v12760_v39 }
 0x270   : > { %9186 = vmatmul.mubr.msk.f32.gmra.mrb[10].mxu0 %vm257_vm0, %v12761_v40 }
 0x271   : > { %9188 = vmatprep.mubr.msk.f32.mxu0 %vm257_vm0, %v12762_v43 }
 0x274   : > { %9189 = vmatmul.mubr.msk.f32.gmra.mrb[12].mxu0 %vm257_vm0, %v12734_v62 }
 0x275   : > { %9191 = vmatprep.mubr.msk.f32.mxu0 %vm257_vm0, %v12763_v44 }
 0x278   : > { %9192 = vmatmul.mubr.msk.f32.gmra.mrb[14].mxu0 %vm257_vm0, %v12736_v29 }
 0x279   : > { %9194 = vmatprep.mubr.msk.f32.mxu0 %vm257_vm0, %v12764_v45 }
 0x27c   : > { %9195 = vmatmul.mubr.msk.f32.gmra.mrb[16].mxu0 %vm257_vm0, %v12738_v30 }
 0x27d   : > { %9197 = vmatprep.mubr.msk.f32.mxu0 %vm257_vm0, %v12739_v28 }
 0x280   : > { %9198 = vmatmul.mubr.msk.f32.gmra.mrb[18].mxu0 %vm257_vm0, %v12765_v46 }
 0x281   : > { %9200 = vmatprep.mubr.msk.f32.mxu0 %vm257_vm0, %v12741_v35 }
 0x284   : > { %9201 = vmatmul.mubr.msk.f32.gmra.mrb[20].mxu0 %vm257_vm0, %v11076_v4  ;;  %v3425_v4 = vld [vmem:[#allocation2 + $0x229] sm:$0xff] }
 0x285   : > { %9203 = vmatprep.mubr.msk.f32.mxu0 %vm257_vm0, %v12766_v47 }
 0x288   : > { %9204 = vmatmul.mubr.msk.f32.gmra.mrb[22].mxu0 %vm257_vm0, %v11084_v0 }
 0x289   : > { %9206 = vmatprep.mubr.msk.f32.mxu0 %vm257_vm0, %v12743_v33 }
 0x28c   : > { %9207 = vmatmul.mubr.msk.f32.gmra.mrb[24].mxu0 %vm257_vm0, %v11092_v3 }
 0x28d   : > { %9209 = vmatprep.mubr.msk.f32.mxu0 %vm257_vm0, %v12767_v48 }
 0x290   : > { %9210 = vmatmul.mubr.msk.f32.gmra.mrb[26].mxu0 %vm257_vm0, %v11100_v41 }
 0x291   : > { %9212 = vmatprep.mubr.msk.f32.mxu0 %vm257_vm0, %v11308_v34 }
 0x294   : > { %9213 = vmatmul.mubr.msk.f32.gmra.mrb[28].mxu0 %vm257_vm0, %v11314_v11 }
 0x295   : > { %9215 = vmatprep.mubr.msk.f32.mxu0 %vm257_vm0, %v3425_v4 }
 0x298   : > { %9216 = vmatmul.mubr.msk.f32.gmra.mrb[30].mxu0 %vm257_vm0, %v3426_v49 }
 0x32f   : > { %v9172_v56 = vpop.f32.mrb[0].mxu0 }
 0x330   : > { %v3790_v57 = vadd.f32 %v9172_v56, %v11520_v55  ;;  %v3591_v58 = vpop.f32.mrb[1].mxu0 }
 0x331   : > { %v3789_v59 = vadd.f32 %v11520_v55, %v3591_v58 }
 0x332   : > { %v3822_v60 = vmax.f32 %v3790_v57, 0.0 }
 0x333   : > { %v3821_v61 = vmax.f32 %v3789_v59, 0.0  ;;  %v9175_v62 = vpop.f32.mrb[2].mxu0 }
 0x334   : > { %3927 = vst.msk [vmem:[#allocation3 + $0x30] sm:$0xff] %vm257_vm0, %v3822_v60  ;;  %v3792_v0 = vadd.f32 %v9175_v62, %v11520_v55  ;;  %v3601_v2 = vpop.f32.mrb[3].mxu0 }
 0x335   : > { %3926 = vst.msk [vmem:[#allocation3 + $0x28] sm:$0xff] %vm257_vm0, %v3821_v61  ;;  %v3791_v10 = vadd.f32 %v11520_v55, %v3601_v2 }
 0x336   : > { %v3824_v9 = vmax.f32 %v3792_v0, 0.0 }
 0x337   : > { %v3823_v3 = vmax.f32 %v3791_v10, 0.0  ;;  %v9178_v8 = vpop.f32.mrb[4].mxu0 }
 0x338   : > { %3929 = vst.msk [vmem:[#allocation3 + $0x50] sm:$0xff] %vm257_vm0, %v3824_v9  ;;  %v3794_v41 = vadd.f32 %v9178_v8, %v11520_v55  ;;  %v3611_v42 = vpop.f32.mrb[5].mxu0 }
 0x339   : > { %3928 = vst.msk [vmem:[#allocation3 + $0x48] sm:$0xff] %vm257_vm0, %v3823_v3  ;;  %v3793_v1 = vadd.f32 %v11520_v55, %v3611_v42 }
 0x33a   : > { %v3826_v28 = vmax.f32 %v3794_v41, 0.0 }
 0x33b   : > { %v3825_v30 = vmax.f32 %v3793_v1, 0.0  ;;  %v9181_v33 = vpop.f32.mrb[6].mxu0  ;;  %v11540_v29 = vld [vmem:[#allocation3 + $0x30] sm:$0xff] }
 0x33c   : > { %3931 = vst.msk [vmem:[#allocation3 + $0x70] sm:$0xff] %vm257_vm0, %v3826_v28  ;;  %v3796_v34 = vadd.f32 %v9181_v33, %v11520_v55  ;;  %v3621_v63 = vpop.f32.mrb[7].mxu0  ;;  %v11534_v35 = vld [vmem:[#allocation3 + $0x28] sm:$0xff] }
 0x33d   : > { %3930 = vst.msk [vmem:[#allocation3 + $0x68] sm:$0xff] %vm257_vm0, %v3825_v30  ;;  %v3795_v11 = vadd.f32 %v11520_v55, %v3621_v63  ;;  %9223 = vmatprep.mubr.msk.f32.mxu1 %vm257_vm0, %v11534_v35 }
 0x33e   : > { %v3828_v14 = vmax.f32 %v3796_v34, 0.0  ;;  %9224 = vmatmul.mubr.msk.f32.gmra.mrb[2].mxu1 %vm257_vm0, %v11540_v29 }
 0x33f   : > { %v3827_v12 = vmax.f32 %v3795_v11, 0.0  ;;  %v9184_v13 = vpop.f32.mrb[8].mxu0  ;;  %v11552_v16 = vld [vmem:[#allocation3 + $0x50] sm:$0xff] }
 0x340   : > { %3933 = vst.msk [vmem:[#allocation3 + $0x90] sm:$0xff] %vm257_vm0, %v3828_v14  ;;  %v3798_v5 = vadd.f32 %v9184_v13, %v11520_v55  ;;  %v3631_v6 = vpop.f32.mrb[9].mxu0  ;;  %v11546_v7 = vld [vmem:[#allocation3 + $0x48] sm:$0xff] }
 0x341   : > { %3932 = vst.msk [vmem:[#allocation3 + $0x88] sm:$0xff] %vm257_vm0, %v3827_v12  ;;  %v3797_v15 = vadd.f32 %v11520_v55, %v3631_v6  ;;  %9226 = vmatprep.mubr.msk.f32.mxu1 %vm257_vm0, %v11546_v7 }
 0x342   : > { %v3830_v17 = vmax.f32 %v3798_v5, 0.0  ;;  %9227 = vmatmul.mubr.msk.f32.gmra.mrb[4].mxu1 %vm257_vm0, %v11552_v16 }
 0x343   : > { %v3829_v18 = vmax.f32 %v3797_v15, 0.0  ;;  %v9187_v19 = vpop.f32.mrb[10].mxu0  ;;  %v11564_v24 = vld [vmem:[#allocation3 + $0x70] sm:$0xff] }
 0x344   : > { %3935 = vst.msk [vmem:[#allocation3 + $0xb0] sm:$0xff] %vm257_vm0, %v3830_v17  ;;  %v3800_v20 = vadd.f32 %v9187_v19, %v11520_v55  ;;  %v3641_v21 = vpop.f32.mrb[11].mxu0  ;;  %v11558_v22 = vld [vmem:[#allocation3 + $0x68] sm:$0xff] }
 0x345   : > { %3934 = vst.msk [vmem:[#allocation3 + $0xa8] sm:$0xff] %vm257_vm0, %v3829_v18  ;;  %v3799_v23 = vadd.f32 %v11520_v55, %v3641_v21  ;;  %9229 = vmatprep.mubr.msk.f32.mxu1 %vm257_vm0, %v11558_v22 }
 0x346   : > { %v3832_v25 = vmax.f32 %v3800_v20, 0.0  ;;  %9230 = vmatmul.mubr.msk.f32.gmra.mrb[6].mxu1 %vm257_vm0, %v11564_v24 }
 0x347   : > { %v3831_v26 = vmax.f32 %v3799_v23, 0.0  ;;  %v9190_v27 = vpop.f32.mrb[12].mxu0  ;;  %v11576_v38 = vld [vmem:[#allocation3 + $0x90] sm:$0xff] }
 0x348   : > { %3937 = vst.msk [vmem:[#allocation3 + $0xd0] sm:$0xff] %vm257_vm0, %v3832_v25  ;;  %v3802_v31 = vadd.f32 %v9190_v27, %v11520_v55  ;;  %v3651_v32 = vpop.f32.mrb[13].mxu0  ;;  %v11570_v36 = vld [vmem:[#allocation3 + $0x88] sm:$0xff] }
 0x349   : > { %3936 = vst.msk [vmem:[#allocation3 + $0xc8] sm:$0xff] %vm257_vm0, %v3831_v26  ;;  %v3801_v37 = vadd.f32 %v11520_v55, %v3651_v32  ;;  %9232 = vmatprep.mubr.msk.f32.mxu1 %vm257_vm0, %v11570_v36 }
 0x34a   : > { %v3834_v39 = vmax.f32 %v3802_v31, 0.0  ;;  %9233 = vmatmul.mubr.msk.f32.gmra.mrb[8].mxu1 %vm257_vm0, %v11576_v38 }
 0x34b   : > { %v3833_v40 = vmax.f32 %v3801_v37, 0.0  ;;  %v9193_v43 = vpop.f32.mrb[14].mxu0  ;;  %v11588_v48 = vld [vmem:[#allocation3 + $0xb0] sm:$0xff] }
 0x34c   : > { %3939 = vst.msk [vmem:[#allocation3 + $0xf0] sm:$0xff] %vm257_vm0, %v3834_v39  ;;  %v3804_v44 = vadd.f32 %v9193_v43, %v11520_v55  ;;  %v3661_v45 = vpop.f32.mrb[15].mxu0  ;;  %v11582_v46 = vld [vmem:[#allocation3 + $0xa8] sm:$0xff] }
 0x34d   : > { %3938 = vst.msk [vmem:[#allocation3 + $0xe8] sm:$0xff] %vm257_vm0, %v3833_v40  ;;  %v3803_v47 = vadd.f32 %v11520_v55, %v3661_v45  ;;  %9235 = vmatprep.mubr.msk.f32.mxu1 %vm257_vm0, %v11582_v46 }
 0x34e   : > { %v3836_v4 = vmax.f32 %v3804_v44, 0.0  ;;  %9236 = vmatmul.mubr.msk.f32.gmra.mrb[10].mxu1 %vm257_vm0, %v11588_v48 }
 0x34f   : > { %v3835_v49 = vmax.f32 %v3803_v47, 0.0  ;;  %v9196_v50 = vpop.f32.mrb[16].mxu0  ;;  %v11600_v57 = vld [vmem:[#allocation3 + $0xd0] sm:$0xff] }
 0x350   : > { %3941 = vst.msk [vmem:[#allocation3 + $0x110] sm:$0xff] %vm257_vm0, %v3836_v4  ;;  %v3806_v51 = vadd.f32 %v9196_v50, %v11520_v55  ;;  %v3671_v52 = vpop.f32.mrb[17].mxu0  ;;  %v11594_v53 = vld [vmem:[#allocation3 + $0xc8] sm:$0xff] }
 0x351   : > { %3940 = vst.msk [vmem:[#allocation3 + $0x108] sm:$0xff] %vm257_vm0, %v3835_v49  ;;  %v3805_v56 = vadd.f32 %v11520_v55, %v3671_v52  ;;  %9238 = vmatprep.mubr.msk.f32.mxu1 %vm257_vm0, %v11594_v53 }
 0x352   : > { %v3838_v58 = vmax.f32 %v3806_v51, 0.0  ;;  %9239 = vmatmul.mubr.msk.f32.gmra.mrb[12].mxu1 %vm257_vm0, %v11600_v57 }
 0x353   : > { %v3837_v59 = vmax.f32 %v3805_v56, 0.0  ;;  %v9199_v60 = vpop.f32.mrb[18].mxu0  ;;  %v11612_v10 = vld [vmem:[#allocation3 + $0xf0] sm:$0xff] }
 0x354   : > { %3943 = vst.msk [vmem:[#allocation3 + $0x130] sm:$0xff] %vm257_vm0, %v3838_v58  ;;  %v3808_v61 = vadd.f32 %v9199_v60, %v11520_v55  ;;  %v3681_v62 = vpop.f32.mrb[19].mxu0  ;;  %v11606_v0 = vld [vmem:[#allocation3 + $0xe8] sm:$0xff] }
 0x355   : > { %3942 = vst.msk [vmem:[#allocation3 + $0x128] sm:$0xff] %vm257_vm0, %v3837_v59  ;;  %v3807_v2 = vadd.f32 %v11520_v55, %v3681_v62  ;;  %9241 = vmatprep.mubr.msk.f32.mxu1 %vm257_vm0, %v11606_v0 }
 0x356   : > { %v3840_v9 = vmax.f32 %v3808_v61, 0.0  ;;  %9242 = vmatmul.mubr.msk.f32.gmra.mrb[14].mxu1 %vm257_vm0, %v11612_v10 }
 0x357   : > { %v3839_v3 = vmax.f32 %v3807_v2, 0.0  ;;  %v9202_v8 = vpop.f32.mrb[20].mxu0  ;;  %v11624_v30 = vld [vmem:[#allocation3 + $0x110] sm:$0xff] }
 0x358   : > { %3945 = vst.msk [vmem:[#allocation3 + $0x150] sm:$0xff] %vm257_vm0, %v3840_v9  ;;  %v3810_v41 = vadd.f32 %v9202_v8, %v11520_v55  ;;  %v3691_v42 = vpop.f32.mrb[21].mxu0  ;;  %v11618_v1 = vld [vmem:[#allocation3 + $0x108] sm:$0xff] }
 0x359   : > { %3944 = vst.msk [vmem:[#allocation3 + $0x148] sm:$0xff] %vm257_vm0, %v3839_v3  ;;  %v3809_v28 = vadd.f32 %v11520_v55, %v3691_v42  ;;  %9244 = vmatprep.mubr.msk.f32.mxu1 %vm257_vm0, %v11618_v1  ;;  %v3958_v42 = vld [vmem:[#allocation3 + $0x7] sm:$0xff] }
 0x35a   : > { %v3842_v33 = vmax.f32 %v3810_v41, 0.0  ;;  %9245 = vmatmul.mubr.msk.f32.gmra.mrb[16].mxu1 %vm257_vm0, %v11624_v30 }
 0x35b   : > { %v3841_v34 = vmax.f32 %v3809_v28, 0.0  ;;  %v9205_v63 = vpop.f32.mrb[22].mxu0  ;;  %v11636_v5 = vld [vmem:[#allocation3 + $0x130] sm:$0xff] }
 0x35c   : > { %3947 = vst.msk [vmem:[#allocation3 + $0x170] sm:$0xff] %vm257_vm0, %v3842_v33  ;;  %v3812_v11 = vadd.f32 %v9205_v63, %v11520_v55  ;;  %v3701_v14 = vpop.f32.mrb[23].mxu0  ;;  %v11630_v12 = vld [vmem:[#allocation3 + $0x128] sm:$0xff] }
 0x35d   : > { %3946 = vst.msk [vmem:[#allocation3 + $0x168] sm:$0xff] %vm257_vm0, %v3841_v34  ;;  %v3811_v13 = vadd.f32 %v11520_v55, %v3701_v14  ;;  %9247 = vmatprep.mubr.msk.f32.mxu1 %vm257_vm0, %v11630_v12  ;;  %v3959_v33 = vld [vmem:[#allocation3 + $0xf] sm:$0xff]  ;;  %v11710_v34 = vld [vmem:[%s12503_s3 + $0x18] sm:$0xff]  ;;  %v11713_v63 = vld [vmem:[#allocation3 + $0x27] sm:$0xff] }
 0x35e   : > { %v3844_v6 = vmax.f32 %v3812_v11, 0.0  ;;  %9248 = vmatmul.mubr.msk.f32.gmra.mrb[18].mxu1 %vm257_vm0, %v11636_v5  ;;  %v11719_v11 = vld [vmem:[#allocation3 + $0x2f] sm:$0xff]  ;;  %v11723_v14 = vld [vmem:[#allocation3 + $0x47] sm:$0xff] }
 0x35f   : > { %v3843_v15 = vmax.f32 %v3811_v13, 0.0  ;;  %v9208_v17 = vpop.f32.mrb[24].mxu0  ;;  %v11648_v23 = vld [vmem:[#allocation3 + $0x150] sm:$0xff] }
 0x360   : > { %3949 = vst.msk [vmem:[#allocation3 + $0x190] sm:$0xff] %vm257_vm0, %v3844_v6  ;;  %v3814_v18 = vadd.f32 %v9208_v17, %v11520_v55  ;;  %v3711_v19 = vpop.f32.mrb[25].mxu0  ;;  %v11642_v20 = vld [vmem:[#allocation3 + $0x148] sm:$0xff] }
 0x361   : > { %3948 = vst.msk [vmem:[#allocation3 + $0x188] sm:$0xff] %vm257_vm0, %v3843_v15  ;;  %v3813_v21 = vadd.f32 %v11520_v55, %v3711_v19  ;;  %9250 = vmatprep.mubr.msk.f32.mxu1 %vm257_vm0, %v11642_v20  ;;  %v11727_v13 = vld [vmem:[#allocation3 + $0x4f] sm:$0xff]  ;;  %v11739_v15 = vld [vmem:[#allocation3 + $0x87] sm:$0xff] }
 0x362   : > { %v3846_v25 = vmax.f32 %v3814_v18, 0.0  ;;  %9251 = vmatmul.mubr.msk.f32.gmra.mrb[20].mxu1 %vm257_vm0, %v11648_v23  ;;  %v11735_v6 = vld [vmem:[#allocation3 + $0x6f] sm:$0xff]  ;;  %v11747_v18 = vld [vmem:[#allocation3 + $0xa7] sm:$0xff] }
 0x363   : > { %v3845_v26 = vmax.f32 %v3813_v21, 0.0  ;;  %v9211_v27 = vpop.f32.mrb[26].mxu0  ;;  %v11660_v40 = vld [vmem:[#allocation3 + $0x170] sm:$0xff]  ;;  %v11755_v21 = vld [vmem:[#allocation3 + $0xc7] sm:$0xff] }
 0x364   : > { %3951 = vst.msk [vmem:[#allocation3 + $0x1b0] sm:$0xff] %vm257_vm0, %v3846_v25  ;;  %v3816_v31 = vadd.f32 %v9211_v27, %v11520_v55  ;;  %v3721_v32 = vpop.f32.mrb[27].mxu0  ;;  %v11654_v37 = vld [vmem:[#allocation3 + $0x168] sm:$0xff] }
 0x365   : > { %3950 = vst.msk [vmem:[#allocation3 + $0x1a8] sm:$0xff] %vm257_vm0, %v3845_v26  ;;  %v3815_v39 = vadd.f32 %v11520_v55, %v3721_v32  ;;  %9253 = vmatprep.mubr.msk.f32.mxu1 %vm257_vm0, %v11654_v37  ;;  %v11743_v17 = vld [vmem:[#allocation3 + $0x8f] sm:$0xff]  ;;  %v11763_v26 = vld [vmem:[#allocation3 + $0xe7] sm:$0xff] }
 0x366   : > { %v3848_v43 = vmax.f32 %v3816_v31, 0.0  ;;  %9254 = vmatmul.mubr.msk.f32.gmra.mrb[22].mxu1 %vm257_vm0, %v11660_v40  ;;  %v11751_v19 = vld [vmem:[#allocation3 + $0xaf] sm:$0xff]  ;;  %v11771_v31 = vld [vmem:[#allocation3 + $0x107] sm:$0xff] }
 0x367   : > { %v3847_v44 = vmax.f32 %v3815_v39, 0.0  ;;  %v9214_v45 = vpop.f32.mrb[28].mxu0  ;;  %v11672_v51 = vld [vmem:[#allocation3 + $0x190] sm:$0xff]  ;;  %v11779_v39 = vld [vmem:[#allocation3 + $0x127] sm:$0xff] }
 0x368   : > { %3953 = vst.msk [vmem:[#allocation3 + $0x1d0] sm:$0xff] %vm257_vm0, %v3848_v43  ;;  %v3818_v47 = vadd.f32 %v9214_v45, %v11520_v55  ;;  %v3731_v4 = vpop.f32.mrb[29].mxu0  ;;  %v11666_v49 = vld [vmem:[#allocation3 + $0x188] sm:$0xff] }
 0x369   : > { %3952 = vst.msk [vmem:[#allocation3 + $0x1c8] sm:$0xff] %vm257_vm0, %v3847_v44  ;;  %v3817_v50 = vadd.f32 %v11520_v55, %v3731_v4  ;;  %9256 = vmatprep.mubr.msk.f32.mxu1 %vm257_vm0, %v11666_v49  ;;  %v11759_v25 = vld [vmem:[#allocation3 + $0xcf] sm:$0xff]  ;;  %v11787_v44 = vld [vmem:[#allocation3 + $0x147] sm:$0xff] }
 0x36a   : > { %v3850_v52 = vmax.f32 %v3818_v47, 0.0  ;;  %9257 = vmatmul.mubr.msk.f32.gmra.mrb[24].mxu1 %vm257_vm0, %v11672_v51  ;;  %v11767_v27 = vld [vmem:[#allocation3 + $0xef] sm:$0xff]  ;;  %v11795_v47 = vld [vmem:[#allocation3 + $0x167] sm:$0xff] }
 0x36b   : > { %v3849_v56 = vmax.f32 %v3817_v50, 0.0  ;;  %v9217_v58 = vpop.f32.mrb[30].mxu0  ;;  %v11684_v2 = vld [vmem:[#allocation3 + $0x1b0] sm:$0xff]  ;;  %v11803_v50 = vld [vmem:[#allocation3 + $0x187] sm:$0xff] }
 0x36c   : > { %3955 = vst.msk [vmem:[#allocation3 + $0x1f0] sm:$0xff] %vm257_vm0, %v3850_v52  ;;  %v3820_v59 = vadd.f32 %v9217_v58, %v11520_v55  ;;  %v3741_v60 = vpop.f32.mrb[31].mxu0  ;;  %v11678_v61 = vld [vmem:[#allocation3 + $0x1a8] sm:$0xff] }
 0x36d   : > { %3954 = vst.msk [vmem:[#allocation3 + $0x1e8] sm:$0xff] %vm257_vm0, %v3849_v56  ;;  %v3819_v62 = vadd.f32 %v11520_v55, %v3741_v60  ;;  %9259 = vmatprep.mubr.msk.f32.mxu1 %vm257_vm0, %v11678_v61  ;;  %v11775_v32 = vld [vmem:[#allocation3 + $0x10f] sm:$0xff]  ;;  %v11811_v56 = vld [vmem:[#allocation3 + $0x1a7] sm:$0xff] }
 0x36e   : > { %v3852_v9 = vmax.f32 %v3820_v59, 0.0  ;;  %9260 = vmatmul.mubr.msk.f32.gmra.mrb[26].mxu1 %vm257_vm0, %v11684_v2  ;;  %v11783_v43 = vld [vmem:[#allocation3 + $0x12f] sm:$0xff] }
 0x36f   : > { %v3851_v3 = vmax.f32 %v3819_v62, 0.0  ;;  %v11694_v55 = vld [vmem:[#allocation3 + $0x1d0] sm:$0xff] }
 0x370   : > { %3957 = vst.msk [vmem:[#allocation3 + $0x210] sm:$0xff] %vm257_vm0, %v3852_v9  ;;  %v11689_v8 = vld [vmem:[#allocation3 + $0x1c8] sm:$0xff] }
 0x371   : > { %3956 = vst.msk [vmem:[#allocation3 + $0x208] sm:$0xff] %vm257_vm0, %v3851_v3  ;;  %9262 = vmatprep.mubr.msk.f32.mxu1 %vm257_vm0, %v11689_v8  ;;  %v11791_v45 = vld [vmem:[#allocation3 + $0x14f] sm:$0xff]  ;;  %v11819_v59 = vld [vmem:[#allocation3 + $0x1c7] sm:$0xff] }
 0x372   : > { %9263 = vmatmul.mubr.msk.f32.gmra.mrb[28].mxu1 %vm257_vm0, %v11694_v55  ;;  %v11799_v4 = vld [vmem:[#allocation3 + $0x16f] sm:$0xff] }
 0x373   : > { %v11702_v28 = vld [vmem:[#allocation3 + $0x1f0] sm:$0xff] }
 0x374   : > { %v11698_v41 = vld [vmem:[#allocation3 + $0x1e8] sm:$0xff]  ;;  %12769 = vst [vmem:[#allocation41_spill] sm:$0xff] %v11702_v28 }
 0x375   : > { %12768 = vst [vmem:[#allocation40_spill] sm:$0xff] %v11698_v41  ;;  %9265 = vmatprep.mubr.msk.f32.mxu1 %vm257_vm0, %v11698_v41  ;;  %v11807_v52 = vld [vmem:[#allocation3 + $0x18f] sm:$0xff]  ;;  %v11827_v62 = vld [vmem:[#allocation3 + $0x1e7] sm:$0xff] }
 0x376   : > { %9266 = vmatmul.mubr.msk.f32.gmra.mrb[30].mxu1 %vm257_vm0, %v11702_v28  ;;  %v11815_v58 = vld [vmem:[#allocation3 + $0x1af] sm:$0xff] }
 0x377   : > { %9270 = vmatprep.mubr.msk.f32.mxu1 %vm257_vm0, %v3958_v42  ;;  %v11823_v60 = vld [vmem:[#allocation3 + $0x1cf] sm:$0xff] }
 0x378   : > { %v4667_v9 = vld [vmem:[#allocation3 + $0x9] sm:$0xff]  ;;  %v4668_v42 = vld [vmem:[#allocation3 + $0x11] sm:$0xff] }
 0x379   : > { %v11831_v3 = vld [vmem:[#allocation3 + $0x1ef] sm:$0xff] }
 0x37a   : > { %9271 = vmatmul.mubr.msk.f32.vlgmr.msra.gmra.mrb[0].mxu1 %vm257_vm0, %v3959_v33  ;;  %v11839_v33 = vld [vmem:[%s12503_s3 + $0x20] sm:$0xff]  ;;  %v11842_v28 = vld [vmem:[#allocation3 + $0x29] sm:$0xff]  ;;  %v11848_v41 = vld [vmem:[#allocation3 + $0x31] sm:$0xff] }
 0x37b   : > { %9319 = vmatpush3.msra.mxu1 %v11514_v54  ;;  %9273 = vmatprep.mubr.msk.f32.mxu1 %vm257_vm0, %v11713_v63  ;;  %v11731_v54 = vld [vmem:[#allocation3 + $0x67] sm:$0xff]  ;;  %12770 = vst [vmem:[#allocation55_spill] sm:$0xff] %v11842_v28  ;;  %12771 = vst [vmem:[#allocation57_spill] sm:$0xff] %v11848_v41 }
 0x37c   : > { %9368 = vmatprep.subr.mxu1 %v11710_v34 }
 0x37e   : > { %9274 = vmatmul.mubr.msk.f32.gmra.mrb[2].mxu1 %vm257_vm0, %v11719_v11 }
 0x37f   : > { %9276 = vmatprep.mubr.msk.f32.mxu1 %vm257_vm0, %v11723_v14 }
 0x382   : > { %9277 = vmatmul.mubr.msk.f32.gmra.mrb[4].mxu1 %vm257_vm0, %v11727_v13 }
 0x383   : > { %9279 = vmatprep.mubr.msk.f32.mxu1 %vm257_vm0, %v11731_v54 }
 0x386   : > { %9280 = vmatmul.mubr.msk.f32.gmra.mrb[6].mxu1 %vm257_vm0, %v11735_v6 }
 0x387   : > { %9282 = vmatprep.mubr.msk.f32.mxu1 %vm257_vm0, %v11739_v15 }
 0x38a   : > { %9283 = vmatmul.mubr.msk.f32.gmra.mrb[8].mxu1 %vm257_vm0, %v11743_v17 }
 0x38b   : > { %9285 = vmatprep.mubr.msk.f32.mxu1 %vm257_vm0, %v11747_v18 }
 0x38e   : > { %9286 = vmatmul.mubr.msk.f32.gmra.mrb[10].mxu1 %vm257_vm0, %v11751_v19 }
 0x38f   : > { %9288 = vmatprep.mubr.msk.f32.mxu1 %vm257_vm0, %v11755_v21 }
 0x392   : > { %9289 = vmatmul.mubr.msk.f32.gmra.mrb[12].mxu1 %vm257_vm0, %v11759_v25 }
 0x393   : > { %9291 = vmatprep.mubr.msk.f32.mxu1 %vm257_vm0, %v11763_v26 }
 0x396   : > { %9292 = vmatmul.mubr.msk.f32.gmra.mrb[14].mxu1 %vm257_vm0, %v11767_v27 }
 0x397   : > { %9294 = vmatprep.mubr.msk.f32.mxu1 %vm257_vm0, %v11771_v31 }
 0x39a   : > { %9295 = vmatmul.mubr.msk.f32.gmra.mrb[16].mxu1 %vm257_vm0, %v11775_v32 }
 0x39b   : > { %9297 = vmatprep.mubr.msk.f32.mxu1 %vm257_vm0, %v11779_v39 }
 0x39e   : > { %9298 = vmatmul.mubr.msk.f32.gmra.mrb[18].mxu1 %vm257_vm0, %v11783_v43 }
 0x39f   : > { %9300 = vmatprep.mubr.msk.f32.mxu1 %vm257_vm0, %v11787_v44 }
 0x3a2   : > { %9301 = vmatmul.mubr.msk.f32.gmra.mrb[20].mxu1 %vm257_vm0, %v11791_v45 }
 0x3a3   : > { %9303 = vmatprep.mubr.msk.f32.mxu1 %vm257_vm0, %v11795_v47 }
 0x3a6   : > { %9304 = vmatmul.mubr.msk.f32.gmra.mrb[22].mxu1 %vm257_vm0, %v11799_v4 }
 0x3a7   : > { %9306 = vmatprep.mubr.msk.f32.mxu1 %vm257_vm0, %v11803_v50 }
 0x3aa   : > { %9307 = vmatmul.mubr.msk.f32.gmra.mrb[24].mxu1 %vm257_vm0, %v11807_v52 }
 0x3ab   : > { %9309 = vmatprep.mubr.msk.f32.mxu1 %vm257_vm0, %v11811_v56 }
 0x3ae   : > { %9310 = vmatmul.mubr.msk.f32.gmra.mrb[26].mxu1 %vm257_vm0, %v11815_v58 }
 0x3af   : > { %9312 = vmatprep.mubr.msk.f32.mxu1 %vm257_vm0, %v11819_v59 }
 0x3b2   : > { %9313 = vmatmul.mubr.msk.f32.gmra.mrb[28].mxu1 %vm257_vm0, %v11823_v60 }
 0x3b3   : > { %9315 = vmatprep.mubr.msk.f32.mxu1 %vm257_vm0, %v11827_v62 }
 0x3b6   : > { %9316 = vmatmul.mubr.msk.f32.gmra.mrb[30].mxu1 %vm257_vm0, %v11831_v3 }
 0x3b7   : > { %9320 = vmatprep.mubr.msk.f32.mxu1 %vm257_vm0, %v4667_v9  ;;  %v11852_v9 = vld [vmem:[#allocation3 + $0x49] sm:$0xff] }
 0x3b8   : > { %12772 = vst [vmem:[#allocation59_spill] sm:$0xff] %v11852_v9 }
 0x3ba   : > { %9321 = vmatmul.mubr.msk.f32.vlgmr.msra.gmra.mrb[0].mxu1 %vm257_vm0, %v4668_v42  ;;  %v11856_v42 = vld [vmem:[#allocation3 + $0x51] sm:$0xff] }
 0x3bb   : > { %9369 = vmatpush3.msra.mxu1 %v11710_v34  ;;  %9323 = vmatprep.mubr.msk.f32.mxu1 %vm257_vm0, %v11842_v28  ;;  %12773 = vst [vmem:[#allocation60_spill] sm:$0xff] %v11856_v42  ;;  %v11860_v34 = vld [vmem:[#allocation3 + $0x69] sm:$0xff]  ;;  %v11864_v28 = vld [vmem:[#allocation3 + $0x71] sm:$0xff] }
 0x3bc   : > { %9418 = vmatprep.subr.mxu1 %v11839_v33  ;;  %12774 = vst [vmem:[#allocation62_spill] sm:$0xff] %v11860_v34  ;;  %12775 = vst [vmem:[#allocation64_spill] sm:$0xff] %v11864_v28 }
 0x3be   : > { %9324 = vmatmul.mubr.msk.f32.gmra.mrb[2].mxu1 %vm257_vm0, %v11848_v41  ;;  %v11868_v41 = vld [vmem:[#allocation3 + $0x89] sm:$0xff] }
 0x3bf   : > { %9326 = vmatprep.mubr.msk.f32.mxu1 %vm257_vm0, %v11852_v9  ;;  %12776 = vst [vmem:[#allocation34_spill] sm:$0xff] %v11868_v41  ;;  %v11872_v9 = vld [vmem:[#allocation3 + $0x91] sm:$0xff] }
 0x3c0   : > { %12777 = vst [vmem:[#allocation35_spill] sm:$0xff] %v11872_v9 }
 0x3c2   : > { %9327 = vmatmul.mubr.msk.f32.gmra.mrb[4].mxu1 %vm257_vm0, %v11856_v42  ;;  %v11876_v42 = vld [vmem:[#allocation3 + $0xa9] sm:$0xff] }
 0x3c3   : > { %9329 = vmatprep.mubr.msk.f32.mxu1 %vm257_vm0, %v11860_v34  ;;  %12778 = vst [vmem:[#allocation36_spill] sm:$0xff] %v11876_v42  ;;  %v11880_v34 = vld [vmem:[#allocation3 + $0xb1] sm:$0xff] }
 0x3c4   : > { %12779 = vst [vmem:[#allocation37_spill] sm:$0xff] %v11880_v34 }
 0x3c6   : > { %9330 = vmatmul.mubr.msk.f32.gmra.mrb[6].mxu1 %vm257_vm0, %v11864_v28  ;;  %v11884_v28 = vld [vmem:[#allocation3 + $0xc9] sm:$0xff] }
 0x3c7   : > { %9332 = vmatprep.mubr.msk.f32.mxu1 %vm257_vm0, %v11868_v41  ;;  %12780 = vst [vmem:[#allocation66_spill] sm:$0xff] %v11884_v28  ;;  %v11888_v41 = vld [vmem:[#allocation3 + $0xd1] sm:$0xff] }
 0x3c8   : > { %12781 = vst [vmem:[#allocation67_spill] sm:$0xff] %v11888_v41 }
 0x3ca   : > { %9333 = vmatmul.mubr.msk.f32.gmra.mrb[8].mxu1 %vm257_vm0, %v11872_v9  ;;  %v11892_v9 = vld [vmem:[#allocation3 + $0xe9] sm:$0xff] }
 0x3cb   : > { %9335 = vmatprep.mubr.msk.f32.mxu1 %vm257_vm0, %v11876_v42  ;;  %12782 = vst [vmem:[#allocation42_spill] sm:$0xff] %v11892_v9  ;;  %v11896_v42 = vld [vmem:[#allocation3 + $0xf1] sm:$0xff] }
 0x3cc   : > { %12783 = vst [vmem:[#allocation43_spill] sm:$0xff] %v11896_v42 }
 0x3ce   : > { %9336 = vmatmul.mubr.msk.f32.gmra.mrb[10].mxu1 %vm257_vm0, %v11880_v34  ;;  %v11900_v34 = vld [vmem:[#allocation3 + $0x109] sm:$0xff] }
 0x3cf   : > { %9338 = vmatprep.mubr.msk.f32.mxu1 %vm257_vm0, %v11884_v28  ;;  %12784 = vst [vmem:[#allocation44_spill] sm:$0xff] %v11900_v34  ;;  %v11904_v28 = vld [vmem:[#allocation3 + $0x111] sm:$0xff] }
 0x3d0   : > { %12785 = vst [vmem:[#allocation45_spill] sm:$0xff] %v11904_v28 }
 0x3d2   : > { %9339 = vmatmul.mubr.msk.f32.gmra.mrb[12].mxu1 %vm257_vm0, %v11888_v41  ;;  %v11908_v41 = vld [vmem:[#allocation3 + $0x129] sm:$0xff] }
 0x3d3   : > { %9341 = vmatprep.mubr.msk.f32.mxu1 %vm257_vm0, %v11892_v9  ;;  %12786 = vst [vmem:[#allocation46_spill] sm:$0xff] %v11908_v41  ;;  %v11912_v9 = vld [vmem:[#allocation3 + $0x131] sm:$0xff] }
 0x3d4   : > { %12787 = vst [vmem:[#allocation47_spill] sm:$0xff] %v11912_v9 }
 0x3d6   : > { %9342 = vmatmul.mubr.msk.f32.gmra.mrb[14].mxu1 %vm257_vm0, %v11896_v42  ;;  %v11916_v42 = vld [vmem:[#allocation3 + $0x149] sm:$0xff] }
 0x3d7   : > { %9344 = vmatprep.mubr.msk.f32.mxu1 %vm257_vm0, %v11900_v34  ;;  %12788 = vst [vmem:[#allocation48_spill] sm:$0xff] %v11916_v42  ;;  %v11920_v34 = vld [vmem:[#allocation3 + $0x151] sm:$0xff] }
 0x3d8   : > { %12789 = vst [vmem:[#allocation49_spill] sm:$0xff] %v11920_v34 }
 0x3da   : > { %9345 = vmatmul.mubr.msk.f32.gmra.mrb[16].mxu1 %vm257_vm0, %v11904_v28  ;;  %v11924_v28 = vld [vmem:[#allocation3 + $0x169] sm:$0xff] }
 0x3db   : > { %9347 = vmatprep.mubr.msk.f32.mxu1 %vm257_vm0, %v11908_v41  ;;  %12790 = vst [vmem:[#allocation50_spill] sm:$0xff] %v11924_v28  ;;  %v11928_v41 = vld [vmem:[#allocation3 + $0x171] sm:$0xff] }
 0x3dc   : > { %12791 = vst [vmem:[#allocation51_spill] sm:$0xff] %v11928_v41 }
 0x3de   : > { %9348 = vmatmul.mubr.msk.f32.gmra.mrb[18].mxu1 %vm257_vm0, %v11912_v9  ;;  %v11932_v9 = vld [vmem:[#allocation3 + $0x189] sm:$0xff] }
 0x3df   : > { %9350 = vmatprep.mubr.msk.f32.mxu1 %vm257_vm0, %v11916_v42  ;;  %12792 = vst [vmem:[#allocation52_spill] sm:$0xff] %v11932_v9  ;;  %v11936_v42 = vld [vmem:[#allocation3 + $0x191] sm:$0xff] }
 0x3e0   : > { %12793 = vst [vmem:[#allocation53_spill] sm:$0xff] %v11936_v42 }
 0x3e2   : > { %9351 = vmatmul.mubr.msk.f32.gmra.mrb[20].mxu1 %vm257_vm0, %v11920_v34  ;;  %v11940_v34 = vld [vmem:[#allocation3 + $0x1a9] sm:$0xff] }
 0x3e3   : > { %9353 = vmatprep.mubr.msk.f32.mxu1 %vm257_vm0, %v11924_v28  ;;  %12794 = vst [vmem:[#allocation54_spill] sm:$0xff] %v11940_v34  ;;  %v11944_v28 = vld [vmem:[#allocation3 + $0x1b1] sm:$0xff] }
 0x3e6   : > { %9354 = vmatmul.mubr.msk.f32.gmra.mrb[22].mxu1 %vm257_vm0, %v11928_v41  ;;  %v11948_v41 = vld [vmem:[#allocation3 + $0x1c9] sm:$0xff] }
 0x3e7   : > { %9356 = vmatprep.mubr.msk.f32.mxu1 %vm257_vm0, %v11932_v9  ;;  %12795 = vst [vmem:[#allocation56_spill] sm:$0xff] %v11948_v41  ;;  %v11952_v9 = vld [vmem:[#allocation3 + $0x1d1] sm:$0xff] }
 0x3ea   : > { %9357 = vmatmul.mubr.msk.f32.gmra.mrb[24].mxu1 %vm257_vm0, %v11936_v42  ;;  %v11956_v42 = vld [vmem:[#allocation3 + $0x1e9] sm:$0xff] }
 0x3eb   : > { %9359 = vmatprep.mubr.msk.f32.mxu1 %vm257_vm0, %v11940_v34  ;;  %12796 = vst [vmem:[#allocation58_spill] sm:$0xff] %v11956_v42  ;;  %v11960_v34 = vld [vmem:[#allocation3 + $0x1f1] sm:$0xff] }
 0x3ee   : > { %9360 = vmatmul.mubr.msk.f32.gmra.mrb[26].mxu1 %vm257_vm0, %v11944_v28 }
 0x3ef   : > { %9362 = vmatprep.mubr.msk.f32.mxu1 %vm257_vm0, %v11948_v41  ;;  %v8037_v41 = vld [vmem:[%s12503_s3 + $0x28] sm:$0xff] }
 0x3f2   : > { %9363 = vmatmul.mubr.msk.f32.gmra.mrb[28].mxu1 %vm257_vm0, %v11952_v9 }
 0x3f3   : > { %9365 = vmatprep.mubr.msk.f32.mxu1 %vm257_vm0, %v11956_v42 }
 0x3f6   : > { %9366 = vmatmul.mubr.msk.f32.gmra.mrb[30].mxu1 %vm257_vm0, %v11960_v34 }
 0x3f7   : > { %9370 = vmatprep.mubr.msk.f32.mxu1 %vm257_vm0, %v11713_v63  ;;  %v12028_v63 = vld [vmem:[#allocation3 + $0x207] sm:$0xff] }
 0x3fa   : > { %9371 = vmatmul.mubr.msk.f32.vlgmr.msra.gmra.mrb[0].mxu1 %vm257_vm0, %v11719_v11  ;;  %v12032_v11 = vld [vmem:[#allocation3 + $0x20f] sm:$0xff] }
 0x3fb   : > { %9419 = vmatpush3.msra.mxu1 %v11839_v33  ;;  %9373 = vmatprep.mubr.msk.f32.mxu1 %vm257_vm0, %v11723_v14  ;;  %v8070_v33 = vld [vmem:[%s12503_s3 + $0x30] sm:$0xff] }
 0x3fc   : > { %9468 = vmatprep.subr.mxu1 %v8037_v41 }
 0x3fe   : > { %9374 = vmatmul.mubr.msk.f32.gmra.mrb[2].mxu1 %vm257_vm0, %v11727_v13 }
 0x3ff   : > { %9376 = vmatprep.mubr.msk.f32.mxu1 %vm257_vm0, %v11731_v54 }
 0x402   : > { %9377 = vmatmul.mubr.msk.f32.gmra.mrb[4].mxu1 %vm257_vm0, %v11735_v6 }
 0x403   : > { %9379 = vmatprep.mubr.msk.f32.mxu1 %vm257_vm0, %v11739_v15 }
 0x406   : > { %9380 = vmatmul.mubr.msk.f32.gmra.mrb[6].mxu1 %vm257_vm0, %v11743_v17 }
 0x407   : > { %9382 = vmatprep.mubr.msk.f32.mxu1 %vm257_vm0, %v11747_v18 }
 0x40a   : > { %9383 = vmatmul.mubr.msk.f32.gmra.mrb[8].mxu1 %vm257_vm0, %v11751_v19 }
 0x40b   : > { %9385 = vmatprep.mubr.msk.f32.mxu1 %vm257_vm0, %v11755_v21 }
 0x40e   : > { %9386 = vmatmul.mubr.msk.f32.gmra.mrb[10].mxu1 %vm257_vm0, %v11759_v25 }
 0x40f   : > { %9388 = vmatprep.mubr.msk.f32.mxu1 %vm257_vm0, %v11763_v26 }
 0x412   : > { %9389 = vmatmul.mubr.msk.f32.gmra.mrb[12].mxu1 %vm257_vm0, %v11767_v27 }
 0x413   : > { %9391 = vmatprep.mubr.msk.f32.mxu1 %vm257_vm0, %v11771_v31 }
 0x416   : > { %9392 = vmatmul.mubr.msk.f32.gmra.mrb[14].mxu1 %vm257_vm0, %v11775_v32 }
 0x417   : > { %9394 = vmatprep.mubr.msk.f32.mxu1 %vm257_vm0, %v11779_v39 }
 0x41a   : > { %9395 = vmatmul.mubr.msk.f32.gmra.mrb[16].mxu1 %vm257_vm0, %v11783_v43 }
 0x41b   : > { %9397 = vmatprep.mubr.msk.f32.mxu1 %vm257_vm0, %v11787_v44 }
 0x41e   : > { %9398 = vmatmul.mubr.msk.f32.gmra.mrb[18].mxu1 %vm257_vm0, %v11791_v45 }
 0x41f   : > { %9400 = vmatprep.mubr.msk.f32.mxu1 %vm257_vm0, %v11795_v47 }
 0x422   : > { %9401 = vmatmul.mubr.msk.f32.gmra.mrb[20].mxu1 %vm257_vm0, %v11799_v4 }
 0x423   : > { %9403 = vmatprep.mubr.msk.f32.mxu1 %vm257_vm0, %v11803_v50 }
 0x426   : > { %9404 = vmatmul.mubr.msk.f32.gmra.mrb[22].mxu1 %vm257_vm0, %v11807_v52 }
 0x427   : > { %9406 = vmatprep.mubr.msk.f32.mxu1 %vm257_vm0, %v11811_v56 }
 0x42a   : > { %9407 = vmatmul.mubr.msk.f32.gmra.mrb[24].mxu1 %vm257_vm0, %v11815_v58 }
 0x42b   : > { %9409 = vmatprep.mubr.msk.f32.mxu1 %vm257_vm0, %v11819_v59 }
 0x42e   : > { %9410 = vmatmul.mubr.msk.f32.gmra.mrb[26].mxu1 %vm257_vm0, %v11823_v60 }
 0x42f   : > { %9412 = vmatprep.mubr.msk.f32.mxu1 %vm257_vm0, %v11827_v62 }
 0x432   : > { %9413 = vmatmul.mubr.msk.f32.gmra.mrb[28].mxu1 %vm257_vm0, %v11831_v3 }
 0x433   : > { %9415 = vmatprep.mubr.msk.f32.mxu1 %vm257_vm0, %v12028_v63 }
 0x436   : > { %9416 = vmatmul.mubr.msk.f32.gmra.mrb[30].mxu1 %vm257_vm0, %v12032_v11 }
 0x437   : > { %9420 = vmatprep.mubr.msk.f32.mxu1 %vm257_vm0, %v11534_v35  ;;  %v12797_v35 = vld [vmem:[#allocation40_spill] sm:$0xff] }
 0x43a   : > { %9421 = vmatmul.mubr.msk.f32.vlgmr.msra.gmra.mrb[0].mxu1 %vm257_vm0, %v11540_v29  ;;  %v12798_v29 = vld [vmem:[#allocation41_spill] sm:$0xff] }
 0x43b   : > { %9469 = vmatpush3.msra.mxu1 %v8037_v41  ;;  %9423 = vmatprep.mubr.msk.f32.mxu1 %vm257_vm0, %v11546_v7  ;;  %v12099_v7 = vld [vmem:[#allocation3 + $0x208] sm:$0xff]  ;;  %v12806_v41 = vld [vmem:[#allocation35_spill] sm:$0xff] }
 0x43c   : > { %9518 = vmatprep.subr.mxu1 %v8070_v33 }
 0x43e   : > { %9424 = vmatmul.mubr.msk.f32.gmra.mrb[2].mxu1 %vm257_vm0, %v11552_v16  ;;  %v12103_v16 = vld [vmem:[#allocation3 + $0x210] sm:$0xff] }
 0x43f   : > { %9426 = vmatprep.mubr.msk.f32.mxu1 %vm257_vm0, %v11558_v22  ;;  %v12799_v22 = vld [vmem:[#allocation55_spill] sm:$0xff] }
 0x442   : > { %9427 = vmatmul.mubr.msk.f32.gmra.mrb[4].mxu1 %vm257_vm0, %v11564_v24  ;;  %v8103_v24 = vld [vmem:[%s12503_s3 + $0x38] sm:$0xff] }
 0x443   : > { %9429 = vmatprep.mubr.msk.f32.mxu1 %vm257_vm0, %v11570_v36  ;;  %v12800_v36 = vld [vmem:[#allocation57_spill] sm:$0xff] }
 0x446   : > { %9430 = vmatmul.mubr.msk.f32.gmra.mrb[6].mxu1 %vm257_vm0, %v11576_v38  ;;  %v12801_v38 = vld [vmem:[#allocation59_spill] sm:$0xff] }
 0x447   : > { %9432 = vmatprep.mubr.msk.f32.mxu1 %vm257_vm0, %v11582_v46  ;;  %v12802_v46 = vld [vmem:[#allocation60_spill] sm:$0xff] }
 0x44a   : > { %9433 = vmatmul.mubr.msk.f32.gmra.mrb[8].mxu1 %vm257_vm0, %v11588_v48  ;;  %v12803_v48 = vld [vmem:[#allocation62_spill] sm:$0xff] }
 0x44b   : > { %9435 = vmatprep.mubr.msk.f32.mxu1 %vm257_vm0, %v11594_v53  ;;  %v12804_v53 = vld [vmem:[#allocation64_spill] sm:$0xff] }
 0x44e   : > { %9436 = vmatmul.mubr.msk.f32.gmra.mrb[10].mxu1 %vm257_vm0, %v11600_v57  ;;  %v12805_v57 = vld [vmem:[#allocation34_spill] sm:$0xff] }
 0x44f   : > { %9438 = vmatprep.mubr.msk.f32.mxu1 %vm257_vm0, %v11606_v0 }
 0x452   : > { %9439 = vmatmul.mubr.msk.f32.gmra.mrb[12].mxu1 %vm257_vm0, %v11612_v10 }
 0x453   : > { %9441 = vmatprep.mubr.msk.f32.mxu1 %vm257_vm0, %v11618_v1 }
 0x456   : > { %9442 = vmatmul.mubr.msk.f32.gmra.mrb[14].mxu1 %vm257_vm0, %v11624_v30 }
 0x457   : > { %9444 = vmatprep.mubr.msk.f32.mxu1 %vm257_vm0, %v11630_v12 }
 0x45a   : > { %9445 = vmatmul.mubr.msk.f32.gmra.mrb[16].mxu1 %vm257_vm0, %v11636_v5 }
 0x45b   : > { %9447 = vmatprep.mubr.msk.f32.mxu1 %vm257_vm0, %v11642_v20 }
 0x45e   : > { %9448 = vmatmul.mubr.msk.f32.gmra.mrb[18].mxu1 %vm257_vm0, %v11648_v23 }
 0x45f   : > { %9450 = vmatprep.mubr.msk.f32.mxu1 %vm257_vm0, %v11654_v37 }
 0x462   : > { %9451 = vmatmul.mubr.msk.f32.gmra.mrb[20].mxu1 %vm257_vm0, %v11660_v40 }
 0x463   : > { %9453 = vmatprep.mubr.msk.f32.mxu1 %vm257_vm0, %v11666_v49 }
 0x466   : > { %9454 = vmatmul.mubr.msk.f32.gmra.mrb[22].mxu1 %vm257_vm0, %v11672_v51 }
 0x467   : > { %9456 = vmatprep.mubr.msk.f32.mxu1 %vm257_vm0, %v11678_v61 }
 0x46a   : > { %9457 = vmatmul.mubr.msk.f32.gmra.mrb[24].mxu1 %vm257_vm0, %v11684_v2 }
 0x46b   : > { %9459 = vmatprep.mubr.msk.f32.mxu1 %vm257_vm0, %v11689_v8 }
 0x46e   : > { %9460 = vmatmul.mubr.msk.f32.gmra.mrb[26].mxu1 %vm257_vm0, %v11694_v55 }
 0x46f   : > { %9462 = vmatprep.mubr.msk.f32.mxu1 %vm257_vm0, %v12797_v35 }
 0x472   : > { %9463 = vmatmul.mubr.msk.f32.gmra.mrb[28].mxu1 %vm257_vm0, %v12798_v29 }
 0x473   : > { %9465 = vmatprep.mubr.msk.f32.mxu1 %vm257_vm0, %v12099_v7 }
 0x476   : > { %9466 = vmatmul.mubr.msk.f32.gmra.mrb[30].mxu1 %vm257_vm0, %v12103_v16 }
 0x477   : > { %9470 = vmatprep.mubr.msk.f32.mxu1 %vm257_vm0, %v12799_v22  ;;  %v12808_v22 = vld [vmem:[#allocation37_spill] sm:$0xff] }
 0x47a   : > { %9471 = vmatmul.mubr.msk.f32.vlgmr.msra.gmra.mrb[0].mxu1 %vm257_vm0, %v12800_v36  ;;  %v12809_v36 = vld [vmem:[#allocation66_spill] sm:$0xff] }
 0x47b   : > { %9519 = vmatpush3.msra.mxu1 %v8070_v33  ;;  %9473 = vmatprep.mubr.msk.f32.mxu1 %vm257_vm0, %v12801_v38  ;;  %v12807_v33 = vld [vmem:[#allocation36_spill] sm:$0xff] }
 0x47c   : > { %9568 = vmatprep.subr.mxu1 %v8103_v24 }
 0x47e   : > { %9474 = vmatmul.mubr.msk.f32.gmra.mrb[2].mxu1 %vm257_vm0, %v12802_v46  ;;  %v12810_v46 = vld [vmem:[#allocation67_spill] sm:$0xff] }
 0x47f   : > { %9476 = vmatprep.mubr.msk.f32.mxu1 %vm257_vm0, %v12803_v48  ;;  %v12811_v48 = vld [vmem:[#allocation42_spill] sm:$0xff] }
 0x482   : > { %9477 = vmatmul.mubr.msk.f32.gmra.mrb[4].mxu1 %vm257_vm0, %v12804_v53  ;;  %v12812_v53 = vld [vmem:[#allocation43_spill] sm:$0xff] }
 0x483   : > { %9479 = vmatprep.mubr.msk.f32.mxu1 %vm257_vm0, %v12805_v57  ;;  %v12813_v57 = vld [vmem:[#allocation44_spill] sm:$0xff] }
 0x486   : > { %9480 = vmatmul.mubr.msk.f32.gmra.mrb[6].mxu1 %vm257_vm0, %v12806_v41  ;;  %v12814_v41 = vld [vmem:[#allocation45_spill] sm:$0xff] }
 0x487   : > { %9482 = vmatprep.mubr.msk.f32.mxu1 %vm257_vm0, %v12807_v33  ;;  %v12815_v33 = vld [vmem:[#allocation46_spill] sm:$0xff] }
 0x48a   : > { %9483 = vmatmul.mubr.msk.f32.gmra.mrb[8].mxu1 %vm257_vm0, %v12808_v22  ;;  %v12816_v22 = vld [vmem:[#allocation47_spill] sm:$0xff] }
 0x48b   : > { %9485 = vmatprep.mubr.msk.f32.mxu1 %vm257_vm0, %v12809_v36  ;;  %v12817_v36 = vld [vmem:[#allocation48_spill] sm:$0xff] }
 0x48e   : > { %9486 = vmatmul.mubr.msk.f32.gmra.mrb[10].mxu1 %vm257_vm0, %v12810_v46  ;;  %v12818_v46 = vld [vmem:[#allocation49_spill] sm:$0xff] }
 0x48f   : > { %9488 = vmatprep.mubr.msk.f32.mxu1 %vm257_vm0, %v12811_v48  ;;  %v12819_v48 = vld [vmem:[#allocation50_spill] sm:$0xff] }
 0x492   : > { %9489 = vmatmul.mubr.msk.f32.gmra.mrb[12].mxu1 %vm257_vm0, %v12812_v53  ;;  %v12820_v53 = vld [vmem:[#allocation51_spill] sm:$0xff] }
 0x493   : > { %9491 = vmatprep.mubr.msk.f32.mxu1 %vm257_vm0, %v12813_v57  ;;  %v12821_v57 = vld [vmem:[#allocation52_spill] sm:$0xff] }
 0x496   : > { %9492 = vmatmul.mubr.msk.f32.gmra.mrb[14].mxu1 %vm257_vm0, %v12814_v41  ;;  %v12822_v41 = vld [vmem:[#allocation53_spill] sm:$0xff] }
 0x497   : > { %9494 = vmatprep.mubr.msk.f32.mxu1 %vm257_vm0, %v12815_v33  ;;  %v12823_v33 = vld [vmem:[#allocation54_spill] sm:$0xff] }
 0x49a   : > { %9495 = vmatmul.mubr.msk.f32.gmra.mrb[16].mxu1 %vm257_vm0, %v12816_v22 }
 0x49b   : > { %9497 = vmatprep.mubr.msk.f32.mxu1 %vm257_vm0, %v12817_v36  ;;  %v12824_v36 = vld [vmem:[#allocation56_spill] sm:$0xff] }
 0x49e   : > { %9498 = vmatmul.mubr.msk.f32.gmra.mrb[18].mxu1 %vm257_vm0, %v12818_v46 }
 0x49f   : > { %9500 = vmatprep.mubr.msk.f32.mxu1 %vm257_vm0, %v12819_v48 }
 0x4a2   : > { %9501 = vmatmul.mubr.msk.f32.gmra.mrb[20].mxu1 %vm257_vm0, %v12820_v53 }
 0x4a3   : > { %9503 = vmatprep.mubr.msk.f32.mxu1 %vm257_vm0, %v12821_v57  ;;  %v12170_v57 = vld [vmem:[#allocation3 + $0x209] sm:$0xff] }
 0x4a6   : > { %9504 = vmatmul.mubr.msk.f32.gmra.mrb[22].mxu1 %vm257_vm0, %v12822_v41 }
 0x4a7   : > { %9506 = vmatprep.mubr.msk.f32.mxu1 %vm257_vm0, %v12823_v33  ;;  %v12174_v33 = vld [vmem:[#allocation3 + $0x211] sm:$0xff] }
 0x4aa   : > { %9507 = vmatmul.mubr.msk.f32.gmra.mrb[24].mxu1 %vm257_vm0, %v11944_v28 }
 0x4ab   : > { %9509 = vmatprep.mubr.msk.f32.mxu1 %vm257_vm0, %v12824_v36 }
 0x4ae   : > { %9510 = vmatmul.mubr.msk.f32.gmra.mrb[26].mxu1 %vm257_vm0, %v11952_v9 }
 0x4af   : > { %9512 = vmatprep.mubr.msk.f32.mxu1 %vm257_vm0, %v11956_v42  ;;  %v8136_v42 = vld [vmem:[%s12503_s3 + $0x40] sm:$0xff] }
 0x4b2   : > { %9513 = vmatmul.mubr.msk.f32.gmra.mrb[28].mxu1 %vm257_vm0, %v11960_v34 }
 0x4b3   : > { %9515 = vmatprep.mubr.msk.f32.mxu1 %vm257_vm0, %v12170_v57 }
 0x4b6   : > { %9516 = vmatmul.mubr.msk.f32.gmra.mrb[30].mxu1 %vm257_vm0, %v12174_v33 }
 0x4b7   : > { %9520 = vmatprep.mubr.msk.f32.mxu1 %vm257_vm0, %v11723_v14  ;;  %v6246_v14 = vld [vmem:[#allocation3 + $0x227] sm:$0xff] }
 0x4ba   : > { %9521 = vmatmul.mubr.msk.f32.vlgmr.msra.gmra.mrb[0].mxu1 %vm257_vm0, %v11727_v13  ;;  %v6247_v13 = vld [vmem:[#allocation3 + $0x22f] sm:$0xff] }
 0x4bb   : > { %9569 = vmatpush3.msra.mxu1 %v8103_v24  ;;  %9523 = vmatprep.mubr.msk.f32.mxu1 %vm257_vm0, %v11731_v54  ;;  %v6603_v54 = vld [vmem:[#allocation3 + $0x48] sm:$0xff] }
 0x4bc   : > { %9618 = vmatprep.subr.mxu1 %v8136_v42 }
 0x4be   : > { %9524 = vmatmul.mubr.msk.f32.gmra.mrb[2].mxu1 %vm257_vm0, %v11735_v6  ;;  %v6604_v6 = vld [vmem:[#allocation3 + $0x50] sm:$0xff] }
 0x4bf   : > { %9526 = vmatprep.mubr.msk.f32.mxu1 %vm257_vm0, %v11739_v15  ;;  %v6605_v15 = vld [vmem:[#allocation3 + $0x68] sm:$0xff] }
 0x4c2   : > { %9527 = vmatmul.mubr.msk.f32.gmra.mrb[4].mxu1 %vm257_vm0, %v11743_v17  ;;  %v6606_v17 = vld [vmem:[#allocation3 + $0x70] sm:$0xff] }
 0x4c3   : > { %9529 = vmatprep.mubr.msk.f32.mxu1 %vm257_vm0, %v11747_v18  ;;  %v6607_v18 = vld [vmem:[#allocation3 + $0x88] sm:$0xff] }
 0x4c6   : > { %9530 = vmatmul.mubr.msk.f32.gmra.mrb[6].mxu1 %vm257_vm0, %v11751_v19  ;;  %v6608_v19 = vld [vmem:[#allocation3 + $0x90] sm:$0xff] }
 0x4c7   : > { %9532 = vmatprep.mubr.msk.f32.mxu1 %vm257_vm0, %v11755_v21  ;;  %v6609_v21 = vld [vmem:[#allocation3 + $0xa8] sm:$0xff] }
 0x4ca   : > { %9533 = vmatmul.mubr.msk.f32.gmra.mrb[8].mxu1 %vm257_vm0, %v11759_v25  ;;  %v6610_v25 = vld [vmem:[#allocation3 + $0xb0] sm:$0xff] }
 0x4cb   : > { %9535 = vmatprep.mubr.msk.f32.mxu1 %vm257_vm0, %v11763_v26  ;;  %v6611_v26 = vld [vmem:[#allocation3 + $0xc8] sm:$0xff] }
 0x4ce   : > { %9536 = vmatmul.mubr.msk.f32.gmra.mrb[10].mxu1 %vm257_vm0, %v11767_v27  ;;  %v6612_v27 = vld [vmem:[#allocation3 + $0xd0] sm:$0xff] }
 0x4cf   : > { %9538 = vmatprep.mubr.msk.f32.mxu1 %vm257_vm0, %v11771_v31  ;;  %v12839_v31 = vld [vmem:[#allocation48_spill] sm:$0xff] }
 0x4d2   : > { %9539 = vmatmul.mubr.msk.f32.gmra.mrb[12].mxu1 %vm257_vm0, %v11775_v32  ;;  %v12840_v32 = vld [vmem:[#allocation52_spill] sm:$0xff] }
 0x4d3   : > { %9541 = vmatprep.mubr.msk.f32.mxu1 %vm257_vm0, %v11779_v39  ;;  %v12841_v39 = vld [vmem:[#allocation54_spill] sm:$0xff] }
 0x4d6   : > { %9542 = vmatmul.mubr.msk.f32.gmra.mrb[14].mxu1 %vm257_vm0, %v11783_v43  ;;  %v12842_v43 = vld [vmem:[#allocation58_spill] sm:$0xff] }
 0x4d7   : > { %9544 = vmatprep.mubr.msk.f32.mxu1 %vm257_vm0, %v11787_v44  ;;  %v7020_v44 = vld [vmem:[#allocation3 + $0x229] sm:$0xff] }
 0x4da   : > { %9545 = vmatmul.mubr.msk.f32.gmra.mrb[16].mxu1 %vm257_vm0, %v11791_v45  ;;  %v12360_v45 = vld [vmem:[%s12504_s4] ss:$0 sm:$0xff] }
 0x4db   : > { %9547 = vmatprep.mubr.msk.f32.mxu1 %vm257_vm0, %v11795_v47 }
 0x4de   : > { %9548 = vmatmul.mubr.msk.f32.gmra.mrb[18].mxu1 %vm257_vm0, %v11799_v4 }
 0x4df   : > { %9550 = vmatprep.mubr.msk.f32.mxu1 %vm257_vm0, %v11803_v50 }
 0x4e2   : > { %9551 = vmatmul.mubr.msk.f32.gmra.mrb[20].mxu1 %vm257_vm0, %v11807_v52 }
 0x4e3   : > { %9553 = vmatprep.mubr.msk.f32.mxu1 %vm257_vm0, %v11811_v56  ;;  %v12843_v56 = vld [vmem:[#allocation5_spill] sm:$0xff] }
 0x4e6   : > { %9554 = vmatmul.mubr.msk.f32.gmra.mrb[22].mxu1 %vm257_vm0, %v11815_v58 }
 0x4e7   : > { %9556 = vmatprep.mubr.msk.f32.mxu1 %vm257_vm0, %v11819_v59  ;;  %v12844_v59 = vld [vmem:[#allocation4_spill] sm:$0xff] }
 0x4ea   : > { %9557 = vmatmul.mubr.msk.f32.gmra.mrb[24].mxu1 %vm257_vm0, %v11823_v60 }
 0x4eb   : > { %9559 = vmatprep.mubr.msk.f32.mxu1 %vm257_vm0, %v11827_v62 }
 0x4ee   : > { %9560 = vmatmul.mubr.msk.f32.gmra.mrb[26].mxu1 %vm257_vm0, %v11831_v3 }
 0x4ef   : > { %9562 = vmatprep.mubr.msk.f32.mxu1 %vm257_vm0, %v12028_v63 }
 0x4f2   : > { %9563 = vmatmul.mubr.msk.f32.gmra.mrb[28].mxu1 %vm257_vm0, %v12032_v11  ;;  %v12845_v11 = vld [vmem:[#allocation7_spill] sm:$0xff] }
 0x4f3   : > { %9565 = vmatprep.mubr.msk.f32.mxu1 %vm257_vm0, %v6246_v14 }
 0x4f6   : > { %9566 = vmatmul.mubr.msk.f32.gmra.mrb[30].mxu1 %vm257_vm0, %v6247_v13 }
 0x4f7   : > { %9570 = vmatprep.mubr.msk.f32.mxu1 %vm257_vm0, %v6603_v54 }
 0x4fa   : > { %9571 = vmatmul.mubr.msk.f32.vlgmr.msra.gmra.mrb[0].mxu1 %vm257_vm0, %v6604_v6 }
 0x4fb   : > { %9619 = vmatpush3.msra.mxu1 %v8136_v42  ;;  %9573 = vmatprep.mubr.msk.f32.mxu1 %vm257_vm0, %v6605_v15 }
 0x4fe   : > { %9574 = vmatmul.mubr.msk.f32.gmra.mrb[2].mxu1 %vm257_vm0, %v6606_v17  ;;  %v12849_v17 = vld [vmem:[#allocation11_spill] sm:$0xff] }
 0x4ff   : > { %9576 = vmatprep.mubr.msk.f32.mxu1 %vm257_vm0, %v6607_v18 }
 0x502   : > { %9577 = vmatmul.mubr.msk.f32.gmra.mrb[4].mxu1 %vm257_vm0, %v6608_v19  ;;  %v12850_v19 = vld [vmem:[#allocation10_spill] sm:$0xff] }
 0x503   : > { %9579 = vmatprep.mubr.msk.f32.mxu1 %vm257_vm0, %v6609_v21 }
 0x506   : > { %9580 = vmatmul.mubr.msk.f32.gmra.mrb[6].mxu1 %vm257_vm0, %v6610_v25 }
 0x507   : > { %9582 = vmatprep.mubr.msk.f32.mxu1 %vm257_vm0, %v6611_v26 }
 0x50a   : > { %9583 = vmatmul.mubr.msk.f32.gmra.mrb[8].mxu1 %vm257_vm0, %v6612_v27 }
 0x50b   : > { %9585 = vmatprep.mubr.msk.f32.mxu1 %vm257_vm0, %v11606_v0  ;;  %v6633_v0 = vld [vmem:[#allocation3 + $0x228] sm:$0xff] }
 0x50e   : > { %9586 = vmatmul.mubr.msk.f32.gmra.mrb[10].mxu1 %vm257_vm0, %v11612_v10  ;;  %v6634_v10 = vld [vmem:[#allocation3 + $0x230] sm:$0xff] }
 0x50f   : > { %9588 = vmatprep.mubr.msk.f32.mxu1 %vm257_vm0, %v11618_v1  ;;  %v12825_v1 = vld [vmem:[#allocation60_spill] sm:$0xff] }
 0x512   : > { %9589 = vmatmul.mubr.msk.f32.gmra.mrb[12].mxu1 %vm257_vm0, %v11624_v30  ;;  %v12826_v30 = vld [vmem:[#allocation62_spill] sm:$0xff] }
 0x513   : > { %9591 = vmatprep.mubr.msk.f32.mxu1 %vm257_vm0, %v11630_v12  ;;  %v12827_v12 = vld [vmem:[#allocation64_spill] sm:$0xff] }
 0x516   : > { %9592 = vmatmul.mubr.msk.f32.gmra.mrb[14].mxu1 %vm257_vm0, %v11636_v5  ;;  %v12828_v5 = vld [vmem:[#allocation34_spill] sm:$0xff] }
 0x517   : > { %9594 = vmatprep.mubr.msk.f32.mxu1 %vm257_vm0, %v11642_v20  ;;  %v12829_v20 = vld [vmem:[#allocation35_spill] sm:$0xff] }
 0x51a   : > { %9595 = vmatmul.mubr.msk.f32.gmra.mrb[16].mxu1 %vm257_vm0, %v11648_v23  ;;  %v12830_v23 = vld [vmem:[#allocation36_spill] sm:$0xff] }
 0x51b   : > { %9597 = vmatprep.mubr.msk.f32.mxu1 %vm257_vm0, %v11654_v37  ;;  %v12831_v37 = vld [vmem:[#allocation37_spill] sm:$0xff] }
 0x51e   : > { %9598 = vmatmul.mubr.msk.f32.gmra.mrb[18].mxu1 %vm257_vm0, %v11660_v40  ;;  %v12832_v40 = vld [vmem:[#allocation66_spill] sm:$0xff] }
 0x51f   : > { %9600 = vmatprep.mubr.msk.f32.mxu1 %vm257_vm0, %v11666_v49  ;;  %v12833_v49 = vld [vmem:[#allocation67_spill] sm:$0xff] }
 0x522   : > { %9601 = vmatmul.mubr.msk.f32.gmra.mrb[20].mxu1 %vm257_vm0, %v11672_v51  ;;  %v12834_v51 = vld [vmem:[#allocation42_spill] sm:$0xff] }
 0x523   : > { %9603 = vmatprep.mubr.msk.f32.mxu1 %vm257_vm0, %v11678_v61  ;;  %v12835_v61 = vld [vmem:[#allocation43_spill] sm:$0xff] }
 0x526   : > { %9604 = vmatmul.mubr.msk.f32.gmra.mrb[22].mxu1 %vm257_vm0, %v11684_v2  ;;  %v12836_v2 = vld [vmem:[#allocation44_spill] sm:$0xff] }
 0x527   : > { %9606 = vmatprep.mubr.msk.f32.mxu1 %vm257_vm0, %v11689_v8  ;;  %v12837_v8 = vld [vmem:[#allocation45_spill] sm:$0xff] }
 0x52a   : > { %9607 = vmatmul.mubr.msk.f32.gmra.mrb[24].mxu1 %vm257_vm0, %v11694_v55  ;;  %v12838_v55 = vld [vmem:[#allocation46_spill] sm:$0xff] }
 0x52b   : > { %9609 = vmatprep.mubr.msk.f32.mxu1 %vm257_vm0, %v12797_v35 }
 0x52e   : > { %9610 = vmatmul.mubr.msk.f32.gmra.mrb[26].mxu1 %vm257_vm0, %v12798_v29  ;;  %v12846_v29 = vld [vmem:[#allocation6_spill] sm:$0xff] }
 0x52f   : > { %9612 = vmatprep.mubr.msk.f32.mxu1 %vm257_vm0, %v12099_v7 }
 0x532   : > { %9613 = vmatmul.mubr.msk.f32.gmra.mrb[28].mxu1 %vm257_vm0, %v12103_v16 }
 0x533   : > { %9615 = vmatprep.mubr.msk.f32.mxu1 %vm257_vm0, %v6633_v0 }
 0x536   : > { %9616 = vmatmul.mubr.msk.f32.gmra.mrb[30].mxu1 %vm257_vm0, %v6634_v10 }
 0x537   : > { %9620 = vmatprep.mubr.msk.f32.mxu1 %vm257_vm0, %v12801_v38 }
 0x53a   : > { %9621 = vmatmul.mubr.msk.f32.vlgmr.msra.gmra.mrb[0].mxu1 %vm257_vm0, %v12825_v1 }
 0x53b   : > { %9623 = vmatprep.mubr.msk.f32.mxu1 %vm257_vm0, %v12826_v30  ;;  %v12851_v30 = vld [vmem:[#allocation13_spill] sm:$0xff] }
 0x53e   : > { %9624 = vmatmul.mubr.msk.f32.gmra.mrb[2].mxu1 %vm257_vm0, %v12827_v12 }
 0x53f   : > { %9626 = vmatprep.mubr.msk.f32.mxu1 %vm257_vm0, %v12828_v5  ;;  %v12852_v5 = vld [vmem:[#allocation12_spill] sm:$0xff] }
 0x542   : > { %9627 = vmatmul.mubr.msk.f32.gmra.mrb[4].mxu1 %vm257_vm0, %v12829_v20 }
 0x543   : > { %9629 = vmatprep.mubr.msk.f32.mxu1 %vm257_vm0, %v12830_v23 }
 0x546   : > { %9630 = vmatmul.mubr.msk.f32.gmra.mrb[6].mxu1 %vm257_vm0, %v12831_v37 }
 0x547   : > { %9632 = vmatprep.mubr.msk.f32.mxu1 %vm257_vm0, %v12832_v40 }
 0x54a   : > { %9633 = vmatmul.mubr.msk.f32.gmra.mrb[8].mxu1 %vm257_vm0, %v12833_v49 }
 0x54b   : > { %9635 = vmatprep.mubr.msk.f32.mxu1 %vm257_vm0, %v12834_v51 }
 0x54e   : > { %9636 = vmatmul.mubr.msk.f32.gmra.mrb[10].mxu1 %vm257_vm0, %v12835_v61 }
 0x54f   : > { %9638 = vmatprep.mubr.msk.f32.mxu1 %vm257_vm0, %v12836_v2  ;;  %v12853_v2 = vld [vmem:[#allocation15_spill] sm:$0xff] }
 0x552   : > { %9639 = vmatmul.mubr.msk.f32.gmra.mrb[12].mxu1 %vm257_vm0, %v12837_v8 }
 0x553   : > { %9641 = vmatprep.mubr.msk.f32.mxu1 %vm257_vm0, %v12838_v55  ;;  %v12854_v55 = vld [vmem:[#allocation14_spill] sm:$0xff] }
 0x556   : > { %9642 = vmatmul.mubr.msk.f32.gmra.mrb[14].mxu1 %vm257_vm0, %v12816_v22 }
 0x557   : > { %9644 = vmatprep.mubr.msk.f32.mxu1 %vm257_vm0, %v12839_v31 }
 0x55a   : > { %9645 = vmatmul.mubr.msk.f32.gmra.mrb[16].mxu1 %vm257_vm0, %v12818_v46 }
 0x55b   : > { %9647 = vmatprep.mubr.msk.f32.mxu1 %vm257_vm0, %v12819_v48 }
 0x55e   : > { %9648 = vmatmul.mubr.msk.f32.gmra.mrb[18].mxu1 %vm257_vm0, %v12820_v53 }
 0x55f   : > { %9650 = vmatprep.mubr.msk.f32.mxu1 %vm257_vm0, %v12840_v32 }
 0x562   : > { %9651 = vmatmul.mubr.msk.f32.gmra.mrb[20].mxu1 %vm257_vm0, %v12822_v41 }
 0x563   : > { %9653 = vmatprep.mubr.msk.f32.mxu1 %vm257_vm0, %v12841_v39 }
 0x566   : > { %9654 = vmatmul.mubr.msk.f32.gmra.mrb[22].mxu1 %vm257_vm0, %v11944_v28  ;;  %v7021_v28 = vld [vmem:[#allocation3 + $0x231] sm:$0xff] }
 0x567   : > { %9656 = vmatprep.mubr.msk.f32.mxu1 %vm257_vm0, %v12824_v36 }
 0x56a   : > { %9657 = vmatmul.mubr.msk.f32.gmra.mrb[24].mxu1 %vm257_vm0, %v11952_v9 }
 0x56b   : > { %9659 = vmatprep.mubr.msk.f32.mxu1 %vm257_vm0, %v12842_v43 }
 0x56e   : > { %9660 = vmatmul.mubr.msk.f32.gmra.mrb[26].mxu1 %vm257_vm0, %v11960_v34 }
 0x56f   : > { %9662 = vmatprep.mubr.msk.f32.mxu1 %vm257_vm0, %v12170_v57  ;;  %v12847_v57 = vld [vmem:[#allocation9_spill] sm:$0xff] }
 0x572   : > { %9663 = vmatmul.mubr.msk.f32.gmra.mrb[28].mxu1 %vm257_vm0, %v12174_v33  ;;  %v12848_v33 = vld [vmem:[#allocation8_spill] sm:$0xff] }
 0x573   : > { %9665 = vmatprep.mubr.msk.f32.mxu1 %vm257_vm0, %v7020_v44 }
 0x576   : > { %9666 = vmatmul.mubr.msk.f32.gmra.mrb[30].mxu1 %vm257_vm0, %v7021_v28 }
 0x60d   : > { %v9622_v47 = vpop.f32.mrb[0].mxu1 }
 0x60e   : > { %v7385_v4 = vadd.f32 %v9622_v47, %v12360_v45  ;;  %v7186_v50 = vpop.f32.mrb[1].mxu1 }
 0x60f   : > { %v7384_v52 = vadd.f32 %v12360_v45, %v7186_v50 }
 0x610   : > { %v7417_v58 = vadd.f32 %v7385_v4, %v12843_v56  ;;  %v12855_v4 = vld [vmem:[#allocation17_spill] sm:$0xff] }
 0x611   : > { %v7416_v60 = vadd.f32 %v7384_v52, %v12844_v59  ;;  %v9625_v62 = vpop.f32.mrb[2].mxu1  ;;  %v12856_v52 = vld [vmem:[#allocation16_spill] sm:$0xff] }
 0x612   : > { %v7449_v3 = vmax.f32 %v7417_v58, 0.0  ;;  %v7387_v9 = vadd.f32 %v9625_v62, %v12360_v45  ;;  %v7196_v42 = vpop.f32.mrb[3].mxu1 }
 0x613   : > { %v7448_v34 = vmax.f32 %v7416_v60, 0.0  ;;  %v7386_v63 = vadd.f32 %v12360_v45, %v7196_v42  ;;  %v12857_v42 = vld [vmem:[#allocation19_spill] sm:$0xff] }
 0x614   : > { %7481 = vst.msk [vmem:[%s12370_s22 + $0x8] sm:$0xff] %vm257_vm0, %v7449_v3  ;;  %v7419_v35 = vadd.f32 %v7387_v9, %v12845_v11 }
 0x615   : > { %7480 = vst.msk [vmem:[%s12370_s22] sm:$0xff] %vm257_vm0, %v7448_v34  ;;  %v7418_v7 = vadd.f32 %v7386_v63, %v12846_v29  ;;  %v9628_v16 = vpop.f32.mrb[4].mxu1  ;;  %v12858_v63 = vld [vmem:[#allocation18_spill] sm:$0xff] }
 0x616   : > { %v7451_v24 = vmax.f32 %v7419_v35, 0.0  ;;  %v7389_v38 = vadd.f32 %v9628_v16, %v12360_v45  ;;  %v7206_v46 = vpop.f32.mrb[5].mxu1 }
 0x617   : > { %v7450_v48 = vmax.f32 %v7418_v7, 0.0  ;;  %v7388_v53 = vadd.f32 %v12360_v45, %v7206_v46  ;;  %v12859_v46 = vld [vmem:[#allocation21_spill] sm:$0xff] }
 0x618   : > { %7483 = vst.msk [vmem:[%s12370_s22 + $0x18] sm:$0xff] %vm257_vm0, %v7451_v24  ;;  %v7421_v41 = vadd.f32 %v7389_v38, %v12847_v57 }
 0x619   : > { %7482 = vst.msk [vmem:[%s12370_s22 + $0x10] sm:$0xff] %vm257_vm0, %v7450_v48  ;;  %v7420_v22 = vadd.f32 %v7388_v53, %v12848_v33  ;;  %v9631_v36 = vpop.f32.mrb[6].mxu1  ;;  %v12860_v53 = vld [vmem:[#allocation20_spill] sm:$0xff] }
 0x61a   : > { %v7453_v14 = vmax.f32 %v7421_v41, 0.0  ;;  %v7391_v13 = vadd.f32 %v9631_v36, %v12360_v45  ;;  %v7216_v54 = vpop.f32.mrb[7].mxu1 }
 0x61b   : > { %v7452_v6 = vmax.f32 %v7420_v22, 0.0  ;;  %v7390_v15 = vadd.f32 %v12360_v45, %v7216_v54  ;;  %v12861_v54 = vld [vmem:[#allocation23_spill] sm:$0xff] }
 0x61c   : > { %7485 = vst.msk [vmem:[%s12370_s22 + $0x28] sm:$0xff] %vm257_vm0, %v7453_v14  ;;  %v7423_v18 = vadd.f32 %v7391_v13, %v12849_v17 }
 0x61d   : > { %7484 = vst.msk [vmem:[%s12370_s22 + $0x20] sm:$0xff] %vm257_vm0, %v7452_v6  ;;  %v7422_v21 = vadd.f32 %v7390_v15, %v12850_v19  ;;  %v9634_v25 = vpop.f32.mrb[8].mxu1  ;;  %v12862_v15 = vld [vmem:[#allocation22_spill] sm:$0xff] }
 0x61e   : > { %v7455_v26 = vmax.f32 %v7423_v18, 0.0  ;;  %v7393_v27 = vadd.f32 %v9634_v25, %v12360_v45  ;;  %v7226_v0 = vpop.f32.mrb[9].mxu1 }
 0x61f   : > { %v7454_v10 = vmax.f32 %v7422_v21, 0.0  ;;  %v7392_v1 = vadd.f32 %v12360_v45, %v7226_v0  ;;  %v12863_v0 = vld [vmem:[#allocation25_spill] sm:$0xff] }
 0x620   : > { %7487 = vst.msk [vmem:[%s12370_s22 + $0x38] sm:$0xff] %vm257_vm0, %v7455_v26  ;;  %v7425_v12 = vadd.f32 %v7393_v27, %v12851_v30 }
 0x621   : > { %7486 = vst.msk [vmem:[%s12370_s22 + $0x30] sm:$0xff] %vm257_vm0, %v7454_v10  ;;  %v7424_v20 = vadd.f32 %v7392_v1, %v12852_v5  ;;  %v9637_v23 = vpop.f32.mrb[10].mxu1  ;;  %v12864_v1 = vld [vmem:[#allocation24_spill] sm:$0xff] }
 0x622   : > { %v7457_v37 = vmax.f32 %v7425_v12, 0.0  ;;  %v7395_v40 = vadd.f32 %v9637_v23, %v12360_v45  ;;  %v7236_v49 = vpop.f32.mrb[11].mxu1 }
 0x623   : > { %v7456_v51 = vmax.f32 %v7424_v20, 0.0  ;;  %v7394_v61 = vadd.f32 %v12360_v45, %v7236_v49  ;;  %v12865_v49 = vld [vmem:[#allocation27_spill] sm:$0xff] }
 0x624   : > { %7489 = vst.msk [vmem:[%s12370_s22 + $0x48] sm:$0xff] %vm257_vm0, %v7457_v37  ;;  %v7427_v8 = vadd.f32 %v7395_v40, %v12853_v2 }
 0x625   : > { %7488 = vst.msk [vmem:[%s12370_s22 + $0x40] sm:$0xff] %vm257_vm0, %v7456_v51  ;;  %v7426_v31 = vadd.f32 %v7394_v61, %v12854_v55  ;;  %v9640_v32 = vpop.f32.mrb[12].mxu1  ;;  %v12866_v61 = vld [vmem:[#allocation26_spill] sm:$0xff] }
 0x626   : > { %v7459_v39 = vmax.f32 %v7427_v8, 0.0  ;;  %v7397_v43 = vadd.f32 %v9640_v32, %v12360_v45  ;;  %v7246_v44 = vpop.f32.mrb[13].mxu1 }
 0x627   : > { %v7458_v28 = vmax.f32 %v7426_v31, 0.0  ;;  %v7396_v47 = vadd.f32 %v12360_v45, %v7246_v44  ;;  %v12867_v44 = vld [vmem:[#allocation29_spill] sm:$0xff] }
 0x628   : > { %7491 = vst.msk [vmem:[%s12370_s22 + $0x58] sm:$0xff] %vm257_vm0, %v7459_v39  ;;  %v7429_v50 = vadd.f32 %v7397_v43, %v12855_v4 }
 0x629   : > { %7490 = vst.msk [vmem:[%s12370_s22 + $0x50] sm:$0xff] %vm257_vm0, %v7458_v28  ;;  %v7428_v56 = vadd.f32 %v7396_v47, %v12856_v52  ;;  %v9643_v58 = vpop.f32.mrb[14].mxu1  ;;  %v12868_v47 = vld [vmem:[#allocation28_spill] sm:$0xff] }
 0x62a   : > { %v7461_v59 = vmax.f32 %v7429_v50, 0.0  ;;  %v7399_v60 = vadd.f32 %v9643_v58, %v12360_v45  ;;  %v7256_v62 = vpop.f32.mrb[15].mxu1 }
 0x62b   : > { %v7460_v3 = vmax.f32 %v7428_v56, 0.0  ;;  %v7398_v9 = vadd.f32 %v12360_v45, %v7256_v62  ;;  %v12869_v62 = vld [vmem:[#allocation31_spill] sm:$0xff] }
 0x62c   : > { %7493 = vst.msk [vmem:[%s12370_s22 + $0x68] sm:$0xff] %vm257_vm0, %v7461_v59  ;;  %v7431_v34 = vadd.f32 %v7399_v60, %v12857_v42 }
 0x62d   : > { %7492 = vst.msk [vmem:[%s12370_s22 + $0x60] sm:$0xff] %vm257_vm0, %v7460_v3  ;;  %v7430_v11 = vadd.f32 %v7398_v9, %v12858_v63  ;;  %v9646_v35 = vpop.f32.mrb[16].mxu1  ;;  %v12870_v9 = vld [vmem:[#allocation30_spill] sm:$0xff] }
 0x62e   : > { %v7463_v29 = vmax.f32 %v7431_v34, 0.0  ;;  %v7401_v7 = vadd.f32 %v9646_v35, %v12360_v45  ;;  %v7266_v16 = vpop.f32.mrb[17].mxu1 }
 0x62f   : > { %v7462_v24 = vmax.f32 %v7430_v11, 0.0  ;;  %v7400_v38 = vadd.f32 %v12360_v45, %v7266_v16  ;;  %v12871_v16 = vld [vmem:[#allocation33_spill] sm:$0xff] }
 0x630   : > { %7495 = vst.msk [vmem:[%s12370_s22 + $0x78] sm:$0xff] %vm257_vm0, %v7463_v29  ;;  %v7433_v48 = vadd.f32 %v7401_v7, %v12859_v46 }
 0x631   : > { %7494 = vst.msk [vmem:[%s12370_s22 + $0x70] sm:$0xff] %vm257_vm0, %v7462_v24  ;;  %v7432_v57 = vadd.f32 %v7400_v38, %v12860_v53  ;;  %v9649_v41 = vpop.f32.mrb[18].mxu1  ;;  %v12872_v38 = vld [vmem:[#allocation32_spill] sm:$0xff] }
 0x632   : > { %v7465_v33 = vmax.f32 %v7433_v48, 0.0  ;;  %v7403_v22 = vadd.f32 %v9649_v41, %v12360_v45  ;;  %v7276_v36 = vpop.f32.mrb[19].mxu1 }
 0x633   : > { %v7464_v14 = vmax.f32 %v7432_v57, 0.0  ;;  %v7402_v13 = vadd.f32 %v12360_v45, %v7276_v36  ;;  %v12873_v36 = vld [vmem:[#allocation39_spill] sm:$0xff] }
 0x634   : > { %7497 = vst.msk [vmem:[%s12370_s22 + $0x88] sm:$0xff] %vm257_vm0, %v7465_v33  ;;  %v7435_v6 = vadd.f32 %v7403_v22, %v12861_v54 }
 0x635   : > { %7496 = vst.msk [vmem:[%s12370_s22 + $0x80] sm:$0xff] %vm257_vm0, %v7464_v14  ;;  %v7434_v17 = vadd.f32 %v7402_v13, %v12862_v15  ;;  %v9652_v18 = vpop.f32.mrb[20].mxu1  ;;  %v12874_v13 = vld [vmem:[#allocation38_spill] sm:$0xff] }
 0x636   : > { %v7467_v19 = vmax.f32 %v7435_v6, 0.0  ;;  %v7405_v21 = vadd.f32 %v9652_v18, %v12360_v45  ;;  %v7286_v25 = vpop.f32.mrb[21].mxu1 }
 0x637   : > { %v7466_v26 = vmax.f32 %v7434_v17, 0.0  ;;  %v7404_v27 = vadd.f32 %v12360_v45, %v7286_v25 }
 0x638   : > { %7499 = vst.msk [vmem:[%s12370_s22 + $0x98] sm:$0xff] %vm257_vm0, %v7467_v19  ;;  %v7437_v10 = vadd.f32 %v7405_v21, %v12863_v0 }
 0x639   : > { %7498 = vst.msk [vmem:[%s12370_s22 + $0x90] sm:$0xff] %vm257_vm0, %v7466_v26  ;;  %v7436_v30 = vadd.f32 %v7404_v27, %v12864_v1  ;;  %v9655_v12 = vpop.f32.mrb[22].mxu1 }
 0x63a   : > { %v7469_v5 = vmax.f32 %v7437_v10, 0.0  ;;  %v7407_v20 = vadd.f32 %v9655_v12, %v12360_v45  ;;  %v7296_v23 = vpop.f32.mrb[23].mxu1 }
 0x63b   : > { %v7468_v37 = vmax.f32 %v7436_v30, 0.0  ;;  %v7406_v40 = vadd.f32 %v12360_v45, %v7296_v23 }
 0x63c   : > { %7501 = vst.msk [vmem:[%s12370_s22 + $0xa8] sm:$0xff] %vm257_vm0, %v7469_v5  ;;  %v7439_v51 = vadd.f32 %v7407_v20, %v12865_v49 }
 0x63d   : > { %7500 = vst.msk [vmem:[%s12370_s22 + $0xa0] sm:$0xff] %vm257_vm0, %v7468_v37  ;;  %v7438_v2 = vadd.f32 %v7406_v40, %v12866_v61  ;;  %v9658_v8 = vpop.f32.mrb[24].mxu1 }
 0x63e   : > { %v7471_v55 = vmax.f32 %v7439_v51, 0.0  ;;  %v7409_v31 = vadd.f32 %v9658_v8, %v12360_v45  ;;  %v7306_v32 = vpop.f32.mrb[25].mxu1 }
 0x63f   : > { %v7470_v39 = vmax.f32 %v7438_v2, 0.0  ;;  %v7408_v43 = vadd.f32 %v12360_v45, %v7306_v32 }
 0x640   : > { %7503 = vst.msk [vmem:[%s12370_s22 + $0xb8] sm:$0xff] %vm257_vm0, %v7471_v55  ;;  %v7441_v28 = vadd.f32 %v7409_v31, %v12867_v44 }
 0x641   : > { %7502 = vst.msk [vmem:[%s12370_s22 + $0xb0] sm:$0xff] %vm257_vm0, %v7470_v39  ;;  %v7440_v4 = vadd.f32 %v7408_v43, %v12868_v47  ;;  %v9661_v50 = vpop.f32.mrb[26].mxu1 }
 0x642   : > { %v7473_v52 = vmax.f32 %v7441_v28, 0.0  ;;  %v7411_v56 = vadd.f32 %v9661_v50, %v12360_v45  ;;  %v7316_v58 = vpop.f32.mrb[27].mxu1 }
 0x643   : > { %v7472_v59 = vmax.f32 %v7440_v4, 0.0  ;;  %v7410_v60 = vadd.f32 %v12360_v45, %v7316_v58 }
 0x644   : > { %7505 = vst.msk [vmem:[%s12370_s22 + $0xc8] sm:$0xff] %vm257_vm0, %v7473_v52  ;;  %v7443_v3 = vadd.f32 %v7411_v56, %v12869_v62 }
 0x645   : > { %7504 = vst.msk [vmem:[%s12370_s22 + $0xc0] sm:$0xff] %vm257_vm0, %v7472_v59  ;;  %v7442_v42 = vadd.f32 %v7410_v60, %v12870_v9  ;;  %v9664_v34 = vpop.f32.mrb[28].mxu1 }
 0x646   : > { %v7475_v63 = vmax.f32 %v7443_v3, 0.0  ;;  %v7413_v11 = vadd.f32 %v9664_v34, %v12360_v45  ;;  %v7326_v35 = vpop.f32.mrb[29].mxu1 }
 0x647   : > { %v7474_v29 = vmax.f32 %v7442_v42, 0.0  ;;  %v7412_v7 = vadd.f32 %v12360_v45, %v7326_v35 }
 0x648   : > { %7507 = vst.msk [vmem:[%s12370_s22 + $0xd8] sm:$0xff] %vm257_vm0, %v7475_v63  ;;  %v7445_v24 = vadd.f32 %v7413_v11, %v12871_v16 }
 0x649   : > { %7506 = vst.msk [vmem:[%s12370_s22 + $0xd0] sm:$0xff] %vm257_vm0, %v7474_v29  ;;  %v7444_v46 = vadd.f32 %v7412_v7, %v12872_v38  ;;  %v9667_v48 = vpop.f32.mrb[30].mxu1 }
 0x64a   : > { %v7477_v53 = vmax.f32 %v7445_v24, 0.0  ;;  %v7415_v57 = vadd.f32 %v9667_v48, %v12360_v45  ;;  %v7336_v41 = vpop.f32.mrb[31].mxu1 }
 0x64b   : > { %v7476_v33 = vmax.f32 %v7444_v46, 0.0  ;;  %v7414_v22 = vadd.f32 %v12360_v45, %v7336_v41 }
 0x64c   : > { %7509 = vst.msk [vmem:[%s12370_s22 + $0xe8] sm:$0xff] %vm257_vm0, %v7477_v53  ;;  %v7447_v14 = vadd.f32 %v7415_v57, %v12873_v36 }
 0x64d   : > { %7508 = vst.msk [vmem:[%s12370_s22 + $0xe0] sm:$0xff] %vm257_vm0, %v7476_v33  ;;  %v7446_v54 = vadd.f32 %v7414_v22, %v12874_v13 }
 0x64e   : > { %v7479_v6 = vmax.f32 %v7447_v14, 0.0 }
 0x64f   : > { %v7478_v15 = vmax.f32 %v7446_v54, 0.0 }
 0x650   : > { %7511 = vst.msk [vmem:[%s12370_s22 + $0xf8] sm:$0xff] %vm257_vm0, %v7479_v6 }
 0x651   : > { %7510 = vst.msk [vmem:[%s12370_s22 + $0xf0] sm:$0xff] %vm257_vm0, %v7478_v15 }
 0x652 PF: > { %s15_s18 = sadd.s32 1, %s10195_s18  }
 0x653   : > { %p12_p4 = scmp.ge.s32.totalorder %s15_s18, 4  }
 0x655   :  { %14 = sbr.rel (!%p12_p4) target bundleno = 1 (0x1), region = 90 }

</bundles_post_ra>
